<compile_context>
chip_gen: v5e
topology: v5e:2x2
jax: 0.10.0
libtpu: 0.0.40
codegen_flags: <defaults>
</compile_context>

<pallas_src>
import functools

import jax
import jax.numpy as jnp
from jax.experimental import pallas as pl
from jax.experimental.pallas import tpu as pltpu

IMAGENET_MEAN = jnp.array([0.485, 0.456, 0.406], jnp.float32)
IMAGENET_STD = jnp.array([0.229, 0.224, 0.225], jnp.float32)


# ---------------------------------------------------------------------------
# Pallas kernels
# ---------------------------------------------------------------------------
def _conv_bn_kernel(slab_ref, w_ref, shift_ref, o_ref, *, relu, W, TRW):
    """3x3 conv as 3 accumulated row-shifted matmuls + folded-BN epilogue.

    slab_ref : (1, Mp + 2*W, 3*Cin)  bf16 per-image dx-im2col slab (whole image)
    w_ref    : (3, 3*Cin, Cout_p)    bf16 per-dy weight slices (BN scale folded in)
    shift_ref: (1, Cout_p)           f32 folded conv-bias/BN shift
    o_ref    : (1, TRW, Cout_p)      one block of flattened output pixels
    """
    base = pl.multiple_of(pl.program_id(1) * TRW, TRW)
    acc = None
    for dy in range(3):                         # unrolled; dy*W is static
        lhs = slab_ref[0, pl.ds(base + dy * W, TRW), :]
        part = jnp.dot(lhs, w_ref[dy], preferred_element_type=jnp.float32)
        acc = part if acc is None else acc + part
    y = acc + shift_ref[...]
    if relu:
        y = jnp.maximum(y, 0.0)
    o_ref[0] = y.astype(o_ref.dtype)


def _sqdiff_kernel(a_ref, b_ref, o_ref):
    """Accumulates sum((a-b)^2) over the 'arbitrary' grid axis into (1,1,1)."""
    @pl.when(pl.program_id(1) == 0)
    def _():
        o_ref[...] = jnp.zeros_like(o_ref)
    d = a_ref[...] - b_ref[...]
    o_ref[...] += jnp.sum(d * d)


# ---------------------------------------------------------------------------
# Wrappers
# ---------------------------------------------------------------------------
def _row_tile(m):
    if m >= 512:
        return 512
    if m >= 256:
        return 256
    return 128


def conv3x3_bn(x, w, b, gamma, beta, mean, var, *, relu,
               out_dtype=jnp.float32, eps=1e-5):
    """3x3 / stride-1 / pad-1 conv fused with eval-mode BatchNorm2d (+ReLU).

    x: (N, H, W, Cin) NHWC.  w: (Cout, Cin, 3, 3) PyTorch layout.
    Returns (N, H, W, Cout) in `out_dtype`.
    """
    N, H, W, Cin = x.shape
    Cout = w.shape[0]
    Cout_p = pl.cdiv(Cout, 128) * 128            # lane-dense output channels
    K = 3 * Cin

    # Fold conv bias + eval-BN: scale goes into the weights, rest into a shift.
    scale = gamma / jnp.sqrt(var + eps)
    shift = (beta + scale * (b - mean)).reshape(1, Cout).astype(jnp.float32)
    # (Cout, Cin, 3, 3) -> (dy, dx, Cin, Cout) -> (3, 3*Cin, Cout)
    w3 = jnp.transpose(w * scale[:, None, None, None], (2, 3, 1, 0))
    w3 = w3.reshape(3, K, Cout)
    if Cout_p != Cout:
        w3 = jnp.pad(w3, ((0, 0), (0, 0), (0, Cout_p - Cout)))
        shift = jnp.pad(shift, ((0, 0), (0, Cout_p - Cout)))
    w3 = w3.astype(jnp.bfloat16)

    # dx-only im2col (3x, not 9x): slab[n, yp*W + x, dx*Cin + c] = xpad[n, yp, x+dx, c]
    xp = jnp.pad(x.astype(jnp.bfloat16), ((0, 0), (1, 1), (1, 1), (0, 0)))
    slab = jnp.concatenate([xp[:, :, dx:dx + W, :] for dx in range(3)], axis=-1)
    slab = slab.reshape(N, (H + 2) * W, K)

    M = H * W
    TRW = _row_tile(M)                           # 128/256/512 output pixels per step
    Mp = pl.cdiv(M, TRW) * TRW
    if Mp != M:                                  # pad rows; padded rows sliced off below
        slab = jnp.pad(slab, ((0, 0), (0, Mp - M), (0, 0)))

    # TODO(synk): at large image sizes the per-image slab should be row-blocked
    # with manual halo DMA instead of kept whole in VMEM per grid step.
    out = pl.pallas_call(
        functools.partial(_conv_bn_kernel, relu=relu, W=W, TRW=TRW),
        out_shape=jax.ShapeDtypeStruct((N, Mp, Cout_p), out_dtype),
        grid_spec=pltpu.PrefetchScalarGridSpec(
            num_scalar_prefetch=0,
            grid=(N, Mp // TRW),
            in_specs=[
                pl.BlockSpec((1, Mp + 2 * W, K), lambda n, r: (n, 0, 0)),
                pl.BlockSpec((3, K, Cout_p), lambda n, r: (0, 0, 0)),
                pl.BlockSpec((1, Cout_p), lambda n, r: (0, 0)),
            ],
            out_specs=pl.BlockSpec((1, TRW, Cout_p), lambda n, r: (n, r, 0)),
        ),
        compiler_params=pltpu.CompilerParams(
            dimension_semantics=("parallel", "parallel")),
    )(slab, w3, shift)

    return out[:, :M, :Cout].reshape(N, H, W, Cout)


def mse_loss(a, b):
    """Equivalent to torch.nn.MSELoss() (mean over all elements), tiled."""
    n_elem = a.size
    C = 128                                      # lane width
    P = 2                                        # parallel partitions (2 TCs on v7x)
    rows = pl.cdiv(n_elem, C)
    rows_per_p = pl.cdiv(rows, P)
    TR = min(512, pl.cdiv(rows_per_p, 8) * 8)    # sublane-aligned row tile
    S = pl.cdiv(rows_per_p, TR)
    total = P * S * TR * C

    af = a.reshape(-1).astype(jnp.float32)
    bf = b.reshape(-1).astype(jnp.float32)
    if total != n_elem:                          # identical zero pad -> diff contributes 0
        af = jnp.pad(af, (0, total - n_elem))
        bf = jnp.pad(bf, (0, total - n_elem))
    a3 = af.reshape(P, S * TR, C)
    b3 = bf.reshape(P, S * TR, C)

    parts = pl.pallas_call(
        _sqdiff_kernel,
        out_shape=jax.ShapeDtypeStruct((P, 1, 1), jnp.float32),
        grid_spec=pltpu.PrefetchScalarGridSpec(
            num_scalar_prefetch=0,
            grid=(P, S),
            in_specs=[
                pl.BlockSpec((1, TR, C), lambda p, s: (p, s, 0)),
                pl.BlockSpec((1, TR, C), lambda p, s: (p, s, 0)),
            ],
            out_specs=pl.BlockSpec((1, 1, 1), lambda p, s: (p, 0, 0)),
        ),
        compiler_params=pltpu.CompilerParams(
            dimension_semantics=("parallel", "arbitrary")),
    )(a3, b3)
    return jnp.sum(parts) / n_elem


def maxpool2x2(x):
    # glue: 2x2 / stride-2 max pool on NHWC (not a hot path at these sizes)
    N, H, W, C = x.shape
    return jnp.max(x.reshape(N, H // 2, 2, W // 2, 2, C), axis=(2, 4))


# ---------------------------------------------------------------------------
# Synthetic (deterministic) truncated vgg16_bn.features parameters.
# Needed layers for blocks=[0,1]:
#   conv0(3->64)+bn1+relu, conv3(64->64)+bn4[hook], relu, maxpool,
#   conv7(64->128)+bn8+relu, conv10(128->128)+bn11[hook]
# ---------------------------------------------------------------------------
def init_params(key):
    specs = [("conv0", 3, 64), ("conv3", 64, 64),
             ("conv7", 64, 128), ("conv10", 128, 128)]
    params = {}
    for i, (name, cin, cout) in enumerate(specs):
        k = jax.random.fold_in(key, i)
        kw, kb, kg, kbt, km, kv = jax.random.split(k, 6)
        params[name] = dict(
            w=0.1 * jax.random.normal(kw, (cout, cin, 3, 3), jnp.float32),
            b=0.05 * jax.random.normal(kb, (cout,), jnp.float32),
            gamma=1.0 + 0.05 * jax.random.normal(kg, (cout,), jnp.float32),
            beta=0.05 * jax.random.normal(kbt, (cout,), jnp.float32),
            mean=0.05 * jax.random.normal(km, (cout,), jnp.float32),
            var=0.5 + jax.random.uniform(kv, (cout,), jnp.float32),
        )
    return params


def _extract_features(x_nchw, params):
    """Runs the truncated VGG; returns the hooked (pre-ReLU BN) features."""
    # TODO(synk): the original calls F.normalize(x, mean, std), misusing the
    # (p, dim) args; we implement the intended per-channel (x - mean) / std.
    x = jnp.transpose(x_nchw, (0, 2, 3, 1)).astype(jnp.float32)   # NCHW -> NHWC
    x = (x - IMAGENET_MEAN) / IMAGENET_STD

    p = params
    # block 0
    x = conv3x3_bn(x, **p["conv0"], relu=True, out_dtype=jnp.bfloat16)
    f0 = conv3x3_bn(x, **p["conv3"], relu=False, out_dtype=jnp.float32)  # hook (pre-ReLU)
    x = maxpool2x2(jnp.maximum(f0, 0.0))
    # block 1 (features slice stops at bn11, the last hooked BN)
    x = conv3x3_bn(x, **p["conv7"], relu=True, out_dtype=jnp.bfloat16)
    f1 = conv3x3_bn(x, **p["conv10"], relu=False, out_dtype=jnp.float32)  # hook (pre-ReLU)
    return [f0, f1]


def feature_loss_forward(inputs, targets, params, weights):
    n = inputs.shape[0]
    # Run inputs and targets through the truncated VGG in one batched pass.
    feats = _extract_features(jnp.concatenate([inputs, targets], axis=0), params)
    loss = jnp.float32(0.0)
    for f, w in zip(feats, weights):
        loss = loss + mse_loss(f[:n], f[n:]) * w
    return loss


if __name__ == "__main__":
    key = jax.random.PRNGKey(0)
    kp, ki, kt = jax.random.split(key, 3)
    params = init_params(kp)

    inputs = jax.random.uniform(ki, (2, 3, 16, 16), jnp.float32)   # NCHW
    targets = jax.random.uniform(kt, (2, 3, 16, 16), jnp.float32)  # NCHW
    weights = (1.0, 0.5)  # blocks = [0, 1]

    fn = jax.jit(functools.partial(feature_loss_forward,
                                   params=params, weights=weights))
    loss = fn(inputs, targets)
    jax.block_until_ready(loss)
    print("KERNEL_OK")
</pallas_src>

<mosaic_0001>
module attributes {stable_mosaic.version = 11 : i64} {
  func.func @_conv_bn_kernel(%arg0: i32, %arg1: i32, %arg2: memref<1x288x9xbf16, #tpu.memory_space<vmem>>, %arg3: memref<3x9x128xbf16, #tpu.memory_space<vmem>>, %arg4: memref<1x128xf32, #tpu.memory_space<vmem>>, %arg5: memref<1x256x128xbf16, #tpu.memory_space<vmem>>) attributes {dimension_semantics = [#tpu.dimension_semantics<parallel>, #tpu.dimension_semantics<parallel>], iteration_bounds = array<i64: 4, 1>, scalar_prefetch = 0 : i64, scratch_operands = 0 : i64, tpu.core_type = #tpu.core_type<tc>, window_params = [{transform_indices = @transform_0, window_bounds = array<i64: 1, 288, 9>}, {pipeline_mode = #tpu.pipeline_mode<synchronous>, transform_indices = @transform_1, window_bounds = array<i64: 3, 9, 128>}, {pipeline_mode = #tpu.pipeline_mode<synchronous>, transform_indices = @transform_2, window_bounds = array<i64: 1, 128>}, {transform_indices = @transform_3, window_bounds = array<i64: 1, 256, 128>}]} {
    %c256_i32 = arith.constant 256 : i32
    %0 = arith.muli %arg1, %c256_i32 : i32
    %1 = tpu.assume_multiple %0, 256 : i32
    %c0_i32 = arith.constant 0 : i32
    %2 = arith.addi %1, %c0_i32 : i32
    %c0 = arith.constant 0 : index
    %3 = arith.index_cast %2 : i32 to index
    %c0_0 = arith.constant 0 : index
    %4 = vector.load %arg2[%c0, %3, %c0_0] : memref<1x288x9xbf16, #tpu.memory_space<vmem>>, vector<1x256x9xbf16>
    %5 = vector.shape_cast %4 : vector<1x256x9xbf16> to vector<256x9xbf16>
    %c0_1 = arith.constant 0 : index
    %c0_2 = arith.constant 0 : index
    %c0_3 = arith.constant 0 : index
    %6 = vector.load %arg3[%c0_1, %c0_2, %c0_3] : memref<3x9x128xbf16, #tpu.memory_space<vmem>>, vector<1x9x128xbf16>
    %7 = vector.shape_cast %6 : vector<1x9x128xbf16> to vector<9x128xbf16>
    %cst = arith.constant dense<0.000000e+00> : vector<256x128xf32>
    %8 = tpu.matmul %5, %7, %cst {dimension_numbers = #tpu.dot_dimension_numbers<[1], [0], [0], [1], [0, 0, 1, 1], [], []>} : vector<256x9xbf16>, vector<9x128xbf16>, vector<256x128xf32> -> vector<256x128xf32>
    %c16_i32 = arith.constant 16 : i32
    %9 = arith.addi %1, %c16_i32 : i32
    %c0_4 = arith.constant 0 : index
    %10 = arith.index_cast %9 : i32 to index
    %c0_5 = arith.constant 0 : index
    %11 = vector.load %arg2[%c0_4, %10, %c0_5] : memref<1x288x9xbf16, #tpu.memory_space<vmem>>, vector<1x256x9xbf16>
    %12 = vector.shape_cast %11 : vector<1x256x9xbf16> to vector<256x9xbf16>
    %c1 = arith.constant 1 : index
    %c0_6 = arith.constant 0 : index
    %c0_7 = arith.constant 0 : index
    %13 = vector.load %arg3[%c1, %c0_6, %c0_7] : memref<3x9x128xbf16, #tpu.memory_space<vmem>>, vector<1x9x128xbf16>
    %14 = vector.shape_cast %13 : vector<1x9x128xbf16> to vector<9x128xbf16>
    %cst_8 = arith.constant dense<0.000000e+00> : vector<256x128xf32>
    %15 = tpu.matmul %12, %14, %cst_8 {dimension_numbers = #tpu.dot_dimension_numbers<[1], [0], [0], [1], [0, 0, 1, 1], [], []>} : vector<256x9xbf16>, vector<9x128xbf16>, vector<256x128xf32> -> vector<256x128xf32>
    %16 = arith.addf %8, %15 : vector<256x128xf32>
    %c32_i32 = arith.constant 32 : i32
    %17 = arith.addi %1, %c32_i32 : i32
    %c0_9 = arith.constant 0 : index
    %18 = arith.index_cast %17 : i32 to index
    %c0_10 = arith.constant 0 : index
    %19 = vector.load %arg2[%c0_9, %18, %c0_10] : memref<1x288x9xbf16, #tpu.memory_space<vmem>>, vector<1x256x9xbf16>
    %20 = vector.shape_cast %19 : vector<1x256x9xbf16> to vector<256x9xbf16>
    %c2 = arith.constant 2 : index
    %c0_11 = arith.constant 0 : index
    %c0_12 = arith.constant 0 : index
    %21 = vector.load %arg3[%c2, %c0_11, %c0_12] : memref<3x9x128xbf16, #tpu.memory_space<vmem>>, vector<1x9x128xbf16>
    %22 = vector.shape_cast %21 : vector<1x9x128xbf16> to vector<9x128xbf16>
    %cst_13 = arith.constant dense<0.000000e+00> : vector<256x128xf32>
    %23 = tpu.matmul %20, %22, %cst_13 {dimension_numbers = #tpu.dot_dimension_numbers<[1], [0], [0], [1], [0, 0, 1, 1], [], []>} : vector<256x9xbf16>, vector<9x128xbf16>, vector<256x128xf32> -> vector<256x128xf32>
    %24 = arith.addf %16, %23 : vector<256x128xf32>
    %c0_14 = arith.constant 0 : index
    %c0_15 = arith.constant 0 : index
    %25 = vector.load %arg4[%c0_14, %c0_15] : memref<1x128xf32, #tpu.memory_space<vmem>>, vector<1x128xf32>
    %26 = vector.broadcast %25 : vector<1x128xf32> to vector<256x128xf32>
    %27 = arith.addf %24, %26 : vector<256x128xf32>
    %cst_16 = arith.constant 0.000000e+00 : f32
    %28 = vector.broadcast %cst_16 : f32 to vector<256x128xf32>
    %29 = arith.maximumf %27, %28 : vector<256x128xf32>
    %30 = arith.truncf %29 : vector<256x128xf32> to vector<256x128xbf16>
    %c0_17 = arith.constant 0 : index
    %c0_18 = arith.constant 0 : index
    %c0_19 = arith.constant 0 : index
    %31 = vector.load %arg5[%c0_17, %c0_18, %c0_19] : memref<1x256x128xbf16, #tpu.memory_space<vmem>>, vector<1x256x128xbf16>
    %32 = vector.shape_cast %31 : vector<1x256x128xbf16> to vector<256x128xbf16>
    %33 = vector.shape_cast %30 : vector<256x128xbf16> to vector<1x256x128xbf16>
    tpu.vector_store %arg5[%c0_17, %c0_18, %c0_19], %33 {strides = array<i32>} : memref<1x256x128xbf16, #tpu.memory_space<vmem>>, vector<1x256x128xbf16>,
    return
  }
  func.func @transform_0(%arg0: i32, %arg1: i32) -> (i32, i32, i32) {
    %c0_i32 = arith.constant 0 : i32
    %c0_i32_0 = arith.constant 0 : i32
    %c0_i32_1 = arith.constant 0 : i32
    return %arg0, %c0_i32, %c0_i32_0 : i32, i32, i32
  }
  func.func @transform_1(%arg0: i32, %arg1: i32) -> (i32, i32, i32) {
    %c0_i32 = arith.constant 0 : i32
    %c0_i32_0 = arith.constant 0 : i32
    %c0_i32_1 = arith.constant 0 : i32
    %c0_i32_2 = arith.constant 0 : i32
    return %c0_i32, %c0_i32_0, %c0_i32_1 : i32, i32, i32
  }
  func.func @transform_2(%arg0: i32, %arg1: i32) -> (i32, i32) {
    %c0_i32 = arith.constant 0 : i32
    %c0_i32_0 = arith.constant 0 : i32
    %c0_i32_1 = arith.constant 0 : i32
    return %c0_i32, %c0_i32_0 : i32, i32
  }
  func.func @transform_3(%arg0: i32, %arg1: i32) -> (i32, i32, i32) {
    %c0_i32 = arith.constant 0 : i32
    %c0_i32_0 = arith.constant 0 : i32
    return %arg0, %arg1, %c0_i32 : i32, i32, i32
  }
}

module attributes {stable_mosaic.version = 11 : i64} {
  func.func @_conv_bn_kernel(%arg0: i32, %arg1: i32, %arg2: memref<1x288x192xbf16, #tpu.memory_space<vmem>>, %arg3: memref<3x192x128xbf16, #tpu.memory_space<vmem>>, %arg4: memref<1x128xf32, #tpu.memory_space<vmem>>, %arg5: memref<1x256x128xf32, #tpu.memory_space<vmem>>) attributes {dimension_semantics = [#tpu.dimension_semantics<parallel>, #tpu.dimension_semantics<parallel>], iteration_bounds = array<i64: 4, 1>, scalar_prefetch = 0 : i64, scratch_operands = 0 : i64, tpu.core_type = #tpu.core_type<tc>, window_params = [{transform_indices = @transform_0, window_bounds = array<i64: 1, 288, 192>}, {pipeline_mode = #tpu.pipeline_mode<synchronous>, transform_indices = @transform_1, window_bounds = array<i64: 3, 192, 128>}, {pipeline_mode = #tpu.pipeline_mode<synchronous>, transform_indices = @transform_2, window_bounds = array<i64: 1, 128>}, {transform_indices = @transform_3, window_bounds = array<i64: 1, 256, 128>}]} {
    %c256_i32 = arith.constant 256 : i32
    %0 = arith.muli %arg1, %c256_i32 : i32
    %1 = tpu.assume_multiple %0, 256 : i32
    %c0_i32 = arith.constant 0 : i32
    %2 = arith.addi %1, %c0_i32 : i32
    %c0 = arith.constant 0 : index
    %3 = arith.index_cast %2 : i32 to index
    %c0_0 = arith.constant 0 : index
    %4 = vector.load %arg2[%c0, %3, %c0_0] : memref<1x288x192xbf16, #tpu.memory_space<vmem>>, vector<1x256x192xbf16>
    %5 = vector.shape_cast %4 : vector<1x256x192xbf16> to vector<256x192xbf16>
    %c0_1 = arith.constant 0 : index
    %c0_2 = arith.constant 0 : index
    %c0_3 = arith.constant 0 : index
    %6 = vector.load %arg3[%c0_1, %c0_2, %c0_3] : memref<3x192x128xbf16, #tpu.memory_space<vmem>>, vector<1x192x128xbf16>
    %7 = vector.shape_cast %6 : vector<1x192x128xbf16> to vector<192x128xbf16>
    %cst = arith.constant dense<0.000000e+00> : vector<256x128xf32>
    %8 = tpu.matmul %5, %7, %cst {dimension_numbers = #tpu.dot_dimension_numbers<[1], [0], [0], [1], [0, 0, 1, 1], [], []>} : vector<256x192xbf16>, vector<192x128xbf16>, vector<256x128xf32> -> vector<256x128xf32>
    %c16_i32 = arith.constant 16 : i32
    %9 = arith.addi %1, %c16_i32 : i32
    %c0_4 = arith.constant 0 : index
    %10 = arith.index_cast %9 : i32 to index
    %c0_5 = arith.constant 0 : index
    %11 = vector.load %arg2[%c0_4, %10, %c0_5] : memref<1x288x192xbf16, #tpu.memory_space<vmem>>, vector<1x256x192xbf16>
    %12 = vector.shape_cast %11 : vector<1x256x192xbf16> to vector<256x192xbf16>
    %c1 = arith.constant 1 : index
    %c0_6 = arith.constant 0 : index
    %c0_7 = arith.constant 0 : index
    %13 = vector.load %arg3[%c1, %c0_6, %c0_7] : memref<3x192x128xbf16, #tpu.memory_space<vmem>>, vector<1x192x128xbf16>
    %14 = vector.shape_cast %13 : vector<1x192x128xbf16> to vector<192x128xbf16>
    %cst_8 = arith.constant dense<0.000000e+00> : vector<256x128xf32>
    %15 = tpu.matmul %12, %14, %cst_8 {dimension_numbers = #tpu.dot_dimension_numbers<[1], [0], [0], [1], [0, 0, 1, 1], [], []>} : vector<256x192xbf16>, vector<192x128xbf16>, vector<256x128xf32> -> vector<256x128xf32>
    %16 = arith.addf %8, %15 : vector<256x128xf32>
    %c32_i32 = arith.constant 32 : i32
    %17 = arith.addi %1, %c32_i32 : i32
    %c0_9 = arith.constant 0 : index
    %18 = arith.index_cast %17 : i32 to index
    %c0_10 = arith.constant 0 : index
    %19 = vector.load %arg2[%c0_9, %18, %c0_10] : memref<1x288x192xbf16, #tpu.memory_space<vmem>>, vector<1x256x192xbf16>
    %20 = vector.shape_cast %19 : vector<1x256x192xbf16> to vector<256x192xbf16>
    %c2 = arith.constant 2 : index
    %c0_11 = arith.constant 0 : index
    %c0_12 = arith.constant 0 : index
    %21 = vector.load %arg3[%c2, %c0_11, %c0_12] : memref<3x192x128xbf16, #tpu.memory_space<vmem>>, vector<1x192x128xbf16>
    %22 = vector.shape_cast %21 : vector<1x192x128xbf16> to vector<192x128xbf16>
    %cst_13 = arith.constant dense<0.000000e+00> : vector<256x128xf32>
    %23 = tpu.matmul %20, %22, %cst_13 {dimension_numbers = #tpu.dot_dimension_numbers<[1], [0], [0], [1], [0, 0, 1, 1], [], []>} : vector<256x192xbf16>, vector<192x128xbf16>, vector<256x128xf32> -> vector<256x128xf32>
    %24 = arith.addf %16, %23 : vector<256x128xf32>
    %c0_14 = arith.constant 0 : index
    %c0_15 = arith.constant 0 : index
    %25 = vector.load %arg4[%c0_14, %c0_15] : memref<1x128xf32, #tpu.memory_space<vmem>>, vector<1x128xf32>
    %26 = vector.broadcast %25 : vector<1x128xf32> to vector<256x128xf32>
    %27 = arith.addf %24, %26 : vector<256x128xf32>
    %c0_16 = arith.constant 0 : index
    %c0_17 = arith.constant 0 : index
    %c0_18 = arith.constant 0 : index
    %28 = vector.load %arg5[%c0_16, %c0_17, %c0_18] : memref<1x256x128xf32, #tpu.memory_space<vmem>>, vector<1x256x128xf32>
    %29 = vector.shape_cast %28 : vector<1x256x128xf32> to vector<256x128xf32>
    %30 = vector.shape_cast %27 : vector<256x128xf32> to vector<1x256x128xf32>
    tpu.vector_store %arg5[%c0_16, %c0_17, %c0_18], %30 {strides = array<i32>} : memref<1x256x128xf32, #tpu.memory_space<vmem>>, vector<1x256x128xf32>,
    return
  }
  func.func @transform_0(%arg0: i32, %arg1: i32) -> (i32, i32, i32) {
    %c0_i32 = arith.constant 0 : i32
    %c0_i32_0 = arith.constant 0 : i32
    %c0_i32_1 = arith.constant 0 : i32
    return %arg0, %c0_i32, %c0_i32_0 : i32, i32, i32
  }
  func.func @transform_1(%arg0: i32, %arg1: i32) -> (i32, i32, i32) {
    %c0_i32 = arith.constant 0 : i32
    %c0_i32_0 = arith.constant 0 : i32
    %c0_i32_1 = arith.constant 0 : i32
    %c0_i32_2 = arith.constant 0 : i32
    return %c0_i32, %c0_i32_0, %c0_i32_1 : i32, i32, i32
  }
  func.func @transform_2(%arg0: i32, %arg1: i32) -> (i32, i32) {
    %c0_i32 = arith.constant 0 : i32
    %c0_i32_0 = arith.constant 0 : i32
    %c0_i32_1 = arith.constant 0 : i32
    return %c0_i32, %c0_i32_0 : i32, i32
  }
  func.func @transform_3(%arg0: i32, %arg1: i32) -> (i32, i32, i32) {
    %c0_i32 = arith.constant 0 : i32
    %c0_i32_0 = arith.constant 0 : i32
    return %arg0, %arg1, %c0_i32 : i32, i32, i32
  }
}

module attributes {stable_mosaic.version = 11 : i64} {
  func.func @_sqdiff_kernel(%arg0: i32, %arg1: i32, %arg2: memref<1x128x128xf32, #tpu.memory_space<vmem>>, %arg3: memref<1x128x128xf32, #tpu.memory_space<vmem>>, %arg4: memref<1x1x1xf32, #tpu.memory_space<vmem>>) attributes {dimension_semantics = [#tpu.dimension_semantics<parallel>, #tpu.dimension_semantics<arbitrary>], iteration_bounds = array<i64: 2, 1>, scalar_prefetch = 0 : i64, scratch_operands = 0 : i64, tpu.core_type = #tpu.core_type<tc>, window_params = [{transform_indices = @transform_0, window_bounds = array<i64: 1, 128, 128>}, {transform_indices = @transform_1, window_bounds = array<i64: 1, 128, 128>}, {transform_indices = @transform_2, window_bounds = array<i64: 1, 1, 1>}]} {
    %c0_i32 = arith.constant 0 : i32
    %0 = arith.cmpi eq, %arg1, %c0_i32 : i32
    %1 = arith.extui %0 : i1 to i32
    %c0_i32_0 = arith.constant 0 : i32
    %2 = arith.cmpi ne, %1, %c0_i32_0 : i32
    scf.if %2 {
      %cst_12 = arith.constant 0.000000e+00 : f32
      %15 = vector.broadcast %cst_12 : f32 to vector<1x1x1xf32>
      %c0_13 = arith.constant 0 : index
      %c0_14 = arith.constant 0 : index
      %c0_15 = arith.constant 0 : index
      %16 = vector.load %arg4[%c0_13, %c0_14, %c0_15] : memref<1x1x1xf32, #tpu.memory_space<vmem>>, vector<1x1x1xf32>
      tpu.vector_store %arg4[%c0_13, %c0_14, %c0_15], %15 {strides = array<i32>} : memref<1x1x1xf32, #tpu.memory_space<vmem>>, vector<1x1x1xf32>,
    } else {
    }
    %c0 = arith.constant 0 : index
    %c0_1 = arith.constant 0 : index
    %c0_2 = arith.constant 0 : index
    %3 = vector.load %arg2[%c0, %c0_1, %c0_2] : memref<1x128x128xf32, #tpu.memory_space<vmem>>, vector<1x128x128xf32>
    %c0_3 = arith.constant 0 : index
    %c0_4 = arith.constant 0 : index
    %c0_5 = arith.constant 0 : index
    %4 = vector.load %arg3[%c0_3, %c0_4, %c0_5] : memref<1x128x128xf32, #tpu.memory_space<vmem>>, vector<1x128x128xf32>
    %5 = arith.subf %3, %4 : vector<1x128x128xf32>
    %c0_6 = arith.constant 0 : index
    %c0_7 = arith.constant 0 : index
    %c0_8 = arith.constant 0 : index
    %6 = vector.load %arg4[%c0_6, %c0_7, %c0_8] : memref<1x1x1xf32, #tpu.memory_space<vmem>>, vector<1x1x1xf32>
    %7 = arith.mulf %5, %5 : vector<1x128x128xf32>
    %8 = vector.shape_cast %7 : vector<1x128x128xf32> to vector<1x1x128x128xf32>
    %cst = arith.constant dense<0.000000e+00> : vector<1xf32>
    %9 = vector.multi_reduction <add>, %8, %cst [1, 2, 3] : vector<1x1x128x128xf32> to vector<1xf32>
    %10 = vector.shape_cast %9 : vector<1xf32> to vector<1x1x1x1xf32>
    %11 = vector.extract %10[0, 0, 0, 0] : f32 from vector<1x1x1x1xf32>
    %12 = vector.broadcast %11 : f32 to vector<1x1x1xf32>
    %13 = arith.addf %6, %12 : vector<1x1x1xf32>
    %c0_9 = arith.constant 0 : index
    %c0_10 = arith.constant 0 : index
    %c0_11 = arith.constant 0 : index
    %14 = vector.load %arg4[%c0_9, %c0_10, %c0_11] : memref<1x1x1xf32, #tpu.memory_space<vmem>>, vector<1x1x1xf32>
    tpu.vector_store %arg4[%c0_9, %c0_10, %c0_11], %13 {strides = array<i32>} : memref<1x1x1xf32, #tpu.memory_space<vmem>>, vector<1x1x1xf32>,
    return
  }
  func.func @transform_0(%arg0: i32, %arg1: i32) -> (i32, i32, i32) {
    %c0_i32 = arith.constant 0 : i32
    %c0_i32_0 = arith.constant 0 : i32
    return %arg0, %arg1, %c0_i32 : i32, i32, i32
  }
  func.func @transform_1(%arg0: i32, %arg1: i32) -> (i32, i32, i32) {
    %c0_i32 = arith.constant 0 : i32
    %c0_i32_0 = arith.constant 0 : i32
    return %arg0, %arg1, %c0_i32 : i32, i32, i32
  }
  func.func @transform_2(%arg0: i32, %arg1: i32) -> (i32, i32, i32) {
    %c0_i32 = arith.constant 0 : i32
    %c0_i32_0 = arith.constant 0 : i32
    %c0_i32_1 = arith.constant 0 : i32
    return %arg0, %c0_i32, %c0_i32_0 : i32, i32, i32
  }
}

module attributes {stable_mosaic.version = 11 : i64} {
  func.func @_conv_bn_kernel(%arg0: i32, %arg1: i32, %arg2: memref<1x144x192xbf16, #tpu.memory_space<vmem>>, %arg3: memref<3x192x128xbf16, #tpu.memory_space<vmem>>, %arg4: memref<1x128xf32, #tpu.memory_space<vmem>>, %arg5: memref<1x128x128xbf16, #tpu.memory_space<vmem>>) attributes {dimension_semantics = [#tpu.dimension_semantics<parallel>, #tpu.dimension_semantics<parallel>], iteration_bounds = array<i64: 4, 1>, scalar_prefetch = 0 : i64, scratch_operands = 0 : i64, tpu.core_type = #tpu.core_type<tc>, window_params = [{transform_indices = @transform_0, window_bounds = array<i64: 1, 144, 192>}, {pipeline_mode = #tpu.pipeline_mode<synchronous>, transform_indices = @transform_1, window_bounds = array<i64: 3, 192, 128>}, {pipeline_mode = #tpu.pipeline_mode<synchronous>, transform_indices = @transform_2, window_bounds = array<i64: 1, 128>}, {transform_indices = @transform_3, window_bounds = array<i64: 1, 128, 128>}]} {
    %c128_i32 = arith.constant 128 : i32
    %0 = arith.muli %arg1, %c128_i32 : i32
    %1 = tpu.assume_multiple %0, 128 : i32
    %c0_i32 = arith.constant 0 : i32
    %2 = arith.addi %1, %c0_i32 : i32
    %c0 = arith.constant 0 : index
    %3 = arith.index_cast %2 : i32 to index
    %c0_0 = arith.constant 0 : index
    %4 = vector.load %arg2[%c0, %3, %c0_0] : memref<1x144x192xbf16, #tpu.memory_space<vmem>>, vector<1x128x192xbf16>
    %5 = vector.shape_cast %4 : vector<1x128x192xbf16> to vector<128x192xbf16>
    %c0_1 = arith.constant 0 : index
    %c0_2 = arith.constant 0 : index
    %c0_3 = arith.constant 0 : index
    %6 = vector.load %arg3[%c0_1, %c0_2, %c0_3] : memref<3x192x128xbf16, #tpu.memory_space<vmem>>, vector<1x192x128xbf16>
    %7 = vector.shape_cast %6 : vector<1x192x128xbf16> to vector<192x128xbf16>
    %cst = arith.constant dense<0.000000e+00> : vector<128x128xf32>
    %8 = tpu.matmul %5, %7, %cst {dimension_numbers = #tpu.dot_dimension_numbers<[1], [0], [0], [1], [0, 0, 1, 1], [], []>} : vector<128x192xbf16>, vector<192x128xbf16>, vector<128x128xf32> -> vector<128x128xf32>
    %c8_i32 = arith.constant 8 : i32
    %9 = arith.addi %1, %c8_i32 : i32
    %c0_4 = arith.constant 0 : index
    %10 = arith.index_cast %9 : i32 to index
    %c0_5 = arith.constant 0 : index
    %11 = vector.load %arg2[%c0_4, %10, %c0_5] : memref<1x144x192xbf16, #tpu.memory_space<vmem>>, vector<1x128x192xbf16>
    %12 = vector.shape_cast %11 : vector<1x128x192xbf16> to vector<128x192xbf16>
    %c1 = arith.constant 1 : index
    %c0_6 = arith.constant 0 : index
    %c0_7 = arith.constant 0 : index
    %13 = vector.load %arg3[%c1, %c0_6, %c0_7] : memref<3x192x128xbf16, #tpu.memory_space<vmem>>, vector<1x192x128xbf16>
    %14 = vector.shape_cast %13 : vector<1x192x128xbf16> to vector<192x128xbf16>
    %cst_8 = arith.constant dense<0.000000e+00> : vector<128x128xf32>
    %15 = tpu.matmul %12, %14, %cst_8 {dimension_numbers = #tpu.dot_dimension_numbers<[1], [0], [0], [1], [0, 0, 1, 1], [], []>} : vector<128x192xbf16>, vector<192x128xbf16>, vector<128x128xf32> -> vector<128x128xf32>
    %16 = arith.addf %8, %15 : vector<128x128xf32>
    %c16_i32 = arith.constant 16 : i32
    %17 = arith.addi %1, %c16_i32 : i32
    %c0_9 = arith.constant 0 : index
    %18 = arith.index_cast %17 : i32 to index
    %c0_10 = arith.constant 0 : index
    %19 = vector.load %arg2[%c0_9, %18, %c0_10] : memref<1x144x192xbf16, #tpu.memory_space<vmem>>, vector<1x128x192xbf16>
    %20 = vector.shape_cast %19 : vector<1x128x192xbf16> to vector<128x192xbf16>
    %c2 = arith.constant 2 : index
    %c0_11 = arith.constant 0 : index
    %c0_12 = arith.constant 0 : index
    %21 = vector.load %arg3[%c2, %c0_11, %c0_12] : memref<3x192x128xbf16, #tpu.memory_space<vmem>>, vector<1x192x128xbf16>
    %22 = vector.shape_cast %21 : vector<1x192x128xbf16> to vector<192x128xbf16>
    %cst_13 = arith.constant dense<0.000000e+00> : vector<128x128xf32>
    %23 = tpu.matmul %20, %22, %cst_13 {dimension_numbers = #tpu.dot_dimension_numbers<[1], [0], [0], [1], [0, 0, 1, 1], [], []>} : vector<128x192xbf16>, vector<192x128xbf16>, vector<128x128xf32> -> vector<128x128xf32>
    %24 = arith.addf %16, %23 : vector<128x128xf32>
    %c0_14 = arith.constant 0 : index
    %c0_15 = arith.constant 0 : index
    %25 = vector.load %arg4[%c0_14, %c0_15] : memref<1x128xf32, #tpu.memory_space<vmem>>, vector<1x128xf32>
    %26 = vector.broadcast %25 : vector<1x128xf32> to vector<128x128xf32>
    %27 = arith.addf %24, %26 : vector<128x128xf32>
    %cst_16 = arith.constant 0.000000e+00 : f32
    %28 = vector.broadcast %cst_16 : f32 to vector<128x128xf32>
    %29 = arith.maximumf %27, %28 : vector<128x128xf32>
    %30 = arith.truncf %29 : vector<128x128xf32> to vector<128x128xbf16>
    %c0_17 = arith.constant 0 : index
    %c0_18 = arith.constant 0 : index
    %c0_19 = arith.constant 0 : index
    %31 = vector.load %arg5[%c0_17, %c0_18, %c0_19] : memref<1x128x128xbf16, #tpu.memory_space<vmem>>, vector<1x128x128xbf16>
    %32 = vector.shape_cast %31 : vector<1x128x128xbf16> to vector<128x128xbf16>
    %33 = vector.shape_cast %30 : vector<128x128xbf16> to vector<1x128x128xbf16>
    tpu.vector_store %arg5[%c0_17, %c0_18, %c0_19], %33 {strides = array<i32>} : memref<1x128x128xbf16, #tpu.memory_space<vmem>>, vector<1x128x128xbf16>,
    return
  }
  func.func @transform_0(%arg0: i32, %arg1: i32) -> (i32, i32, i32) {
    %c0_i32 = arith.constant 0 : i32
    %c0_i32_0 = arith.constant 0 : i32
    %c0_i32_1 = arith.constant 0 : i32
    return %arg0, %c0_i32, %c0_i32_0 : i32, i32, i32
  }
  func.func @transform_1(%arg0: i32, %arg1: i32) -> (i32, i32, i32) {
    %c0_i32 = arith.constant 0 : i32
    %c0_i32_0 = arith.constant 0 : i32
    %c0_i32_1 = arith.constant 0 : i32
    %c0_i32_2 = arith.constant 0 : i32
    return %c0_i32, %c0_i32_0, %c0_i32_1 : i32, i32, i32
  }
  func.func @transform_2(%arg0: i32, %arg1: i32) -> (i32, i32) {
    %c0_i32 = arith.constant 0 : i32
    %c0_i32_0 = arith.constant 0 : i32
    %c0_i32_1 = arith.constant 0 : i32
    return %c0_i32, %c0_i32_0 : i32, i32
  }
  func.func @transform_3(%arg0: i32, %arg1: i32) -> (i32, i32, i32) {
    %c0_i32 = arith.constant 0 : i32
    %c0_i32_0 = arith.constant 0 : i32
    return %arg0, %arg1, %c0_i32 : i32, i32, i32
  }
}

module attributes {stable_mosaic.version = 11 : i64} {
  func.func @_conv_bn_kernel(%arg0: i32, %arg1: i32, %arg2: memref<1x144x384xbf16, #tpu.memory_space<vmem>>, %arg3: memref<3x384x128xbf16, #tpu.memory_space<vmem>>, %arg4: memref<1x128xf32, #tpu.memory_space<vmem>>, %arg5: memref<1x128x128xf32, #tpu.memory_space<vmem>>) attributes {dimension_semantics = [#tpu.dimension_semantics<parallel>, #tpu.dimension_semantics<parallel>], iteration_bounds = array<i64: 4, 1>, scalar_prefetch = 0 : i64, scratch_operands = 0 : i64, tpu.core_type = #tpu.core_type<tc>, window_params = [{transform_indices = @transform_0, window_bounds = array<i64: 1, 144, 384>}, {pipeline_mode = #tpu.pipeline_mode<synchronous>, transform_indices = @transform_1, window_bounds = array<i64: 3, 384, 128>}, {pipeline_mode = #tpu.pipeline_mode<synchronous>, transform_indices = @transform_2, window_bounds = array<i64: 1, 128>}, {transform_indices = @transform_3, window_bounds = array<i64: 1, 128, 128>}]} {
    %c128_i32 = arith.constant 128 : i32
    %0 = arith.muli %arg1, %c128_i32 : i32
    %1 = tpu.assume_multiple %0, 128 : i32
    %c0_i32 = arith.constant 0 : i32
    %2 = arith.addi %1, %c0_i32 : i32
    %c0 = arith.constant 0 : index
    %3 = arith.index_cast %2 : i32 to index
    %c0_0 = arith.constant 0 : index
    %4 = vector.load %arg2[%c0, %3, %c0_0] : memref<1x144x384xbf16, #tpu.memory_space<vmem>>, vector<1x128x384xbf16>
    %5 = vector.shape_cast %4 : vector<1x128x384xbf16> to vector<128x384xbf16>
    %c0_1 = arith.constant 0 : index
    %c0_2 = arith.constant 0 : index
    %c0_3 = arith.constant 0 : index
    %6 = vector.load %arg3[%c0_1, %c0_2, %c0_3] : memref<3x384x128xbf16, #tpu.memory_space<vmem>>, vector<1x384x128xbf16>
    %7 = vector.shape_cast %6 : vector<1x384x128xbf16> to vector<384x128xbf16>
    %cst = arith.constant dense<0.000000e+00> : vector<128x128xf32>
    %8 = tpu.matmul %5, %7, %cst {dimension_numbers = #tpu.dot_dimension_numbers<[1], [0], [0], [1], [0, 0, 1, 1], [], []>} : vector<128x384xbf16>, vector<384x128xbf16>, vector<128x128xf32> -> vector<128x128xf32>
    %c8_i32 = arith.constant 8 : i32
    %9 = arith.addi %1, %c8_i32 : i32
    %c0_4 = arith.constant 0 : index
    %10 = arith.index_cast %9 : i32 to index
    %c0_5 = arith.constant 0 : index
    %11 = vector.load %arg2[%c0_4, %10, %c0_5] : memref<1x144x384xbf16, #tpu.memory_space<vmem>>, vector<1x128x384xbf16>
    %12 = vector.shape_cast %11 : vector<1x128x384xbf16> to vector<128x384xbf16>
    %c1 = arith.constant 1 : index
    %c0_6 = arith.constant 0 : index
    %c0_7 = arith.constant 0 : index
    %13 = vector.load %arg3[%c1, %c0_6, %c0_7] : memref<3x384x128xbf16, #tpu.memory_space<vmem>>, vector<1x384x128xbf16>
    %14 = vector.shape_cast %13 : vector<1x384x128xbf16> to vector<384x128xbf16>
    %cst_8 = arith.constant dense<0.000000e+00> : vector<128x128xf32>
    %15 = tpu.matmul %12, %14, %cst_8 {dimension_numbers = #tpu.dot_dimension_numbers<[1], [0], [0], [1], [0, 0, 1, 1], [], []>} : vector<128x384xbf16>, vector<384x128xbf16>, vector<128x128xf32> -> vector<128x128xf32>
    %16 = arith.addf %8, %15 : vector<128x128xf32>
    %c16_i32 = arith.constant 16 : i32
    %17 = arith.addi %1, %c16_i32 : i32
    %c0_9 = arith.constant 0 : index
    %18 = arith.index_cast %17 : i32 to index
    %c0_10 = arith.constant 0 : index
    %19 = vector.load %arg2[%c0_9, %18, %c0_10] : memref<1x144x384xbf16, #tpu.memory_space<vmem>>, vector<1x128x384xbf16>
    %20 = vector.shape_cast %19 : vector<1x128x384xbf16> to vector<128x384xbf16>
    %c2 = arith.constant 2 : index
    %c0_11 = arith.constant 0 : index
    %c0_12 = arith.constant 0 : index
    %21 = vector.load %arg3[%c2, %c0_11, %c0_12] : memref<3x384x128xbf16, #tpu.memory_space<vmem>>, vector<1x384x128xbf16>
    %22 = vector.shape_cast %21 : vector<1x384x128xbf16> to vector<384x128xbf16>
    %cst_13 = arith.constant dense<0.000000e+00> : vector<128x128xf32>
    %23 = tpu.matmul %20, %22, %cst_13 {dimension_numbers = #tpu.dot_dimension_numbers<[1], [0], [0], [1], [0, 0, 1, 1], [], []>} : vector<128x384xbf16>, vector<384x128xbf16>, vector<128x128xf32> -> vector<128x128xf32>
    %24 = arith.addf %16, %23 : vector<128x128xf32>
    %c0_14 = arith.constant 0 : index
    %c0_15 = arith.constant 0 : index
    %25 = vector.load %arg4[%c0_14, %c0_15] : memref<1x128xf32, #tpu.memory_space<vmem>>, vector<1x128xf32>
    %26 = vector.broadcast %25 : vector<1x128xf32> to vector<128x128xf32>
    %27 = arith.addf %24, %26 : vector<128x128xf32>
    %c0_16 = arith.constant 0 : index
    %c0_17 = arith.constant 0 : index
    %c0_18 = arith.constant 0 : index
    %28 = vector.load %arg5[%c0_16, %c0_17, %c0_18] : memref<1x128x128xf32, #tpu.memory_space<vmem>>, vector<1x128x128xf32>
    %29 = vector.shape_cast %28 : vector<1x128x128xf32> to vector<128x128xf32>
    %30 = vector.shape_cast %27 : vector<128x128xf32> to vector<1x128x128xf32>
    tpu.vector_store %arg5[%c0_16, %c0_17, %c0_18], %30 {strides = array<i32>} : memref<1x128x128xf32, #tpu.memory_space<vmem>>, vector<1x128x128xf32>,
    return
  }
  func.func @transform_0(%arg0: i32, %arg1: i32) -> (i32, i32, i32) {
    %c0_i32 = arith.constant 0 : i32
    %c0_i32_0 = arith.constant 0 : i32
    %c0_i32_1 = arith.constant 0 : i32
    return %arg0, %c0_i32, %c0_i32_0 : i32, i32, i32
  }
  func.func @transform_1(%arg0: i32, %arg1: i32) -> (i32, i32, i32) {
    %c0_i32 = arith.constant 0 : i32
    %c0_i32_0 = arith.constant 0 : i32
    %c0_i32_1 = arith.constant 0 : i32
    %c0_i32_2 = arith.constant 0 : i32
    return %c0_i32, %c0_i32_0, %c0_i32_1 : i32, i32, i32
  }
  func.func @transform_2(%arg0: i32, %arg1: i32) -> (i32, i32) {
    %c0_i32 = arith.constant 0 : i32
    %c0_i32_0 = arith.constant 0 : i32
    %c0_i32_1 = arith.constant 0 : i32
    return %c0_i32, %c0_i32_0 : i32, i32
  }
  func.func @transform_3(%arg0: i32, %arg1: i32) -> (i32, i32, i32) {
    %c0_i32 = arith.constant 0 : i32
    %c0_i32_0 = arith.constant 0 : i32
    return %arg0, %arg1, %c0_i32 : i32, i32, i32
  }
}

module attributes {stable_mosaic.version = 11 : i64} {
  func.func @_sqdiff_kernel(%arg0: i32, %arg1: i32, %arg2: memref<1x64x128xf32, #tpu.memory_space<vmem>>, %arg3: memref<1x64x128xf32, #tpu.memory_space<vmem>>, %arg4: memref<1x1x1xf32, #tpu.memory_space<vmem>>) attributes {dimension_semantics = [#tpu.dimension_semantics<parallel>, #tpu.dimension_semantics<arbitrary>], iteration_bounds = array<i64: 2, 1>, scalar_prefetch = 0 : i64, scratch_operands = 0 : i64, tpu.core_type = #tpu.core_type<tc>, window_params = [{transform_indices = @transform_0, window_bounds = array<i64: 1, 64, 128>}, {transform_indices = @transform_1, window_bounds = array<i64: 1, 64, 128>}, {transform_indices = @transform_2, window_bounds = array<i64: 1, 1, 1>}]} {
    %c0_i32 = arith.constant 0 : i32
    %0 = arith.cmpi eq, %arg1, %c0_i32 : i32
    %1 = arith.extui %0 : i1 to i32
    %c0_i32_0 = arith.constant 0 : i32
    %2 = arith.cmpi ne, %1, %c0_i32_0 : i32
    scf.if %2 {
      %cst_12 = arith.constant 0.000000e+00 : f32
      %15 = vector.broadcast %cst_12 : f32 to vector<1x1x1xf32>
      %c0_13 = arith.constant 0 : index
      %c0_14 = arith.constant 0 : index
      %c0_15 = arith.constant 0 : index
      %16 = vector.load %arg4[%c0_13, %c0_14, %c0_15] : memref<1x1x1xf32, #tpu.memory_space<vmem>>, vector<1x1x1xf32>
      tpu.vector_store %arg4[%c0_13, %c0_14, %c0_15], %15 {strides = array<i32>} : memref<1x1x1xf32, #tpu.memory_space<vmem>>, vector<1x1x1xf32>,
    } else {
    }
    %c0 = arith.constant 0 : index
    %c0_1 = arith.constant 0 : index
    %c0_2 = arith.constant 0 : index
    %3 = vector.load %arg2[%c0, %c0_1, %c0_2] : memref<1x64x128xf32, #tpu.memory_space<vmem>>, vector<1x64x128xf32>
    %c0_3 = arith.constant 0 : index
    %c0_4 = arith.constant 0 : index
    %c0_5 = arith.constant 0 : index
    %4 = vector.load %arg3[%c0_3, %c0_4, %c0_5] : memref<1x64x128xf32, #tpu.memory_space<vmem>>, vector<1x64x128xf32>
    %5 = arith.subf %3, %4 : vector<1x64x128xf32>
    %c0_6 = arith.constant 0 : index
    %c0_7 = arith.constant 0 : index
    %c0_8 = arith.constant 0 : index
    %6 = vector.load %arg4[%c0_6, %c0_7, %c0_8] : memref<1x1x1xf32, #tpu.memory_space<vmem>>, vector<1x1x1xf32>
    %7 = arith.mulf %5, %5 : vector<1x64x128xf32>
    %8 = vector.shape_cast %7 : vector<1x64x128xf32> to vector<1x1x64x128xf32>
    %cst = arith.constant dense<0.000000e+00> : vector<1xf32>
    %9 = vector.multi_reduction <add>, %8, %cst [1, 2, 3] : vector<1x1x64x128xf32> to vector<1xf32>
    %10 = vector.shape_cast %9 : vector<1xf32> to vector<1x1x1x1xf32>
    %11 = vector.extract %10[0, 0, 0, 0] : f32 from vector<1x1x1x1xf32>
    %12 = vector.broadcast %11 : f32 to vector<1x1x1xf32>
    %13 = arith.addf %6, %12 : vector<1x1x1xf32>
    %c0_9 = arith.constant 0 : index
    %c0_10 = arith.constant 0 : index
    %c0_11 = arith.constant 0 : index
    %14 = vector.load %arg4[%c0_9, %c0_10, %c0_11] : memref<1x1x1xf32, #tpu.memory_space<vmem>>, vector<1x1x1xf32>
    tpu.vector_store %arg4[%c0_9, %c0_10, %c0_11], %13 {strides = array<i32>} : memref<1x1x1xf32, #tpu.memory_space<vmem>>, vector<1x1x1xf32>,
    return
  }
  func.func @transform_0(%arg0: i32, %arg1: i32) -> (i32, i32, i32) {
    %c0_i32 = arith.constant 0 : i32
    %c0_i32_0 = arith.constant 0 : i32
    return %arg0, %arg1, %c0_i32 : i32, i32, i32
  }
  func.func @transform_1(%arg0: i32, %arg1: i32) -> (i32, i32, i32) {
    %c0_i32 = arith.constant 0 : i32
    %c0_i32_0 = arith.constant 0 : i32
    return %arg0, %arg1, %c0_i32 : i32, i32, i32
  }
  func.func @transform_2(%arg0: i32, %arg1: i32) -> (i32, i32, i32) {
    %c0_i32 = arith.constant 0 : i32
    %c0_i32_0 = arith.constant 0 : i32
    %c0_i32_1 = arith.constant 0 : i32
    return %arg0, %c0_i32, %c0_i32_0 : i32, i32, i32
  }
}

</mosaic_0001>

<bundles_post_ra>
// kernel: feature_loss_forward.6
= control target key start
LH: loop header
LB: loop body
LE: loop exit
PB: predicated region body
PF: predicated region fallthrough
CT: control target
= control target key end

     0   :  { %s1797_s12 = smov 0   ;;  %s1799_s13 = smov 0   ;;  %s2053_s0 = inlined_call_operand.vmem [shape: bf16[4,288,9], index: 0, kind: input, shape index: {}]   ;;  %s2054_s1 = inlined_call_operand.vmem [shape: bf16[3,9,128], index: 1, kind: input, shape index: {}]   ;;  %s2055_s2 = inlined_call_operand.vmem [shape: f32[1,128], index: 2, kind: input, shape index: {}]   ;;  %s2056_s3 = inlined_call_operand.vmem [shape: bf16[4,256,128], index: 3, kind: output, shape index: {}]  }
   0x1   :  { %s1801_s14 = smov 0  }
   0x2 LB: > { %s25_s15 = sadd.s32 1, %s1770_s13  ;;  %p1249_p0 = scmp.ge.s32.totalorder %s1774_s14, 1  ;;  %s1774_s14 = sphi %s1801_s14, %s13_s14   ;;  %s1770_s13 = sphi %s1799_s13, %s2058_s13   ;;  %s1766_s12 = sphi %s1797_s12, %s2057_s12  }
   0x3   : > { %p27_p1 = scmp.ge.s32.totalorder %s25_s15, 4  ;;  %p151_p2 = scmp.lt.s32.totalorder %s1774_s14, 5 }
   0x5   : > { %s2060_s15 = smov (%p27_p1, %s25_s15), 0  ;;  %p152_p3 = pnand %p1249_p0, %p151_p2 }
   0x6   : > { %p179_p4 = scmp.lt.s32.totalorder (!%p152_p3), %s1766_s12, 3 }
   0x7   : > { %155 = sbr.rel (%p152_p3) target bundleno = 348 (0x15c), region = 32 }
   0xc   : > { %v1353_v0 = vld [vmem:[%s2054_s1 + $0x8] sm:$0xf]  ;;  %v1609_v1 = vld [vmem:[%s2054_s1 + $0x8] sm:$0x10]  ;;  %vm408_vm0 = vcmask 1043456   ;;  %vm409_vm1 = vcmask 1044480  }
   0xd   : > { %v1354_v2 = vor.u32 %v1609_v1, %v1353_v0  ;;  %v1437_v3 = vld [vmem:[%s2054_s1] sm:$0xf]  ;;  %v1592_v4 = vld [vmem:[%s2054_s1] sm:$0x10]  ;;  %v1776_v5 = vmov 65535   ;;  %s2062_s12 = smov (!%p179_p4, %s1766_s12), 3 }
   0xe   : > { %v410_v6 = vsel %vm408_vm0, 4294967295, %v1776_v5  ;;  %v1438_v7 = vor.u32 %v1592_v4, %v1437_v3  ;;  %v1555_v8 = vld [vmem:[%s2054_s1 + $0x10] sm:$0xf]  ;;  %v1626_v9 = vld [vmem:[%s2054_s1 + $0x10] sm:$0x10]  ;;  %s1725_s28 = smul.u32 144, %s2062_s12 }
   0xf   : > { %v411_v10 = vsel %vm409_vm1, %v410_v6, 0  ;;  %v1556_v11 = vor.u32 %v1626_v9, %v1555_v8  ;;  %vm359_vm2 = vcmask 72704   ;;  %v1918_v59 = vld [vmem:[%s2055_s2] ss:$0 sm:$0xff]  ;;  %s1575_s7 = sshll.u32 %s2062_s12, 7 }
  0x10   : > { %v413_v12 = vand.u32 %v1354_v2, %v411_v10  ;;  %v638_v13 = vand.u32 %v1438_v7, %v411_v10  ;;  %s1839_s4 = scalar_lea.vmem %s2053_s0, %s1725_s28  ;;  %s1936_s10 = scalar_lea.vmem %s2056_s3, %s1575_s7 }
  0x11   : > { %v903_v14 = vand.u32 %v1556_v11, %v411_v10  ;;  %v1593_v15 = vld [vmem:[%s1839_s4 + $0x8] sm:$0xff]  ;;  %v1576_v17 = vld [vmem:[%s1839_s4] sm:$0xff]  ;;  %v1610_v18 = vld [vmem:[%s1839_s4 + $0x10] sm:$0xff] }
  0x12   : > { %422 = vmatpush.bf16.msra.mxu0 %v413_v12  ;;  %1722 = vmatpush.bf16.msra.mxu3 %v413_v12  ;;  %v1605_v16 = vld [vmem:[%s1839_s4 + $0x68] sm:$0xff]  ;;  %v1594_v19 = vld [vmem:[%s1839_s4 + $0x10] sm:$0xff]  ;;  %v1611_v22 = vld [vmem:[%s1839_s4 + $0x18] sm:$0xff] }
  0x13   : > { %647 = vmatpush.bf16.msra.mxu1 %v638_v13  ;;  %912 = vmatpush.bf16.msra.mxu2 %v903_v14  ;;  %v1606_v20 = vld [vmem:[%s1839_s4 + $0x70] sm:$0xff]  ;;  %v1577_v21 = vld [vmem:[%s1839_s4 + $0x8] sm:$0xff]  ;;  %v1595_v23 = vld [vmem:[%s1839_s4 + $0x18] sm:$0xff] }
  0x14   : > { %v1607_v24 = vld [vmem:[%s1839_s4 + $0x78] sm:$0xff]  ;;  %v1578_v25 = vld [vmem:[%s1839_s4 + $0x10] sm:$0xff]  ;;  %v1612_v26 = vld [vmem:[%s1839_s4 + $0x20] sm:$0xff] }
  0x15   : > { %1355 = vmatmul.msk.bf16.vlgmr.msra.gmra.mxu0 %vm359_vm2, %v1593_v15  ;;  %1367 = vmatmul.msk.bf16.vlgmr.msra.gmra.mxu3 %vm359_vm2, %v1605_v16  ;;  %v1596_v27 = vld [vmem:[%s1839_s4 + $0x20] sm:$0xff]  ;;  %v1579_v29 = vld [vmem:[%s1839_s4 + $0x18] sm:$0xff]  ;;  %v1613_v30 = vld [vmem:[%s1839_s4 + $0x28] sm:$0xff] }
  0x16   : > { %1723 = vmatpush.bf16.msrb.mxu3 %v638_v13  ;;  %1439 = vmatmul.msk.bf16.vlgmr.msra.gmra.mxu1 %vm359_vm2, %v1576_v17  ;;  %v1608_v28 = vld [vmem:[%s1839_s4 + $0x80] sm:$0xff]  ;;  %v1597_v31 = vld [vmem:[%s1839_s4 + $0x28] sm:$0xff]  ;;  %v1614_v34 = vld [vmem:[%s1839_s4 + $0x30] sm:$0xff] }
  0x17   : > { %1557 = vmatmul.msk.bf16.vlgmr.msra.gmra.mxu2 %vm359_vm2, %v1610_v18  ;;  %v1588_v32 = vld [vmem:[%s1839_s4 + $0x60] sm:$0xff]  ;;  %v1598_v35 = vld [vmem:[%s1839_s4 + $0x30] sm:$0xff]  ;;  %v1589_v36 = vld [vmem:[%s1839_s4 + $0x68] sm:$0xff] }
  0x18   : > { %v1580_v33 = vld [vmem:[%s1839_s4 + $0x20] sm:$0xff]  ;;  %v1581_v37 = vld [vmem:[%s1839_s4 + $0x28] sm:$0xff]  ;;  %v1615_v38 = vld [vmem:[%s1839_s4 + $0x38] sm:$0xff] }
  0x19   : > { %v1599_v39 = vld [vmem:[%s1839_s4 + $0x38] sm:$0xff]  ;;  %v1590_v40 = vld [vmem:[%s1839_s4 + $0x70] sm:$0xff]  ;;  %v1616_v42 = vld [vmem:[%s1839_s4 + $0x40] sm:$0xff] }
  0x1a   : > { %1724 = vmatpush.bf16.msra.mxu3 %v903_v14  ;;  %v1582_v41 = vld [vmem:[%s1839_s4 + $0x30] sm:$0xff]  ;;  %v1600_v43 = vld [vmem:[%s1839_s4 + $0x40] sm:$0xff]  ;;  %v1591_v44 = vld [vmem:[%s1839_s4 + $0x78] sm:$0xff] }
  0x1b   : > { %v1583_v45 = vld [vmem:[%s1839_s4 + $0x38] sm:$0xff]  ;;  %v1617_v46 = vld [vmem:[%s1839_s4 + $0x48] sm:$0xff]  ;;  %v1622_v48 = vld [vmem:[%s1839_s4 + $0x70] sm:$0xff] }
  0x1c   : > { %v1601_v47 = vld [vmem:[%s1839_s4 + $0x48] sm:$0xff]  ;;  %v1584_v50 = vld [vmem:[%s1839_s4 + $0x40] sm:$0xff]  ;;  %v1618_v51 = vld [vmem:[%s1839_s4 + $0x50] sm:$0xff] }
  0x1d   : > { %v1602_v63 = vld [vmem:[%s1839_s4 + $0x50] sm:$0xff]  ;;  %v1623_v0 = vld [vmem:[%s1839_s4 + $0x78] sm:$0xff]  ;;  %v1585_v4 = vld [vmem:[%s1839_s4 + $0x48] sm:$0xff] }
  0x1e   : > { %v1619_v5 = vld [vmem:[%s1839_s4 + $0x58] sm:$0xff] }
  0x25   : > { %1356 = vmatmul.msk.bf16.gmra.mxu0 %vm359_vm2, %v1594_v19  ;;  %1368 = vmatmul.msk.bf16.gmra.mxu3 %vm359_vm2, %v1606_v20  ;;  %v1603_v20 = vld [vmem:[%s1839_s4 + $0x58] sm:$0xff] }
  0x26   : > { %1440 = vmatmul.msk.bf16.gmra.mxu1 %vm359_vm2, %v1577_v21  ;;  %v1624_v21 = vld [vmem:[%s1839_s4 + $0x80] sm:$0xff] }
  0x27   : > { %1558 = vmatmul.msk.bf16.gmra.mxu2 %vm359_vm2, %v1611_v22 }
  0x35   : > { %1357 = vmatmul.msk.bf16.gmra.mxu0 %vm359_vm2, %v1595_v23  ;;  %1369 = vmatmul.msk.bf16.gmra.mxu3 %vm359_vm2, %v1607_v24 }
  0x36   : > { %1441 = vmatmul.msk.bf16.gmra.mxu1 %vm359_vm2, %v1578_v25  ;;  %v1586_v25 = vld [vmem:[%s1839_s4 + $0x50] sm:$0xff] }
  0x37   : > { %1559 = vmatmul.msk.bf16.gmra.mxu2 %vm359_vm2, %v1612_v26  ;;  %v1620_v26 = vld [vmem:[%s1839_s4 + $0x60] sm:$0xff] }
  0x45   : > { %1358 = vmatmul.msk.bf16.gmra.mxu0 %vm359_vm2, %v1596_v27  ;;  %1370 = vmatmul.msk.bf16.gmra.mxu3 %vm359_vm2, %v1608_v28 }
  0x46   : > { %1442 = vmatmul.msk.bf16.gmra.mxu1 %vm359_vm2, %v1579_v29 }
  0x47   : > { %1560 = vmatmul.msk.bf16.gmra.mxu2 %vm359_vm2, %v1613_v30 }
  0x55   : > { %1359 = vmatmul.msk.bf16.gmra.mxu0 %vm359_vm2, %v1597_v31  ;;  %1451 = vmatmul.msk.bf16.vlgmr.msrb.gmra.mxu3 %vm359_vm2, %v1588_v32 }
  0x56   : > { %1443 = vmatmul.msk.bf16.gmra.mxu1 %vm359_vm2, %v1580_v33 }
  0x57   : > { %1561 = vmatmul.msk.bf16.gmra.mxu2 %vm359_vm2, %v1614_v34 }
  0x65   : > { %1360 = vmatmul.msk.bf16.gmra.mxu0 %vm359_vm2, %v1598_v35  ;;  %1452 = vmatmul.msk.bf16.gmra.mxu3 %vm359_vm2, %v1589_v36 }
  0x66   : > { %1444 = vmatmul.msk.bf16.gmra.mxu1 %vm359_vm2, %v1581_v37 }
  0x67   : > { %1562 = vmatmul.msk.bf16.gmra.mxu2 %vm359_vm2, %v1615_v38 }
  0x75   : > { %1361 = vmatmul.msk.bf16.gmra.mxu0 %vm359_vm2, %v1599_v39  ;;  %1453 = vmatmul.msk.bf16.gmra.mxu3 %vm359_vm2, %v1590_v40 }
  0x76   : > { %1445 = vmatmul.msk.bf16.gmra.mxu1 %vm359_vm2, %v1582_v41  ;;  %v1604_v41 = vld [vmem:[%s1839_s4 + $0x60] sm:$0xff] }
  0x77   : > { %1563 = vmatmul.msk.bf16.gmra.mxu2 %vm359_vm2, %v1616_v42  ;;  %v1625_v42 = vld [vmem:[%s1839_s4 + $0x88] sm:$0xff] }
  0x85   : > { %1362 = vmatmul.msk.bf16.gmra.mxu0 %vm359_vm2, %v1600_v43  ;;  %1454 = vmatmul.msk.bf16.gmra.mxu3 %vm359_vm2, %v1591_v44 }
  0x86   : > { %1446 = vmatmul.msk.bf16.gmra.mxu1 %vm359_vm2, %v1583_v45 }
  0x87   : > { %1564 = vmatmul.msk.bf16.gmra.mxu2 %vm359_vm2, %v1617_v46  ;;  %v1587_v46 = vld [vmem:[%s1839_s4 + $0x58] sm:$0xff] }
  0x92   : > { %v424_v49 = vpop.f32.mrf.mxu0 }
  0x93   : > { %v649_v52 = vpop.f32.mrf.mxu1 }
  0x94   : > { %v650_v55 = vadd.f32 %v649_v52, %v424_v49 }
  0x95   : > { %1363 = vmatmul.msk.bf16.gmra.mxu0 %vm359_vm2, %v1601_v47  ;;  %1569 = vmatmul.msk.bf16.vlgmr.msra.gmra.mxu3 %vm359_vm2, %v1622_v48  ;;  %v1621_v47 = vld [vmem:[%s1839_s4 + $0x68] sm:$0xff] }
  0x96   : > { %1447 = vmatmul.msk.bf16.gmra.mxu1 %vm359_vm2, %v1584_v50 }
  0x97   : > { %1565 = vmatmul.msk.bf16.gmra.mxu2 %vm359_vm2, %v1618_v51 }
  0x98   : > { %v1913_v53 = vpop.f32.mrf.mxu3 }
  0x9a   : > { %v914_v54 = vpop.f32.mrf.mxu2  ;;  %v426_v56 = vpop.f32.mrf.mxu0 }
  0x9b   : > { %v651_v57 = vpop.f32.mrf.mxu1  ;;  %v994_v58 = vadd.f32 %v914_v54, %v650_v55 }
  0x9c   : > { %v652_v60 = vadd.f32 %v651_v57, %v426_v56 }
  0x9d   : > { %v1030_v1 = vadd.f32 %v1918_v59, %v994_v58 }
  0x9f   : > { %v1062_v8 = vmax.f32 %v1030_v1, 0.0 }
  0xa0   : > { %v1920_v61 = vpop.f32.mrf.mxu3 }
  0xa2   : > { %v916_v62 = vpop.f32.mrf.mxu2  ;;  %v429_v3 = vpop.f32.mrf.mxu0 }
  0xa3   : > { %v995_v2 = vadd.f32 %v916_v62, %v652_v60  ;;  %v654_v6 = vpop.f32.mrf.mxu1 }
  0xa4   : > { %v655_v13 = vadd.f32 %v654_v6, %v429_v3 }
  0xa5   : > { %v1031_v7 = vadd.f32 %v1918_v59, %v995_v2  ;;  %1364 = vmatmul.msk.bf16.gmra.mxu0 %vm359_vm2, %v1602_v63  ;;  %1570 = vmatmul.msk.bf16.gmra.mxu3 %vm359_vm2, %v1623_v0 }
  0xa6   : > { %1448 = vmatmul.msk.bf16.gmra.mxu1 %vm359_vm2, %v1585_v4 }
  0xa7   : > { %v1063_v9 = vmax.f32 %v1031_v7, 0.0  ;;  %1566 = vmatmul.msk.bf16.gmra.mxu2 %vm359_vm2, %v1619_v5 }
  0xa8   : > { %v1938_v11 = vpop.f32.mrf.mxu3 }
  0xa9   : > { %v1630_v10 = vpack.c.bf16 %v1063_v9, %v1062_v8 }
  0xaa   : > { %v919_v12 = vpop.f32.mrf.mxu2  ;;  %v431_v14 = vpop.f32.mrf.mxu0 }
  0xab   : > { %1631 = vst [vmem:[%s1936_s10] sm:$0xff] %v1630_v10   ;;  %v656_v15 = vpop.f32.mrf.mxu1  ;;  %v996_v16 = vadd.f32 %v919_v12, %v655_v13 }
  0xac   : > { %v657_v17 = vadd.f32 %v656_v15, %v431_v14 }
  0xad   : > { %v1032_v22 = vadd.f32 %v1918_v59, %v996_v16 }
  0xaf   : > { %v1064_v29 = vmax.f32 %v1032_v22, 0.0 }
  0xb0   : > { %v1941_v18 = vpop.f32.mrf.mxu3 }
  0xb2   : > { %v921_v19 = vpop.f32.mrf.mxu2  ;;  %v434_v24 = vpop.f32.mrf.mxu0 }
  0xb3   : > { %v997_v23 = vadd.f32 %v921_v19, %v657_v17  ;;  %v659_v27 = vpop.f32.mrf.mxu1 }
  0xb4   : > { %v660_v34 = vadd.f32 %v659_v27, %v434_v24 }
  0xb5   : > { %v1033_v28 = vadd.f32 %v1918_v59, %v997_v23  ;;  %1365 = vmatmul.msk.bf16.gmra.mxu0 %vm359_vm2, %v1603_v20  ;;  %1571 = vmatmul.msk.bf16.gmra.mxu3 %vm359_vm2, %v1624_v21 }
  0xb6   : > { %1449 = vmatmul.msk.bf16.gmra.mxu1 %vm359_vm2, %v1586_v25 }
  0xb7   : > { %v1065_v30 = vmax.f32 %v1033_v28, 0.0  ;;  %1567 = vmatmul.msk.bf16.gmra.mxu2 %vm359_vm2, %v1620_v26 }
  0xb8   : > { %v1953_v32 = vpop.f32.mrf.mxu3 }
  0xb9   : > { %v1635_v31 = vpack.c.bf16 %v1065_v30, %v1064_v29 }
  0xba   : > { %v924_v33 = vpop.f32.mrf.mxu2  ;;  %v436_v35 = vpop.f32.mrf.mxu0 }
  0xbb   : > { %1707 = vst [vmem:[%s1936_s10 + $0x8] sm:$0xff] %v1635_v31   ;;  %v661_v36 = vpop.f32.mrf.mxu1  ;;  %v998_v37 = vadd.f32 %v924_v33, %v660_v34 }
  0xbc   : > { %v662_v38 = vadd.f32 %v661_v36, %v436_v35 }
  0xbd   : > { %v1034_v43 = vadd.f32 %v1918_v59, %v998_v37 }
  0xbf   : > { %v1066_v50 = vmax.f32 %v1034_v43, 0.0 }
  0xc0   : > { %v1956_v39 = vpop.f32.mrf.mxu3 }
  0xc2   : > { %v926_v40 = vpop.f32.mrf.mxu2  ;;  %v439_v45 = vpop.f32.mrf.mxu0 }
  0xc3   : > { %v999_v44 = vadd.f32 %v926_v40, %v662_v38  ;;  %v664_v48 = vpop.f32.mrf.mxu1 }
  0xc4   : > { %v665_v56 = vadd.f32 %v664_v48, %v439_v45 }
  0xc5   : > { %v1035_v49 = vadd.f32 %v1918_v59, %v999_v44  ;;  %1366 = vmatmul.msk.bf16.gmra.mxu0 %vm359_vm2, %v1604_v41  ;;  %1572 = vmatmul.msk.bf16.gmra.mxu3 %vm359_vm2, %v1625_v42 }
  0xc6   : > { %1450 = vmatmul.msk.bf16.gmra.mxu1 %vm359_vm2, %v1587_v46 }
  0xc7   : > { %v1067_v51 = vmax.f32 %v1035_v49, 0.0  ;;  %1568 = vmatmul.msk.bf16.gmra.mxu2 %vm359_vm2, %v1621_v47 }
  0xc8   : > { %v1968_v54 = vpop.f32.mrf.mxu3 }
  0xc9   : > { %v1640_v52 = vpack.c.bf16 %v1067_v51, %v1066_v50 }
  0xca   : > { %v929_v55 = vpop.f32.mrf.mxu2  ;;  %v441_v57 = vpop.f32.mrf.mxu0 }
  0xcb   : > { %1708 = vst [vmem:[%s1936_s10 + $0x10] sm:$0xff] %v1640_v52   ;;  %v666_v58 = vpop.f32.mrf.mxu1  ;;  %v1000_v60 = vadd.f32 %v929_v55, %v665_v56 }
  0xcc   : > { %v667_v62 = vadd.f32 %v666_v58, %v441_v57 }
  0xcd   : > { %v1036_v1 = vadd.f32 %v1918_v59, %v1000_v60 }
  0xcf   : > { %v1068_v6 = vmax.f32 %v1036_v1, 0.0 }
  0xd0   : > { %v1971_v63 = vpop.f32.mrf.mxu3 }
  0xd2   : > { %v931_v0 = vpop.f32.mrf.mxu2  ;;  %v444_v3 = vpop.f32.mrf.mxu0 }
  0xd3   : > { %v1001_v2 = vadd.f32 %v931_v0, %v667_v62  ;;  %v669_v4 = vpop.f32.mrf.mxu1 }
  0xd4   : > { %v670_v13 = vadd.f32 %v669_v4, %v444_v3 }
  0xd5   : > { %v1037_v5 = vadd.f32 %v1918_v59, %v1001_v2 }
  0xd7   : > { %v1069_v7 = vmax.f32 %v1037_v5, 0.0 }
  0xd8   : > { %v709_v9 = vpop.f32.mrf.mxu3 }
  0xd9   : > { %v1645_v8 = vpack.c.bf16 %v1069_v7, %v1068_v6  ;;  %v1976_v10 = vadd.f32 %v709_v9, %v1913_v53 }
  0xda   : > { %v934_v12 = vpop.f32.mrf.mxu2  ;;  %v446_v14 = vpop.f32.mrf.mxu0 }
  0xdb   : > { %1709 = vst [vmem:[%s1936_s10 + $0x18] sm:$0xff] %v1645_v8   ;;  %v671_v15 = vpop.f32.mrf.mxu1  ;;  %v1002_v16 = vadd.f32 %v934_v12, %v670_v13 }
  0xdc   : > { %v672_v17 = vadd.f32 %v671_v15, %v446_v14 }
  0xdd   : > { %v1038_v21 = vadd.f32 %v1918_v59, %v1002_v16 }
  0xdf   : > { %v1070_v53 = vmax.f32 %v1038_v21, 0.0 }
  0xe0   : > { %v1979_v19 = vpop.f32.mrf.mxu3 }
  0xe2   : > { %v936_v20 = vpop.f32.mrf.mxu2  ;;  %v449_v23 = vpop.f32.mrf.mxu0 }
  0xe3   : > { %v1003_v22 = vadd.f32 %v936_v20, %v672_v17  ;;  %v674_v24 = vpop.f32.mrf.mxu1 }
  0xe4   : > { %v675_v31 = vadd.f32 %v674_v24, %v449_v23 }
  0xe5   : > { %v1039_v25 = vadd.f32 %v1918_v59, %v1003_v22 }
  0xe7   : > { %v1071_v26 = vmax.f32 %v1039_v25, 0.0 }
  0xe8   : > { %v714_v28 = vpop.f32.mrf.mxu3 }
  0xe9   : > { %v1650_v27 = vpack.c.bf16 %v1071_v26, %v1070_v53  ;;  %v1984_v29 = vadd.f32 %v714_v28, %v1938_v11 }
  0xea   : > { %v939_v30 = vpop.f32.mrf.mxu2  ;;  %v451_v33 = vpop.f32.mrf.mxu0 }
  0xeb   : > { %1710 = vst [vmem:[%s1936_s10 + $0x20] sm:$0xff] %v1650_v27   ;;  %v676_v34 = vpop.f32.mrf.mxu1  ;;  %v1004_v35 = vadd.f32 %v939_v30, %v675_v31 }
  0xec   : > { %v677_v36 = vadd.f32 %v676_v34, %v451_v33  ;;  %v712_v34 = vadd.f32 %v1979_v19, %v1920_v61 }
  0xed   : > { %v1040_v40 = vadd.f32 %v1918_v59, %v1004_v35 }
  0xef   : > { %v1072_v11 = vmax.f32 %v1040_v40, 0.0 }
  0xf0   : > { %v1987_v37 = vpop.f32.mrf.mxu3 }
  0xf2   : > { %v941_v38 = vpop.f32.mrf.mxu2  ;;  %v454_v42 = vpop.f32.mrf.mxu0 }
  0xf3   : > { %v1005_v41 = vadd.f32 %v941_v38, %v677_v36  ;;  %v679_v43 = vpop.f32.mrf.mxu1 }
  0xf4   : > { %v680_v50 = vadd.f32 %v679_v43, %v454_v42 }
  0xf5   : > { %v1041_v44 = vadd.f32 %v1918_v59, %v1005_v41 }
  0xf7   : > { %v1073_v45 = vmax.f32 %v1041_v44, 0.0 }
  0xf8   : > { %v719_v47 = vpop.f32.mrf.mxu3 }
  0xf9   : > { %v1655_v46 = vpack.c.bf16 %v1073_v45, %v1072_v11  ;;  %v1992_v48 = vadd.f32 %v719_v47, %v1953_v32 }
  0xfa   : > { %v944_v49 = vpop.f32.mrf.mxu2  ;;  %v456_v51 = vpop.f32.mrf.mxu0 }
  0xfb   : > { %1711 = vst [vmem:[%s1936_s10 + $0x28] sm:$0xff] %v1655_v46   ;;  %v681_v52 = vpop.f32.mrf.mxu1  ;;  %v1006_v55 = vadd.f32 %v944_v49, %v680_v50 }
  0xfc   : > { %v682_v56 = vadd.f32 %v681_v52, %v456_v51 }
  0xfd   : > { %v1042_v60 = vadd.f32 %v1918_v59, %v1006_v55 }
  0xff   : > { %v1074_v32 = vmax.f32 %v1042_v60, 0.0 }
 0x100   : > { %v1995_v57 = vpop.f32.mrf.mxu3 }
 0x102   : > { %v946_v58 = vpop.f32.mrf.mxu2  ;;  %v459_v0 = vpop.f32.mrf.mxu0 }
 0x103   : > { %v1007_v62 = vadd.f32 %v946_v58, %v682_v56  ;;  %v684_v1 = vpop.f32.mrf.mxu1 }
 0x104   : > { %v685_v8 = vadd.f32 %v684_v1, %v459_v0  ;;  %v717_v0 = vadd.f32 %v1987_v37, %v1941_v18 }
 0x105   : > { %v1043_v2 = vadd.f32 %v1918_v59, %v1007_v62 }
 0x107   : > { %v1075_v3 = vmax.f32 %v1043_v2, 0.0 }
 0x108   : > { %v724_v5 = vpop.f32.mrf.mxu3 }
 0x109   : > { %v1660_v4 = vpack.c.bf16 %v1075_v3, %v1074_v32  ;;  %v2000_v6 = vadd.f32 %v724_v5, %v1968_v54 }
 0x10a   : > { %v949_v7 = vpop.f32.mrf.mxu2  ;;  %v461_v9 = vpop.f32.mrf.mxu0 }
 0x10b   : > { %1712 = vst [vmem:[%s1936_s10 + $0x30] sm:$0xff] %v1660_v4   ;;  %v686_v12 = vpop.f32.mrf.mxu1  ;;  %v1008_v13 = vadd.f32 %v949_v7, %v685_v8 }
 0x10c   : > { %v687_v14 = vadd.f32 %v686_v12, %v461_v9 }
 0x10d   : > { %v1044_v17 = vadd.f32 %v1918_v59, %v1008_v13 }
 0x10f   : > { %v1076_v54 = vmax.f32 %v1044_v17, 0.0 }
 0x110   : > { %v2003_v15 = vpop.f32.mrf.mxu3 }
 0x112   : > { %v951_v16 = vpop.f32.mrf.mxu2  ;;  %v464_v21 = vpop.f32.mrf.mxu0 }
 0x113   : > { %v1009_v20 = vadd.f32 %v951_v16, %v687_v14  ;;  %v689_v22 = vpop.f32.mrf.mxu1 }
 0x114   : > { %v690_v27 = vadd.f32 %v689_v22, %v464_v21 }
 0x115   : > { %v1045_v23 = vadd.f32 %v1918_v59, %v1009_v20 }
 0x117   : > { %v1077_v24 = vmax.f32 %v1045_v23, 0.0 }
 0x118   : > { %v974_v53 = vpop.f32.mrf.mxu3 }
 0x119   : > { %v1665_v25 = vpack.c.bf16 %v1077_v24, %v1076_v54  ;;  %v1018_v31 = vadd.f32 %v974_v53, %v1976_v10  ;;  %v722_v53 = vadd.f32 %v1995_v57, %v1956_v39 }
 0x11a   : > { %v954_v26 = vpop.f32.mrf.mxu2  ;;  %v466_v28 = vpop.f32.mrf.mxu0 }
 0x11b   : > { %1713 = vst [vmem:[%s1936_s10 + $0x38] sm:$0xff] %v1665_v25   ;;  %v691_v30 = vpop.f32.mrf.mxu1  ;;  %v1010_v33 = vadd.f32 %v954_v26, %v690_v27  ;;  %v1054_v38 = vadd.f32 %v1918_v59, %v1018_v31 }
 0x11c   : > { %v692_v35 = vadd.f32 %v691_v30, %v466_v28 }
 0x11d   : > { %v1046_v42 = vadd.f32 %v1918_v59, %v1010_v33  ;;  %v1086_v46 = vmax.f32 %v1054_v38, 0.0 }
 0x11f   : > { %v1078_v61 = vmax.f32 %v1046_v42, 0.0 }
 0x120   : > { %v976_v36 = vpop.f32.mrf.mxu3 }
 0x121   : > { %v1019_v41 = vadd.f32 %v976_v36, %v712_v34 }
 0x122   : > { %v956_v40 = vpop.f32.mrf.mxu2  ;;  %v469_v44 = vpop.f32.mrf.mxu0 }
 0x123   : > { %v1011_v43 = vadd.f32 %v956_v40, %v692_v35  ;;  %v1055_v11 = vadd.f32 %v1918_v59, %v1019_v41  ;;  %v694_v45 = vpop.f32.mrf.mxu1 }
 0x124   : > { %v695_v55 = vadd.f32 %v694_v45, %v469_v44 }
 0x125   : > { %v1047_v10 = vadd.f32 %v1918_v59, %v1011_v43  ;;  %v1087_v47 = vmax.f32 %v1055_v11, 0.0 }
 0x127   : > { %v1079_v19 = vmax.f32 %v1047_v10, 0.0  ;;  %v1690_v49 = vpack.c.bf16 %v1087_v47, %v1086_v46 }
 0x128   : > { %v979_v51 = vpop.f32.mrf.mxu3 }
 0x129   : > { %v1670_v50 = vpack.c.bf16 %v1079_v19, %v1078_v61  ;;  %1718 = vst [vmem:[%s1936_s10 + $0x60] sm:$0xff] %v1690_v49   ;;  %v1020_v60 = vadd.f32 %v979_v51, %v1984_v29  ;;  %v727_v19 = vadd.f32 %v2003_v15, %v1971_v63 }
 0x12a   : > { %v959_v52 = vpop.f32.mrf.mxu2  ;;  %v471_v56 = vpop.f32.mrf.mxu0 }
 0x12b   : > { %1714 = vst [vmem:[%s1936_s10 + $0x40] sm:$0xff] %v1670_v50   ;;  %v696_v58 = vpop.f32.mrf.mxu1  ;;  %v1012_v62 = vadd.f32 %v959_v52, %v695_v55  ;;  %v1056_v32 = vadd.f32 %v1918_v59, %v1020_v60 }
 0x12c   : > { %v697_v1 = vadd.f32 %v696_v58, %v471_v56 }
 0x12d   : > { %v1048_v5 = vadd.f32 %v1918_v59, %v1012_v62  ;;  %v1088_v13 = vmax.f32 %v1056_v32, 0.0 }
 0x12f   : > { %v1080_v18 = vmax.f32 %v1048_v5, 0.0 }
 0x130   : > { %v981_v2 = vpop.f32.mrf.mxu3 }
 0x131   : > { %v1021_v4 = vadd.f32 %v981_v2, %v717_v0 }
 0x132   : > { %v961_v3 = vpop.f32.mrf.mxu2  ;;  %v474_v8 = vpop.f32.mrf.mxu0 }
 0x133   : > { %v1013_v7 = vadd.f32 %v961_v3, %v697_v1  ;;  %v1057_v9 = vadd.f32 %v1918_v59, %v1021_v4  ;;  %v699_v12 = vpop.f32.mrf.mxu1 }
 0x134   : > { %v700_v22 = vadd.f32 %v699_v12, %v474_v8 }
 0x135   : > { %v1049_v29 = vadd.f32 %v1918_v59, %v1013_v7  ;;  %v1089_v14 = vmax.f32 %v1057_v9, 0.0 }
 0x137   : > { %v1081_v37 = vmax.f32 %v1049_v29, 0.0  ;;  %v1695_v16 = vpack.c.bf16 %v1089_v14, %v1088_v13 }
 0x138   : > { %v984_v20 = vpop.f32.mrf.mxu3 }
 0x139   : > { %v1675_v17 = vpack.c.bf16 %v1081_v37, %v1080_v18  ;;  %1719 = vst [vmem:[%s1936_s10 + $0x68] sm:$0xff] %v1695_v16   ;;  %v1022_v24 = vadd.f32 %v984_v20, %v1992_v48 }
 0x13a   : > { %v964_v21 = vpop.f32.mrf.mxu2  ;;  %v476_v23 = vpop.f32.mrf.mxu0 }
 0x13b   : > { %1715 = vst [vmem:[%s1936_s10 + $0x48] sm:$0xff] %v1675_v17   ;;  %v701_v54 = vpop.f32.mrf.mxu1  ;;  %v1014_v25 = vadd.f32 %v964_v21, %v700_v22  ;;  %v1058_v28 = vadd.f32 %v1918_v59, %v1022_v24 }
 0x13c   : > { %v702_v26 = vadd.f32 %v701_v54, %v476_v23 }
 0x13d   : > { %v1050_v33 = vadd.f32 %v1918_v59, %v1014_v25  ;;  %v1090_v40 = vmax.f32 %v1058_v28, 0.0 }
 0x13f   : > { %v1082_v39 = vmax.f32 %v1050_v33, 0.0 }
 0x140   : > { %v986_v27 = vpop.f32.mrf.mxu3 }
 0x141   : > { %v1023_v31 = vadd.f32 %v986_v27, %v722_v53 }
 0x142   : > { %v966_v30 = vpop.f32.mrf.mxu2  ;;  %v479_v36 = vpop.f32.mrf.mxu0 }
 0x143   : > { %v1015_v34 = vadd.f32 %v966_v30, %v702_v26  ;;  %v1059_v35 = vadd.f32 %v1918_v59, %v1023_v31  ;;  %v704_v38 = vpop.f32.mrf.mxu1 }
 0x144   : > { %v705_v45 = vadd.f32 %v704_v38, %v479_v36 }
 0x145   : > { %v1051_v48 = vadd.f32 %v1918_v59, %v1015_v34  ;;  %v1091_v41 = vmax.f32 %v1059_v35, 0.0 }
 0x147   : > { %v1083_v57 = vmax.f32 %v1051_v48, 0.0  ;;  %v1700_v42 = vpack.c.bf16 %v1091_v41, %v1090_v40 }
 0x148   : > { %v989_v44 = vpop.f32.mrf.mxu3 }
 0x149   : > { %v1680_v43 = vpack.c.bf16 %v1083_v57, %v1082_v39  ;;  %1720 = vst [vmem:[%s1936_s10 + $0x70] sm:$0xff] %v1700_v42   ;;  %v1024_v10 = vadd.f32 %v989_v44, %v2000_v6 }
 0x14a   : > { %v969_v11 = vpop.f32.mrf.mxu2  ;;  %v481_v46 = vpop.f32.mrf.mxu0 }
 0x14b   : > { %1716 = vst [vmem:[%s1936_s10 + $0x50] sm:$0xff] %v1680_v43   ;;  %v706_v47 = vpop.f32.mrf.mxu1  ;;  %v1016_v61 = vadd.f32 %v969_v11, %v705_v45  ;;  %v1060_v51 = vadd.f32 %v1918_v59, %v1024_v10 }
 0x14c   : > { %v707_v49 = vadd.f32 %v706_v47, %v481_v46 }
 0x14d   : > { %v1052_v56 = vadd.f32 %v1918_v59, %v1016_v61  ;;  %v1092_v62 = vmax.f32 %v1060_v51, 0.0 }
 0x14f   : > { %v1084_v1 = vmax.f32 %v1052_v56, 0.0 }
 0x150   : > { %v991_v50 = vpop.f32.mrf.mxu3 }
 0x151   : > { %v1025_v55 = vadd.f32 %v991_v50, %v727_v19 }
 0x152   : > { %v971_v52 = vpop.f32.mrf.mxu2 }
 0x153   : > { %v1017_v58 = vadd.f32 %v971_v52, %v707_v49  ;;  %v1061_v60 = vadd.f32 %v1918_v59, %v1025_v55 }
 0x155   : > { %v1053_v6 = vadd.f32 %v1918_v59, %v1017_v58  ;;  %v1093_v0 = vmax.f32 %v1061_v60, 0.0 }
 0x157   : > { %v1085_v2 = vmax.f32 %v1053_v6, 0.0  ;;  %v1705_v63 = vpack.c.bf16 %v1093_v0, %v1092_v62 }
 0x159   : > { %v1685_v15 = vpack.c.bf16 %v1085_v2, %v1084_v1  ;;  %1721 = vst [vmem:[%s1936_s10 + $0x78] sm:$0xff] %v1705_v63  }
 0x15b   : > { %1717 = vst [vmem:[%s1936_s10 + $0x58] sm:$0xff] %v1685_v15  }
 0x15c PF: > { %s13_s14 = sadd.s32 1, %s1774_s14   ;;  %s2057_s12 = smov %s1770_s13 }
 0x15d   : > { %p10_p5 = scmp.ge.s32.totalorder %s13_s14, 6   ;;  %s2058_s13 = smov %s2060_s15 }
 0x15f   :  { %12 = sbr.rel (!%p10_p5) target bundleno = 2 (0x2), region = 67 }

// kernel: feature_loss_forward.7
= control target key start
LH: loop header
LB: loop body
LE: loop exit
PB: predicated region body
PF: predicated region fallthrough
CT: control target
= control target key end

     0   :  { %s2806_s12 = smov 0   ;;  %s2808_s13 = smov 0   ;;  %s3584_s0 = inlined_call_operand.vmem [shape: bf16[4,288,192], index: 0, kind: input, shape index: {}]   ;;  %s3585_s1 = inlined_call_operand.vmem [shape: bf16[3,192,128], index: 1, kind: input, shape index: {}]   ;;  %s3586_s2 = inlined_call_operand.vmem [shape: f32[1,128], index: 2, kind: input, shape index: {}]   ;;  %s3587_s3 = inlined_call_operand.vmem [shape: f32[4,256,128], index: 3, kind: output, shape index: {}]  }
   0x1   :  { %s2810_s14 = smov 0  }
   0x2 LB: > { %s25_s15 = sadd.s32 1, %s2780_s13  ;;  %p1901_p0 = scmp.ge.s32.totalorder %s2784_s14, 1  ;;  %s2784_s14 = sphi %s2810_s14, %s13_s14   ;;  %s2780_s13 = sphi %s2808_s13, %s3653_s13   ;;  %s2776_s12 = sphi %s2806_s12, %s3652_s12  }
   0x3   : > { %p27_p1 = scmp.ge.s32.totalorder %s25_s15, 4  ;;  %p151_p2 = scmp.lt.s32.totalorder %s2784_s14, 5 }
   0x5   : > { %s3655_s15 = smov (%p27_p1, %s25_s15), 0  ;;  %p152_p3 = pnand %p1901_p0, %p151_p2 }
   0x7   : > { %155 = sbr.rel (%p152_p3) target bundleno = 562 (0x232), region = 32 }
   0xc   : > { %v2679_v0 = vld [vmem:[%s3585_s1 + $0x98] sm:$0xff]  ;;  %p179_p4 = scmp.lt.s32.totalorder %s2776_s12, 3  ;;  %v2678_v4 = vld [vmem:[%s3585_s1 + $0x90] sm:$0xff]  ;;  %v2677_v8 = vld [vmem:[%s3585_s1 + $0x88] sm:$0xff]  ;;  %vm536_vm0 = vcmask 523264  }
   0xd   : > { %v2830_v1 = vld [vmem:[%s3585_s1 + $0xb8] sm:$0xff]  ;;  %585 = vmatpush.bf16.msra.mxu0 %v2679_v0  ;;  %v2847_v5 = vld [vmem:[%s3585_s1 + $0xb0] sm:$0xff]  ;;  %v2868_v9 = vld [vmem:[%s3585_s1 + $0xa8] sm:$0xff] }
   0xe   : > { %v2635_v2 = vld [vmem:[%s3585_s1 + $0x38] sm:$0xff]  ;;  %2728 = vmatpush.bf16.msra.mxu1 %v2830_v1  ;;  %s3657_s12 = smov (!%p179_p4, %s2776_s12), 3  ;;  %v2634_v6 = vld [vmem:[%s3585_s1 + $0x30] sm:$0xff]  ;;  %v2633_v10 = vld [vmem:[%s3585_s1 + $0x28] sm:$0xff] }
   0xf   : > { %v2838_v3 = vld [vmem:[%s3585_s1 + $0x58] sm:$0xff]  ;;  %1027 = vmatpush.bf16.msra.mxu2 %v2635_v2  ;;  %v2858_v7 = vld [vmem:[%s3585_s1 + $0x50] sm:$0xff]  ;;  %s2736_s5 = smul.u32 288, %s3657_s12  ;;  %v2877_v11 = vld [vmem:[%s3585_s1 + $0x48] sm:$0xff] }
  0x10   : > { %2732 = vmatpush.bf16.msra.mxu3 %v2838_v3  ;;  %v2676_v12 = vld [vmem:[%s3585_s1 + $0x80] sm:$0xff]  ;;  %v2727_v20 = vld [vmem:[%s3585_s1 + $0x118] sm:$0xff]  ;;  %v2722_v26 = vld [vmem:[%s3585_s1 + $0xf0] sm:$0xff] }
  0x11   : > { %586 = vmatpush.bf16.msra.mxu0 %v2678_v4  ;;  %s2882_s20 = scalar_lea.vmem %s3584_s0, %s2736_s5  ;;  %v2890_v13 = vld [vmem:[%s3585_s1 + $0xa0] sm:$0xff]  ;;  %v2723_v21 = vld [vmem:[%s3585_s1 + $0xf8] sm:$0xff]  ;;  %v2674_v27 = vld [vmem:[%s3585_s1 + $0x70] sm:$0xff] }
  0x12   : > { %2729 = vmatpush.bf16.msra.mxu1 %v2847_v5  ;;  %v2632_v14 = vld [vmem:[%s3585_s1 + $0x20] sm:$0xff]  ;;  %v2021_v16 = vld [vmem:[%s2882_s20 + $0x88] sm:$0xf0]  ;;  %v2610_v18 = vld [vmem:[%s2882_s20 + $0x74] sm:$0xf] }
  0x13   : > { %1028 = vmatpush.bf16.msra.mxu2 %v2634_v6  ;;  %v2654_v15 = vld [vmem:[%s2882_s20 + $0x84] sm:$0xf]  ;;  %v2213_v19 = vld [vmem:[%s2882_s20 + $0x78] sm:$0xf0]  ;;  %v2726_v28 = vld [vmem:[%s3585_s1 + $0x110] sm:$0xff] }
  0x14   : > { %2733 = vmatpush.bf16.msra.mxu3 %v2858_v7  ;;  %v2902_v17 = vld [vmem:[%s3585_s1 + $0x40] sm:$0xff]  ;;  %v2024_v22 = vor.u32 %v2654_v15, %v2021_v16  ;;  %v2216_v23 = vor.u32 %v2610_v18, %v2213_v19  ;;  %v2675_v24 = vld [vmem:[%s3585_s1 + $0x78] sm:$0xff]  ;;  %v2630_v29 = vld [vmem:[%s3585_s1 + $0x10] sm:$0xff] }
  0x15   : > { %587 = vmatpush.bf16.msra.mxu0 %v2677_v8  ;;  %v2631_v25 = vld [vmem:[%s3585_s1 + $0x18] sm:$0xff]  ;;  %v2721_v30 = vld [vmem:[%s3585_s1 + $0xe8] sm:$0xff]  ;;  %v2672_v33 = vld [vmem:[%s3585_s1 + $0x60] sm:$0xff] }
  0x16   : > { %2730 = vmatpush.bf16.msra.mxu1 %v2868_v9  ;;  %v2673_v31 = vld [vmem:[%s3585_s1 + $0x68] sm:$0xff]  ;;  %v2628_v34 = vld [vmem:[%s3585_s1] sm:$0xff]  ;;  %v1963_v35 = vld [vmem:[%s2882_s20 + $0x10] sm:$0xf] }
  0x17   : > { %1029 = vmatpush.bf16.msra.mxu2 %v2633_v10  ;;  %v2629_v32 = vld [vmem:[%s3585_s1 + $0x8] sm:$0xff]  ;;  %v2641_v36 = vld [vmem:[%s2882_s20 + $0x14] sm:$0xf0]  ;;  %v2656_v37 = vld [vmem:[%s2882_s20 + $0x94] sm:$0xf] }
  0x18   : > { %2734 = vmatpush.bf16.msra.mxu3 %v2877_v11  ;;  %v2029_v38 = vld [vmem:[%s2882_s20 + $0x98] sm:$0xf0]  ;;  %v2155_v39 = vld [vmem:[%s2882_s20] sm:$0xf]  ;;  %v2597_v40 = vld [vmem:[%s2882_s20 + $0x4] sm:$0xf0]  ;;  %v1964_v43 = vor.u32 %v2641_v36, %v1963_v35 }
  0x19   : > { %588 = vmatpush.bf16.msra.mxu0 %v2676_v12  ;;  %v2612_v41 = vld [vmem:[%s2882_s20 + $0x84] sm:$0xf]  ;;  %v2221_v42 = vld [vmem:[%s2882_s20 + $0x88] sm:$0xf0]  ;;  %v2032_v44 = vor.u32 %v2656_v37, %v2029_v38  ;;  %v2156_v45 = vor.u32 %v2597_v40, %v2155_v39  ;;  %v1971_v48 = vld [vmem:[%s2882_s20 + $0x20] sm:$0xf] }
  0x1a   : > { %2731 = vmatpush.bf16.msra.mxu1 %v2890_v13  ;;  %v2224_v46 = vor.u32 %v2612_v41, %v2221_v42  ;;  %v2720_v47 = vld [vmem:[%s3585_s1 + $0xe0] sm:$0xff]  ;;  %v2643_v49 = vld [vmem:[%s2882_s20 + $0x24] sm:$0xf0]  ;;  %v2037_v51 = vld [vmem:[%s2882_s20 + $0xa8] sm:$0xf0] }
  0x1b   : > { %1030 = vmatpush.bf16.msra.mxu2 %v2632_v14  ;;  %v2658_v50 = vld [vmem:[%s2882_s20 + $0xa4] sm:$0xf]  ;;  %v2163_v52 = vld [vmem:[%s2882_s20 + $0x10] sm:$0xf]  ;;  %v2599_v53 = vld [vmem:[%s2882_s20 + $0x14] sm:$0xf0]  ;;  %v1972_v56 = vor.u32 %v2643_v49, %v1971_v48 }
  0x1c   : > { %2735 = vmatpush.bf16.msra.mxu3 %v2902_v17  ;;  %v2614_v54 = vld [vmem:[%s2882_s20 + $0x94] sm:$0xf]  ;;  %v2229_v55 = vld [vmem:[%s2882_s20 + $0x98] sm:$0xf0]  ;;  %v2040_v57 = vor.u32 %v2658_v50, %v2037_v51  ;;  %v2164_v58 = vor.u32 %v2599_v53, %v2163_v52  ;;  %v2725_v60 = vld [vmem:[%s3585_s1 + $0x108] sm:$0xff] }
  0x1d   : > { %2144 = vmatmul.msk.bf16.vlgmr.msra.gmra.mxu1 %vm536_vm0, %v2024_v22  ;;  %589 = vmatpush.bf16.msra.mxu0 %v2675_v24  ;;  %v2232_v59 = vor.u32 %v2614_v54, %v2229_v55  ;;  %v2719_v61 = vld [vmem:[%s3585_s1 + $0xd8] sm:$0xff]  ;;  %v1979_v62 = vld [vmem:[%s2882_s20 + $0x30] sm:$0xf]  ;;  %v2660_v0 = vld [vmem:[%s2882_s20 + $0xb4] sm:$0xf] }
  0x1e   : > { %1532 = vmatpush.bf16.msrb.mxu1 %v2723_v21  ;;  %v2645_v63 = vld [vmem:[%s2882_s20 + $0x34] sm:$0xf0]  ;;  %v2171_v2 = vld [vmem:[%s2882_s20 + $0x20] sm:$0xf]  ;;  %v2616_v4 = vld [vmem:[%s2882_s20 + $0xa4] sm:$0xf] }
  0x1f   : > { %2336 = vmatmul.msk.bf16.vlgmr.msra.gmra.mxu3 %vm536_vm0, %v2216_v23  ;;  %1031 = vmatpush.bf16.msra.mxu2 %v2631_v25  ;;  %v1980_v6 = vor.u32 %v2645_v63, %v1979_v62  ;;  %v1987_v10 = vld [vmem:[%s2882_s20 + $0x40] sm:$0xf]  ;;  %v2662_v12 = vld [vmem:[%s2882_s20 + $0xc4] sm:$0xf]  ;;  %v2179_v14 = vld [vmem:[%s2882_s20 + $0x30] sm:$0xf] }
  0x20   : > { %1625 = vmatpush.bf16.msrb.mxu3 %v2727_v20  ;;  %v2603_v15 = vld [vmem:[%s2882_s20 + $0x34] sm:$0xf0]  ;;  %v2618_v16 = vld [vmem:[%s2882_s20 + $0xb4] sm:$0xf]  ;;  %v2724_v23 = vld [vmem:[%s3585_s1 + $0x100] sm:$0xff] }
  0x21   : > { %590 = vmatpush.bf16.msra.mxu0 %v2674_v27  ;;  %v2180_v20 = vor.u32 %v2603_v15, %v2179_v14  ;;  %v2718_v22 = vld [vmem:[%s3585_s1 + $0xd0] sm:$0xff]  ;;  %v2649_v25 = vld [vmem:[%s2882_s20 + $0x54] sm:$0xf0]  ;;  %v2061_v27 = vld [vmem:[%s2882_s20 + $0xd8] sm:$0xf0] }
  0x22   : > { %1533 = vmatpush.bf16.msrb.mxu1 %v2722_v26  ;;  %v1995_v24 = vld [vmem:[%s2882_s20 + $0x50] sm:$0xf]  ;;  %v2664_v26 = vld [vmem:[%s2882_s20 + $0xd4] sm:$0xf]  ;;  %v2717_v36 = vld [vmem:[%s3585_s1 + $0xc8] sm:$0xff] }
  0x23   : > { %1032 = vmatpush.bf16.msra.mxu2 %v2630_v29  ;;  %v2605_v29 = vld [vmem:[%s2882_s20 + $0x44] sm:$0xf0]  ;;  %v2003_v37 = vld [vmem:[%s2882_s20 + $0x60] sm:$0xf]  ;;  %v2666_v39 = vld [vmem:[%s2882_s20 + $0xe4] sm:$0xf] }
  0x24   : > { %1626 = vmatpush.bf16.msrb.mxu3 %v2726_v28  ;;  %v2187_v28 = vld [vmem:[%s2882_s20 + $0x40] sm:$0xf]  ;;  %v2651_v38 = vld [vmem:[%s2882_s20 + $0x64] sm:$0xf0]  ;;  %v2069_v40 = vld [vmem:[%s2882_s20 + $0xe8] sm:$0xf0] }
  0x25   : > { %591 = vmatpush.bf16.msra.mxu0 %v2673_v31  ;;  %v2253_v31 = vld [vmem:[%s2882_s20 + $0xc8] sm:$0xf0]  ;;  %v2195_v41 = vld [vmem:[%s2882_s20 + $0x50] sm:$0xf]  ;;  %v2607_v42 = vld [vmem:[%s2882_s20 + $0x54] sm:$0xf0] }
  0x26   : > { %1534 = vmatpush.bf16.msrb.mxu1 %v2721_v30  ;;  %v2620_v30 = vld [vmem:[%s2882_s20 + $0xc4] sm:$0xf]  ;;  %v2011_v50 = vld [vmem:[%s2882_s20 + $0x70] sm:$0xf]  ;;  %v2653_v51 = vld [vmem:[%s2882_s20 + $0x74] sm:$0xf0] }
  0x27   : > { %1033 = vmatpush.bf16.msra.mxu2 %v2629_v32  ;;  %v1996_v32 = vor.u32 %v2649_v25, %v1995_v24  ;;  %v2256_v35 = vor.u32 %v2620_v30, %v2253_v31  ;;  %v2716_v49 = vld [vmem:[%s3585_s1 + $0xc0] sm:$0xff]  ;;  %v2668_v52 = vld [vmem:[%s2882_s20 + $0xf4] sm:$0xf]  ;;  %v2077_v53 = vld [vmem:[%s2882_s20 + $0xf8] sm:$0xf0] }
  0x28   : > { %1627 = vmatpush.bf16.msrb.mxu3 %v2725_v60  ;;  %v2203_v54 = vld [vmem:[%s2882_s20 + $0x60] sm:$0xf]  ;;  %v2609_v55 = vld [vmem:[%s2882_s20 + $0x64] sm:$0xf0]  ;;  %v2657_v14 = vld [vmem:[%s2882_s20 + $0x94] sm:$0xf0] }
  0x29   : > { %592 = vmatpush.bf16.msra.mxu0 %v2672_v33  ;;  %v2064_v33 = vor.u32 %v2664_v26, %v2061_v27  ;;  %v2204_v60 = vor.u32 %v2609_v55, %v2203_v54  ;;  %v2019_v62 = vld [vmem:[%s2882_s20 + $0x80] sm:$0xf]  ;;  %v2655_v63 = vld [vmem:[%s2882_s20 + $0x84] sm:$0xf0] }
  0x2a   : > { %1535 = vmatpush.bf16.msrb.mxu1 %v2720_v47  ;;  %v2196_v47 = vor.u32 %v2607_v42, %v2195_v41  ;;  %v2219_v15 = vld [vmem:[%s2882_s20 + $0x80] sm:$0xf] }
  0x2b   : > { %1034 = vmatpush.bf16.msra.mxu2 %v2628_v34  ;;  %v2188_v34 = vor.u32 %v2605_v29, %v2187_v28  ;;  %v2235_v54 = vld [vmem:[%s2882_s20 + $0xa0] sm:$0xf] }
  0x2c   : > { %593 = vmatmul.bf16.vlgmr.msra.gmra.mxu0 %v1964_v43  ;;  %1628 = vmatpush.bf16.msrb.mxu3 %v2724_v23  ;;  %v2622_v43 = vld [vmem:[%s2882_s20 + $0xd4] sm:$0xf]  ;;  %v2419_v55 = vld [vmem:[%s2882_s20 + $0x40] sm:$0xf] }
  0x2d   : > { %678 = vmatpush.bf16.msrb.mxu0 %v2830_v1  ;;  %2145 = vmatmul.msk.bf16.gmra.mxu1 %vm536_vm0, %v2032_v44  ;;  %v2045_v1 = vld [vmem:[%s2882_s20 + $0xb8] sm:$0xf0] }
  0x2e   : > { %1035 = vmatmul.bf16.vlgmr.msra.gmra.mxu2 %v2156_v45  ;;  %1536 = vmatpush.bf16.msrb.mxu1 %v2719_v61  ;;  %v2261_v44 = vld [vmem:[%s2882_s20 + $0xd8] sm:$0xf0]  ;;  %v2004_v45 = vor.u32 %v2651_v38, %v2003_v37  ;;  %v2615_v37 = vld [vmem:[%s2882_s20 + $0x94] sm:$0xf0]  ;;  %v2686_v38 = vld [vmem:[%s2882_s20 + $0x34] sm:$0xf] }
  0x2f   : > { %1120 = vmatpush.bf16.msrb.mxu2 %v2838_v3  ;;  %2337 = vmatmul.msk.bf16.gmra.mxu3 %vm536_vm0, %v2224_v46  ;;  %v2601_v3 = vld [vmem:[%s2882_s20 + $0x24] sm:$0xf0]  ;;  %v2072_v46 = vor.u32 %v2666_v39, %v2069_v40  ;;  %v2264_v48 = vor.u32 %v2622_v43, %v2261_v44  ;;  %v2413_v39 = vld [vmem:[%s2882_s20 + $0x38] sm:$0xf0] }
  0x30   : > { %v2172_v8 = vor.u32 %v2601_v3, %v2171_v2  ;;  %v2211_v2 = vld [vmem:[%s2882_s20 + $0x70] sm:$0xf]  ;;  %v2611_v3 = vld [vmem:[%s2882_s20 + $0x74] sm:$0xf0] }
  0x31   : > { %679 = vmatpush.bf16.msrb.mxu0 %v2847_v5  ;;  %v2237_v5 = vld [vmem:[%s2882_s20 + $0xa8] sm:$0xf0] }
  0x32   : > { %1537 = vmatpush.bf16.msrb.mxu1 %v2718_v22 }
  0x33   : > { %1121 = vmatpush.bf16.msrb.mxu2 %v2858_v7  ;;  %v2048_v7 = vor.u32 %v2660_v0, %v2045_v1  ;;  %v2670_v0 = vld [vmem:[%s2882_s20 + $0x104] sm:$0xf]  ;;  %v2085_v1 = vld [vmem:[%s2882_s20 + $0x108] sm:$0xf0] }
  0x35   : > { %680 = vmatpush.bf16.msrb.mxu0 %v2868_v9  ;;  %v2240_v9 = vor.u32 %v2616_v4, %v2237_v5  ;;  %v2626_v4 = vld [vmem:[%s2882_s20 + $0xf4] sm:$0xf]  ;;  %v2277_v5 = vld [vmem:[%s2882_s20 + $0xf8] sm:$0xf0] }
  0x36   : > { %1538 = vmatpush.bf16.msrb.mxu1 %v2717_v36  ;;  %v2687_v36 = vld [vmem:[%s2882_s20 + $0x34] sm:$0xf0] }
  0x37   : > { %1122 = vmatpush.bf16.msrb.mxu2 %v2877_v11  ;;  %v2647_v11 = vld [vmem:[%s2882_s20 + $0x44] sm:$0xf0] }
  0x38   : > { %v1988_v18 = vor.u32 %v2647_v11, %v1987_v10  ;;  %v2280_v10 = vor.u32 %v2626_v4, %v2277_v5 }
  0x39   : > { %681 = vmatpush.bf16.msrb.mxu0 %v2890_v13  ;;  %v2053_v13 = vld [vmem:[%s2882_s20 + $0xc8] sm:$0xf0] }
  0x3a   : > { %v2056_v19 = vor.u32 %v2662_v12, %v2053_v13  ;;  %1539 = vmatpush.bf16.msrb.mxu1 %v2716_v49  ;;  %v2027_v13 = vld [vmem:[%s2882_s20 + $0x90] sm:$0xf] }
  0x3b   : > { %1123 = vmatpush.bf16.msrb.mxu2 %v2902_v17  ;;  %v2245_v17 = vld [vmem:[%s2882_s20 + $0xb8] sm:$0xf0]  ;;  %v2028_v22 = vor.u32 %v2657_v14, %v2027_v13  ;;  %v2243_v13 = vld [vmem:[%s2882_s20 + $0xb0] sm:$0xf] }
  0x3c   : > { %598 = vmatmul.bf16.gmra.mxu0 %v1972_v56  ;;  %v2248_v21 = vor.u32 %v2618_v16, %v2245_v17  ;;  %v2624_v56 = vld [vmem:[%s2882_s20 + $0xe4] sm:$0xf]  ;;  %v2403_v16 = vld [vmem:[%s2882_s20 + $0x20] sm:$0xf]  ;;  %v2685_v17 = vld [vmem:[%s2882_s20 + $0x24] sm:$0xf0] }
  0x3d   : > { %2146 = vmatmul.msk.bf16.gmra.mxu1 %vm536_vm0, %v2040_v57  ;;  %v2269_v57 = vld [vmem:[%s2882_s20 + $0xe8] sm:$0xf0]  ;;  %v2404_v23 = vor.u32 %v2685_v17, %v2403_v16  ;;  %v2427_v14 = vld [vmem:[%s2882_s20 + $0x50] sm:$0xf]  ;;  %v2619_v16 = vld [vmem:[%s2882_s20 + $0xb4] sm:$0xf0] }
  0x3e   : > { %1040 = vmatmul.bf16.gmra.mxu2 %v2164_v58  ;;  %v2012_v58 = vor.u32 %v2653_v51, %v2011_v50  ;;  %v2272_v61 = vor.u32 %v2624_v56, %v2269_v57  ;;  %v2689_v56 = vld [vmem:[%s2882_s20 + $0x44] sm:$0xf0]  ;;  %v2690_v17 = vld [vmem:[%s2882_s20 + $0x54] sm:$0xf] }
  0x3f   : > { %2338 = vmatmul.msk.bf16.gmra.mxu3 %vm536_vm0, %v2232_v59  ;;  %v2080_v59 = vor.u32 %v2668_v52, %v2077_v53  ;;  %v2043_v52 = vld [vmem:[%s2882_s20 + $0xb0] sm:$0xf]  ;;  %v2661_v53 = vld [vmem:[%s2882_s20 + $0xb4] sm:$0xf0]  ;;  %v2617_v57 = vld [vmem:[%s2882_s20 + $0xa4] sm:$0xf0] }
  0x4c   : > { %603 = vmatmul.bf16.gmra.mxu0 %v1980_v6  ;;  %v2020_v6 = vor.u32 %v2655_v63, %v2019_v62  ;;  %v2044_v62 = vor.u32 %v2661_v53, %v2043_v52  ;;  %v2420_v63 = vor.u32 %v2689_v56, %v2419_v55  ;;  %v2692_v52 = vld [vmem:[%s2882_s20 + $0x64] sm:$0xf]  ;;  %v2437_v53 = vld [vmem:[%s2882_s20 + $0x68] sm:$0xf0] }
  0x4d   : > { %2147 = vmatmul.msk.bf16.gmra.mxu1 %vm536_vm0, %v2048_v7  ;;  %v2088_v7 = vor.u32 %v2670_v0, %v2085_v1 }
  0x4e   : > { %1045 = vmatmul.bf16.gmra.mxu2 %v2172_v8 }
  0x4f   : > { %2339 = vmatmul.msk.bf16.gmra.mxu3 %vm536_vm0, %v2240_v9  ;;  %v2212_v9 = vor.u32 %v2611_v3, %v2211_v2  ;;  %v2236_v2 = vor.u32 %v2617_v57, %v2235_v54 }
  0x5c   : > { %608 = vmatmul.bf16.gmra.mxu0 %v1988_v18  ;;  %v2613_v18 = vld [vmem:[%s2882_s20 + $0x84] sm:$0xf0] }
  0x5d   : > { %2148 = vmatmul.msk.bf16.gmra.mxu1 %vm536_vm0, %v2056_v19  ;;  %v2684_v19 = vld [vmem:[%s2882_s20 + $0x24] sm:$0xf]  ;;  %v2220_v26 = vor.u32 %v2613_v18, %v2219_v15  ;;  %v2691_v15 = vld [vmem:[%s2882_s20 + $0x54] sm:$0xf0]  ;;  %v2429_v18 = vld [vmem:[%s2882_s20 + $0x58] sm:$0xf0] }
  0x5e   : > { %1050 = vmatmul.bf16.gmra.mxu2 %v2180_v20  ;;  %v2405_v20 = vld [vmem:[%s2882_s20 + $0x28] sm:$0xf0] }
  0x5f   : > { %2340 = vmatmul.msk.bf16.gmra.mxu3 %vm536_vm0, %v2248_v21  ;;  %v2408_v27 = vor.u32 %v2684_v19, %v2405_v20 }
  0x6c   : > { %613 = vmatmul.bf16.gmra.mxu0 %v1996_v32  ;;  %v2035_v32 = vld [vmem:[%s2882_s20 + $0xa0] sm:$0xf] }
  0x6d   : > { %2149 = vmatmul.msk.bf16.gmra.mxu1 %vm536_vm0, %v2064_v33  ;;  %v2659_v33 = vld [vmem:[%s2882_s20 + $0xa4] sm:$0xf0] }
  0x6e   : > { %1055 = vmatmul.bf16.gmra.mxu2 %v2188_v34  ;;  %v2227_v34 = vld [vmem:[%s2882_s20 + $0x90] sm:$0xf]  ;;  %v2036_v42 = vor.u32 %v2659_v33, %v2035_v32  ;;  %v2244_v32 = vor.u32 %v2619_v16, %v2243_v13  ;;  %v2432_v33 = vor.u32 %v2690_v17, %v2429_v18  ;;  %v2067_v13 = vld [vmem:[%s2882_s20 + $0xe0] sm:$0xf]  ;;  %v2695_v17 = vld [vmem:[%s2882_s20 + $0x74] sm:$0xf0] }
  0x6f   : > { %2341 = vmatmul.msk.bf16.gmra.mxu3 %vm536_vm0, %v2256_v35  ;;  %v2411_v35 = vld [vmem:[%s2882_s20 + $0x30] sm:$0xf]  ;;  %v2623_v18 = vld [vmem:[%s2882_s20 + $0xd4] sm:$0xf0] }
  0x70   : > { %v2412_v43 = vor.u32 %v2687_v36, %v2411_v35  ;;  %v2443_v16 = vld [vmem:[%s2882_s20 + $0x70] sm:$0xf] }
  0x7c   : > { %618 = vmatmul.bf16.gmra.mxu0 %v2004_v45 }
  0x7d   : > { %2150 = vmatmul.msk.bf16.gmra.mxu1 %vm536_vm0, %v2072_v46  ;;  %v2228_v46 = vor.u32 %v2615_v37, %v2227_v34 }
  0x7e   : > { %1060 = vmatmul.bf16.gmra.mxu2 %v2196_v47  ;;  %v2416_v47 = vor.u32 %v2686_v38, %v2413_v39  ;;  %v2059_v38 = vld [vmem:[%s2882_s20 + $0xd0] sm:$0xf]  ;;  %v2665_v39 = vld [vmem:[%s2882_s20 + $0xd4] sm:$0xf0] }
  0x7f   : > { %2342 = vmatmul.msk.bf16.gmra.mxu3 %vm536_vm0, %v2264_v48  ;;  %v2060_v56 = vor.u32 %v2665_v39, %v2059_v38  ;;  %v2444_v39 = vor.u32 %v2695_v17, %v2443_v16  ;;  %v2625_v16 = vld [vmem:[%s2882_s20 + $0xe4] sm:$0xf0]  ;;  %v2696_v17 = vld [vmem:[%s2882_s20 + $0x84] sm:$0xf] }
  0x8c   : > { %623 = vmatmul.bf16.gmra.mxu0 %v2012_v58  ;;  %v2688_v58 = vld [vmem:[%s2882_s20 + $0x44] sm:$0xf] }
  0x8d   : > { %2151 = vmatmul.msk.bf16.gmra.mxu1 %vm536_vm0, %v2080_v59  ;;  %v2421_v59 = vld [vmem:[%s2882_s20 + $0x48] sm:$0xf0] }
  0x8e   : > { %1065 = vmatmul.bf16.gmra.mxu2 %v2204_v60  ;;  %v2424_v3 = vor.u32 %v2688_v58, %v2421_v59 }
  0x8f   : > { %2343 = vmatmul.msk.bf16.gmra.mxu3 %vm536_vm0, %v2272_v61 }
  0x9a   : > { %v3056_v8 = vpop.f32.mrf.mxu1 }
  0x9c   : > { %628 = vmatmul.bf16.gmra.mxu0 %v2020_v6 }
  0x9d   : > { %2152 = vmatmul.msk.bf16.gmra.mxu1 %vm536_vm0, %v2088_v7 }
  0x9e   : > { %1070 = vmatmul.bf16.gmra.mxu2 %v2212_v9  ;;  %v2051_v9 = vld [vmem:[%s2882_s20 + $0xc0] sm:$0xf] }
  0x9f   : > { %2344 = vmatmul.msk.bf16.gmra.mxu3 %vm536_vm0, %v2280_v10  ;;  %v2663_v10 = vld [vmem:[%s2882_s20 + $0xc4] sm:$0xf0] }
  0xa2   : > { %v3060_v11 = vpop.f32.mrf.mxu3  ;;  %v3062_v12 = vpop.f32.mrf.mxu1 }
  0xa9   : > { %v3074_v24 = vpop.f32.mrf.mxu0 }
  0xaa   : > { %v3072_v21 = vpop.f32.mrf.mxu3  ;;  %v3076_v25 = vpop.f32.mrf.mxu1 }
  0xac   : > { %633 = vmatmul.bf16.gmra.mxu0 %v2028_v22  ;;  %v2052_v22 = vor.u32 %v2663_v10, %v2051_v9 }
  0xad   : > { %1540 = vmatmul.bf16.vlgmr.msrb.gmra.mxu1 %v2404_v23  ;;  %v2428_v23 = vor.u32 %v2691_v15, %v2427_v14  ;;  %v2667_v14 = vld [vmem:[%s2882_s20 + $0xe4] sm:$0xf0]  ;;  %v2259_v15 = vld [vmem:[%s2882_s20 + $0xd0] sm:$0xf] }
  0xae   : > { %1075 = vmatmul.bf16.gmra.mxu2 %v2220_v26  ;;  %v2068_v38 = vor.u32 %v2667_v14, %v2067_v13  ;;  %v2267_v13 = vld [vmem:[%s2882_s20 + $0xe0] sm:$0xf] }
  0xaf   : > { %2577 = vmatmul.msk.bf16.vlgmr.msrb.gmra.mxu3 %vm536_vm0, %v2408_v27  ;;  %v2451_v14 = vld [vmem:[%s2882_s20 + $0x80] sm:$0xf] }
  0xb1   : > { %v3079_v28 = vpop.f32.mrf.mxu2  ;;  %v3083_v30 = vpop.f32.mrf.mxu0 }
  0xb2   : > { %v3081_v29 = vpop.f32.mrf.mxu3  ;;  %v3085_v31 = vpop.f32.mrf.mxu1 }
  0xb9   : > { %v3095_v40 = vpop.f32.mrf.mxu2  ;;  %v3099_v44 = vpop.f32.mrf.mxu0 }
  0xba   : > { %v3097_v41 = vpop.f32.mrf.mxu3  ;;  %v3101_v45 = vpop.f32.mrf.mxu1 }
  0xbc   : > { %638 = vmatmul.bf16.gmra.mxu0 %v2036_v42  ;;  %v2251_v42 = vld [vmem:[%s2882_s20 + $0xc0] sm:$0xf] }
  0xbd   : > { %1545 = vmatmul.bf16.gmra.mxu1 %v2412_v43  ;;  %v2435_v43 = vld [vmem:[%s2882_s20 + $0x60] sm:$0xf] }
  0xbe   : > { %1080 = vmatmul.bf16.gmra.mxu2 %v2228_v46  ;;  %v2693_v46 = vld [vmem:[%s2882_s20 + $0x64] sm:$0xf0] }
  0xbf   : > { %2578 = vmatmul.msk.bf16.gmra.mxu3 %vm536_vm0, %v2416_v47  ;;  %v2621_v47 = vld [vmem:[%s2882_s20 + $0xc4] sm:$0xf0]  ;;  %v2436_v57 = vor.u32 %v2693_v46, %v2435_v43  ;;  %v2260_v46 = vor.u32 %v2623_v18, %v2259_v15  ;;  %v2453_v18 = vld [vmem:[%s2882_s20 + $0x88] sm:$0xf0] }
  0xc0   : > { %v2697_v15 = vld [vmem:[%s2882_s20 + $0x84] sm:$0xf0] }
  0xc1   : > { %v3104_v48 = vpop.f32.mrf.mxu2  ;;  %v3108_v50 = vpop.f32.mrf.mxu0 }
  0xc2   : > { %v3106_v49 = vpop.f32.mrf.mxu3  ;;  %v3110_v51 = vpop.f32.mrf.mxu1 }
  0xc9   : > { %v3120_v60 = vpop.f32.mrf.mxu2  ;;  %v3124_v0 = vpop.f32.mrf.mxu0 }
  0xca   : > { %v3122_v61 = vpop.f32.mrf.mxu3  ;;  %v3126_v1 = vpop.f32.mrf.mxu1 }
  0xcc   : > { %643 = vmatmul.bf16.gmra.mxu0 %v2044_v62  ;;  %v2252_v62 = vor.u32 %v2621_v47, %v2251_v42 }
  0xcd   : > { %1550 = vmatmul.bf16.gmra.mxu1 %v2420_v63  ;;  %v2440_v63 = vor.u32 %v2692_v52, %v2437_v53 }
  0xce   : > { %1085 = vmatmul.bf16.gmra.mxu2 %v2236_v2 }
  0xcf   : > { %2579 = vmatmul.msk.bf16.gmra.mxu3 %vm536_vm0, %v2424_v3 }
  0xd1   : > { %v3129_v4 = vpop.f32.mrf.mxu2  ;;  %v3133_v6 = vpop.f32.mrf.mxu0 }
  0xd2   : > { %v3131_v5 = vpop.f32.mrf.mxu3  ;;  %v3135_v7 = vpop.f32.mrf.mxu1 }
  0xd9   : > { %v3145_v19 = vpop.f32.mrf.mxu2  ;;  %v3149_v26 = vpop.f32.mrf.mxu0 }
  0xda   : > { %v3147_v20 = vpop.f32.mrf.mxu3  ;;  %3588 = vst [vmem:[#allocation2_spill] sm:$0xff] %v3149_v26  ;;  %v3151_v27 = vpop.f32.mrf.mxu1 }
  0xdc   : > { %648 = vmatmul.bf16.gmra.mxu0 %v2052_v22  ;;  %v2694_v22 = vld [vmem:[%s2882_s20 + $0x74] sm:$0xf] }
  0xdd   : > { %1555 = vmatmul.bf16.gmra.mxu1 %v2428_v23  ;;  %v2445_v23 = vld [vmem:[%s2882_s20 + $0x78] sm:$0xf0] }
  0xde   : > { %1090 = vmatmul.bf16.gmra.mxu2 %v2244_v32  ;;  %v2448_v47 = vor.u32 %v2694_v22, %v2445_v23 }
  0xdf   : > { %2580 = vmatmul.msk.bf16.gmra.mxu3 %vm536_vm0, %v2432_v33 }
  0xe1   : > { %v3154_v34 = vpop.f32.mrf.mxu2  ;;  %v3158_v36 = vpop.f32.mrf.mxu0 }
  0xe2   : > { %3589 = vst [vmem:[#allocation3_spill] sm:$0xff] %v3154_v34  ;;  %v3156_v35 = vpop.f32.mrf.mxu3  ;;  %v3160_v37 = vpop.f32.mrf.mxu1 }
  0xe3   : > { %3590 = vst [vmem:[#allocation4_spill] sm:$0xff] %v3156_v35 }
  0xe4   : > { %3591 = vst [vmem:[#allocation5_spill] sm:$0xff] %v3158_v36 }
  0xe9   : > { %v3170_v54 = vpop.f32.mrf.mxu2  ;;  %v3174_v58 = vpop.f32.mrf.mxu0 }
  0xea   : > { %3592 = vst [vmem:[#allocation6_spill] sm:$0xff] %v3170_v54  ;;  %v3172_v55 = vpop.f32.mrf.mxu3  ;;  %v3176_v59 = vpop.f32.mrf.mxu1 }
  0xeb   : > { %3593 = vst [vmem:[#allocation7_spill] sm:$0xff] %v3172_v55 }
  0xec   : > { %3594 = vst [vmem:[#allocation8_spill] sm:$0xff] %v3174_v58  ;;  %653 = vmatmul.bf16.gmra.mxu0 %v2060_v56 }
  0xed   : > { %1560 = vmatmul.bf16.gmra.mxu1 %v2436_v57 }
  0xee   : > { %1095 = vmatmul.bf16.gmra.mxu2 %v2252_v62  ;;  %v2075_v62 = vld [vmem:[%s2882_s20 + $0xf0] sm:$0xf] }
  0xef   : > { %2581 = vmatmul.msk.bf16.gmra.mxu3 %vm536_vm0, %v2440_v63  ;;  %v2669_v63 = vld [vmem:[%s2882_s20 + $0xf4] sm:$0xf0] }
  0xf1   : > { %v3179_v2 = vpop.f32.mrf.mxu2  ;;  %v3183_v9 = vpop.f32.mrf.mxu0 }
  0xf2   : > { %3595 = vst [vmem:[#allocation9_spill] sm:$0xff] %v3179_v2  ;;  %v3181_v3 = vpop.f32.mrf.mxu3  ;;  %v3185_v10 = vpop.f32.mrf.mxu1 }
  0xf3   : > { %3596 = vst [vmem:[#allocation10_spill] sm:$0xff] %v3181_v3 }
  0xf4   : > { %3597 = vst [vmem:[#allocation11_spill] sm:$0xff] %v3183_v9 }
  0xf9   : > { %v3195_v32 = vpop.f32.mrf.mxu2  ;;  %v3199_v42 = vpop.f32.mrf.mxu0 }
  0xfa   : > { %3598 = vst [vmem:[#allocation12_spill] sm:$0xff] %v3195_v32  ;;  %v3197_v33 = vpop.f32.mrf.mxu3  ;;  %v3201_v43 = vpop.f32.mrf.mxu1 }
  0xfb   : > { %3599 = vst [vmem:[#allocation13_spill] sm:$0xff] %v3197_v33  ;;  %v2700_v33 = vld [vmem:[%s2882_s20 + $0xa4] sm:$0xf] }
  0xfc   : > { %3600 = vst [vmem:[#allocation14_spill] sm:$0xff] %v3199_v42  ;;  %658 = vmatmul.bf16.gmra.mxu0 %v2068_v38  ;;  %v2076_v38 = vor.u32 %v2669_v63, %v2075_v62 }
  0xfd   : > { %1565 = vmatmul.bf16.gmra.mxu1 %v2444_v39  ;;  %v2452_v39 = vor.u32 %v2697_v15, %v2451_v14  ;;  %v2083_v15 = vld [vmem:[%s2882_s20 + $0x100] sm:$0xf] }
  0xfe   : > { %1100 = vmatmul.bf16.gmra.mxu2 %v2260_v46 }
  0xff   : > { %2582 = vmatmul.msk.bf16.gmra.mxu3 %vm536_vm0, %v2448_v47 }
 0x101   : > { %v3204_v52 = vpop.f32.mrf.mxu2  ;;  %v3208_v56 = vpop.f32.mrf.mxu0 }
 0x102   : > { %3601 = vst [vmem:[#allocation15_spill] sm:$0xff] %v3204_v52  ;;  %v3206_v53 = vpop.f32.mrf.mxu3  ;;  %v3210_v57 = vpop.f32.mrf.mxu1 }
 0x103   : > { %3602 = vst [vmem:[#allocation16_spill] sm:$0xff] %v3206_v53  ;;  %v2456_v53 = vor.u32 %v2696_v17, %v2453_v18  ;;  %v2627_v17 = vld [vmem:[%s2882_s20 + $0xf4] sm:$0xf0]  ;;  %v2698_v18 = vld [vmem:[%s2882_s20 + $0x94] sm:$0xf] }
 0x104   : > { %3603 = vst [vmem:[#allocation17_spill] sm:$0xff] %v3208_v56  ;;  %v2268_v56 = vor.u32 %v2625_v16, %v2267_v13  ;;  %v2459_v13 = vld [vmem:[%s2882_s20 + $0x90] sm:$0xf]  ;;  %v2699_v16 = vld [vmem:[%s2882_s20 + $0x94] sm:$0xf0] }
 0x109   : > { %v3220_v22 = vpop.f32.mrf.mxu2  ;;  %v3224_v46 = vpop.f32.mrf.mxu0 }
 0x10a   : > { %3604 = vst [vmem:[#allocation18_spill] sm:$0xff] %v3220_v22  ;;  %v3222_v23 = vpop.f32.mrf.mxu3  ;;  %v3226_v47 = vpop.f32.mrf.mxu1  ;;  %v2275_v22 = vld [vmem:[%s2882_s20 + $0xf0] sm:$0xf] }
 0x10b   : > { %3605 = vst [vmem:[#allocation19_spill] sm:$0xff] %v3222_v23  ;;  %v2276_v52 = vor.u32 %v2627_v17, %v2275_v22  ;;  %v2640_v22 = vld [vmem:[%s2882_s20 + $0x14] sm:$0xf]  ;;  %v1965_v17 = vld [vmem:[%s2882_s20 + $0x18] sm:$0xf0] }
 0x10c   : > { %3606 = vst [vmem:[#allocation20_spill] sm:$0xff] %v3224_v46  ;;  %663 = vmatmul.bf16.gmra.mxu0 %v2076_v38  ;;  %v2671_v46 = vld [vmem:[%s2882_s20 + $0x104] sm:$0xf0]  ;;  %v2461_v38 = vld [vmem:[%s2882_s20 + $0x98] sm:$0xf0] }
 0x10d   : > { %1570 = vmatmul.bf16.gmra.mxu1 %v2452_v39  ;;  %v2464_v42 = vor.u32 %v2698_v18, %v2461_v38  ;;  %v2596_v18 = vld [vmem:[%s2882_s20 + $0x4] sm:$0xf]  ;;  %v2467_v38 = vld [vmem:[%s2882_s20 + $0xa0] sm:$0xf] }
 0x10e   : > { %1105 = vmatmul.bf16.gmra.mxu2 %v2268_v56 }
 0x10f   : > { %2583 = vmatmul.msk.bf16.gmra.mxu3 %vm536_vm0, %v2456_v53  ;;  %v2084_v53 = vor.u32 %v2671_v46, %v2083_v15 }
 0x111   : > { %v3229_v23 = vpop.f32.mrf.mxu2  ;;  %v3233_v63 = vpop.f32.mrf.mxu0 }
 0x112   : > { %3607 = vst [vmem:[#allocation21_spill] sm:$0xff] %v3229_v23  ;;  %v3231_v62 = vpop.f32.mrf.mxu3  ;;  %v3235_v14 = vpop.f32.mrf.mxu1  ;;  %v2460_v23 = vor.u32 %v2699_v16, %v2459_v13 }
 0x113   : > { %3608 = vst [vmem:[#allocation22_spill] sm:$0xff] %v3231_v62 }
 0x114   : > { %3609 = vst [vmem:[#allocation23_spill] sm:$0xff] %v3233_v63 }
 0x119   : > { %v3245_v39 = vpop.f32.mrf.mxu2  ;;  %v629_v62 = vpop.f32.mrf.mxu0 }
 0x11a   : > { %3610 = vst [vmem:[#allocation24_spill] sm:$0xff] %v3245_v39  ;;  %v3247_v56 = vpop.f32.mrf.mxu3  ;;  %v3249_v63 = vpop.f32.mrf.mxu1  ;;  %v719_v46 = vadd.f32 %v3056_v8, %v629_v62  ;;  %v1968_v62 = vor.u32 %v2640_v22, %v1965_v17 }
 0x11b   : > { %3611 = vst [vmem:[#allocation25_spill] sm:$0xff] %v3247_v56 }
 0x11c   : > { %668 = vmatmul.bf16.gmra.mxu0 %v2084_v53  ;;  %v2701_v53 = vld [vmem:[%s2882_s20 + $0xa4] sm:$0xf0] }
 0x11d   : > { %1575 = vmatmul.bf16.gmra.mxu1 %v2460_v23  ;;  %v2157_v23 = vld [vmem:[%s2882_s20 + $0x8] sm:$0xf0] }
 0x11e   : > { %1110 = vmatmul.bf16.gmra.mxu2 %v2276_v52  ;;  %v2469_v52 = vld [vmem:[%s2882_s20 + $0xa8] sm:$0xf0]  ;;  %v2160_v3 = vor.u32 %v2596_v18, %v2157_v23  ;;  %v2598_v23 = vld [vmem:[%s2882_s20 + $0x14] sm:$0xf] }
 0x11f   : > { %2584 = vmatmul.msk.bf16.gmra.mxu3 %vm536_vm0, %v2464_v42  ;;  %v2472_v2 = vor.u32 %v2700_v33, %v2469_v52  ;;  %v2703_v52 = vld [vmem:[%s2882_s20 + $0xb4] sm:$0xf0] }
 0x121   : > { %v1071_v15 = vpop.f32.mrf.mxu2  ;;  %v631_v56 = vpop.f32.mrf.mxu0 }
 0x122   : > { %v3253_v13 = vpop.f32.mrf.mxu3  ;;  %v3255_v16 = vadd.f32 %v1071_v15, %v719_v46  ;;  %v3257_v39 = vpop.f32.mrf.mxu1  ;;  %v721_v42 = vadd.f32 %v3062_v12, %v631_v56 }
 0x123   : > { %3612 = vst [vmem:[#allocation26_spill] sm:$0xff] %v3253_v13  ;;  %v2468_v13 = vor.u32 %v2701_v53, %v2467_v38  ;;  %v2642_v38 = vld [vmem:[%s2882_s20 + $0x24] sm:$0xf]  ;;  %v1973_v53 = vld [vmem:[%s2882_s20 + $0x28] sm:$0xf0] }
 0x129   : > { %v1073_v32 = vpop.f32.mrf.mxu2  ;;  %v634_v15 = vpop.f32.mrf.mxu0 }
 0x12a   : > { %v3268_v8 = vpop.f32.mrf.mxu3  ;;  %v3270_v46 = vadd.f32 %v1073_v32, %v721_v42  ;;  %v1541_v9 = vpop.f32.mrf.mxu1  ;;  %v724_v12 = vadd.f32 %v3076_v25, %v634_v15  ;;  %v2165_v42 = vld [vmem:[%s2882_s20 + $0x18] sm:$0xf0]  ;;  %v1976_v15 = vor.u32 %v2642_v38, %v1973_v53 }
 0x12b   : > { %3613 = vst [vmem:[#allocation27_spill] sm:$0xff] %v3268_v8  ;;  %v2168_v55 = vor.u32 %v2598_v23, %v2165_v42  ;;  %v2600_v42 = vld [vmem:[%s2882_s20 + $0x24] sm:$0xf] }
 0x12c   : > { %2137 = vmatmul.msk.bf16.vlgmr.msrb.gmra.mxu0 %vm536_vm0, %v1968_v62  ;;  %v2477_v62 = vld [vmem:[%s2882_s20 + $0xb8] sm:$0xf0] }
 0x12d   : > { %1580 = vmatmul.bf16.gmra.mxu1 %v2468_v13  ;;  %v2475_v13 = vld [vmem:[%s2882_s20 + $0xb0] sm:$0xf] }
 0x12e   : > { %2329 = vmatmul.msk.bf16.vlgmr.msrb.gmra.mxu2 %vm536_vm0, %v2160_v3  ;;  %v2702_v3 = vld [vmem:[%s2882_s20 + $0xb4] sm:$0xf]  ;;  %v2476_v58 = vor.u32 %v2703_v52, %v2475_v13  ;;  %v1981_v52 = vld [vmem:[%s2882_s20 + $0x38] sm:$0xf0] }
 0x12f   : > { %2585 = vmatmul.msk.bf16.gmra.mxu3 %vm536_vm0, %v2472_v2  ;;  %v2480_v54 = vor.u32 %v2702_v3, %v2477_v62  ;;  %v2644_v13 = vld [vmem:[%s2882_s20 + $0x34] sm:$0xf]  ;;  %v2705_v3 = vld [vmem:[%s2882_s20 + $0xc4] sm:$0xf0]  ;;  %v2173_v62 = vld [vmem:[%s2882_s20 + $0x28] sm:$0xf0] }
 0x130   : > { %v2176_v36 = vor.u32 %v2600_v42, %v2173_v62  ;;  %v1989_v62 = vld [vmem:[%s2882_s20 + $0x48] sm:$0xf0] }
 0x131   : > { %v1076_v32 = vpop.f32.mrf.mxu2  ;;  %v636_v33 = vpop.f32.mrf.mxu0 }
 0x132   : > { %v1630_v56 = vpop.f32.mrf.mxu3  ;;  %v3276_v22 = vadd.f32 %v1076_v32, %v724_v12  ;;  %v1543_v18 = vpop.f32.mrf.mxu1  ;;  %v726_v2 = vadd.f32 %v3085_v31, %v636_v33 }
 0x133   : > { %v3278_v17 = vadd.f32 %v1630_v56, %v1541_v9 }
 0x139   : > { %v1078_v8 = vpop.f32.mrf.mxu2  ;;  %v639_v32 = vpop.f32.mrf.mxu0 }
 0x13a   : > { %v1632_v25 = vpop.f32.mrf.mxu3  ;;  %v3289_v12 = vadd.f32 %v1078_v8, %v726_v2  ;;  %v1546_v56 = vpop.f32.mrf.mxu1  ;;  %v729_v31 = vadd.f32 %v3101_v45, %v639_v32  ;;  %v2485_v2 = vld [vmem:[%s2882_s20 + $0xc8] sm:$0xf0] }
 0x13b   : > { %v3291_v9 = vadd.f32 %v1632_v25, %v1543_v18 }
 0x13c   : > { %2138 = vmatmul.msk.bf16.gmra.mxu0 %vm536_vm0, %v1976_v15  ;;  %v1984_v15 = vor.u32 %v2644_v13, %v1981_v52 }
 0x13d   : > { %1585 = vmatmul.bf16.gmra.mxu1 %v2476_v58  ;;  %v2483_v58 = vld [vmem:[%s2882_s20 + $0xc0] sm:$0xf] }
 0x13e   : > { %2330 = vmatmul.msk.bf16.gmra.mxu2 %vm536_vm0, %v2168_v55  ;;  %v2704_v55 = vld [vmem:[%s2882_s20 + $0xc4] sm:$0xf]  ;;  %v2484_v32 = vor.u32 %v2705_v3, %v2483_v58 }
 0x13f   : > { %2586 = vmatmul.msk.bf16.gmra.mxu3 %vm536_vm0, %v2480_v54  ;;  %v2488_v35 = vor.u32 %v2704_v55, %v2485_v2  ;;  %v2646_v3 = vld [vmem:[%s2882_s20 + $0x44] sm:$0xf]  ;;  %v2602_v55 = vld [vmem:[%s2882_s20 + $0x34] sm:$0xf]  ;;  %v2491_v2 = vld [vmem:[%s2882_s20 + $0xd0] sm:$0xf] }
 0x141   : > { %v1081_v8 = vpop.f32.mrf.mxu2  ;;  %v641_v53 = vpop.f32.mrf.mxu0 }
 0x142   : > { %v1635_v33 = vpop.f32.mrf.mxu3  ;;  %v3297_v18 = vadd.f32 %v1081_v8, %v729_v31  ;;  %v1548_v23 = vpop.f32.mrf.mxu1  ;;  %v731_v54 = vadd.f32 %v3110_v51, %v641_v53 }
 0x143   : > { %v3299_v38 = vadd.f32 %v1635_v33, %v1546_v56 }
 0x149   : > { %v1083_v25 = vpop.f32.mrf.mxu2  ;;  %v644_v8 = vpop.f32.mrf.mxu0 }
 0x14a   : > { %v1637_v45 = vpop.f32.mrf.mxu3  ;;  %v3310_v31 = vadd.f32 %v1083_v25, %v731_v54  ;;  %v1551_v33 = vpop.f32.mrf.mxu1  ;;  %v734_v51 = vadd.f32 %v3126_v1, %v644_v8  ;;  %v2707_v54 = vld [vmem:[%s2882_s20 + $0xd4] sm:$0xf0]  ;;  %v2181_v25 = vld [vmem:[%s2882_s20 + $0x38] sm:$0xf0] }
 0x14b   : > { %v3312_v56 = vadd.f32 %v1637_v45, %v1548_v23  ;;  %v2493_v45 = vld [vmem:[%s2882_s20 + $0xd8] sm:$0xf0]  ;;  %v2492_v8 = vor.u32 %v2707_v54, %v2491_v2  ;;  %v2184_v34 = vor.u32 %v2602_v55, %v2181_v25  ;;  %v2648_v54 = vld [vmem:[%s2882_s20 + $0x54] sm:$0xf] }
 0x14c   : > { %2139 = vmatmul.msk.bf16.gmra.mxu0 %vm536_vm0, %v1984_v15  ;;  %v1997_v25 = vld [vmem:[%s2882_s20 + $0x58] sm:$0xf0] }
 0x14d   : > { %1590 = vmatmul.bf16.gmra.mxu1 %v2484_v32  ;;  %v1992_v32 = vor.u32 %v2646_v3, %v1989_v62 }
 0x14e   : > { %2331 = vmatmul.msk.bf16.gmra.mxu2 %vm536_vm0, %v2176_v36  ;;  %v2706_v36 = vld [vmem:[%s2882_s20 + $0xd4] sm:$0xf] }
 0x14f   : > { %2587 = vmatmul.msk.bf16.gmra.mxu3 %vm536_vm0, %v2488_v35  ;;  %v2496_v26 = vor.u32 %v2706_v36, %v2493_v45  ;;  %v2604_v36 = vld [vmem:[%s2882_s20 + $0x44] sm:$0xf]  ;;  %v2499_v45 = vld [vmem:[%s2882_s20 + $0xe0] sm:$0xf] }
 0x151   : > { %v1086_v53 = vpop.f32.mrf.mxu2  ;;  %v646_v42 = vpop.f32.mrf.mxu0 }
 0x152   : > { %v1640_v23 = vpop.f32.mrf.mxu3  ;;  %v3318_v13 = vadd.f32 %v1086_v53, %v734_v51  ;;  %v1553_v58 = vpop.f32.mrf.mxu1  ;;  %v736_v35 = vadd.f32 %v3135_v7, %v646_v42 }
 0x153   : > { %v3320_v52 = vadd.f32 %v1640_v23, %v1551_v33 }
 0x159   : > { %v1088_v15 = vpop.f32.mrf.mxu2  ;;  %v649_v53 = vpop.f32.mrf.mxu0 }
 0x15a   : > { %v1642_v1 = vpop.f32.mrf.mxu3  ;;  %v3331_v51 = vadd.f32 %v1088_v15, %v736_v35  ;;  %v1556_v23 = vpop.f32.mrf.mxu1  ;;  %v739_v7 = vadd.f32 %v3151_v27, %v649_v53  ;;  %v2709_v35 = vld [vmem:[%s2882_s20 + $0xe4] sm:$0xf0]  ;;  %v2189_v15 = vld [vmem:[%s2882_s20 + $0x48] sm:$0xf0] }
 0x15b   : > { %v3333_v33 = vadd.f32 %v1642_v1, %v1553_v58  ;;  %v2501_v1 = vld [vmem:[%s2882_s20 + $0xe8] sm:$0xf0]  ;;  %v2500_v53 = vor.u32 %v2709_v35, %v2499_v45  ;;  %v2650_v35 = vld [vmem:[%s2882_s20 + $0x64] sm:$0xf] }
 0x15c   : > { %2140 = vmatmul.msk.bf16.gmra.mxu0 %vm536_vm0, %v1992_v32 }
 0x15d   : > { %1595 = vmatmul.bf16.gmra.mxu1 %v2492_v8  ;;  %v2000_v8 = vor.u32 %v2648_v54, %v1997_v25 }
 0x15e   : > { %2332 = vmatmul.msk.bf16.gmra.mxu2 %vm536_vm0, %v2184_v34  ;;  %v2708_v34 = vld [vmem:[%s2882_s20 + $0xe4] sm:$0xf] }
 0x15f   : > { %2588 = vmatmul.msk.bf16.gmra.mxu3 %vm536_vm0, %v2496_v26 }
 0x161   : > { %v1091_v42 = vpop.f32.mrf.mxu2  ;;  %v651_v55 = vpop.f32.mrf.mxu0 }
 0x162   : > { %v1645_v58 = vpop.f32.mrf.mxu3  ;;  %v3339_v3 = vadd.f32 %v1091_v42, %v739_v7  ;;  %v1558_v2 = vpop.f32.mrf.mxu1  ;;  %v741_v26 = vadd.f32 %v3160_v37, %v651_v55 }
 0x163   : > { %v3341_v62 = vadd.f32 %v1645_v58, %v1556_v23 }
 0x164   : > { %3614 = vst [vmem:[#allocation28_spill] sm:$0xff] %v3339_v3  ;;  %v2504_v3 = vor.u32 %v2708_v34, %v2501_v1  ;;  %v2606_v34 = vld [vmem:[%s2882_s20 + $0x54] sm:$0xf]  ;;  %v2507_v1 = vld [vmem:[%s2882_s20 + $0xf0] sm:$0xf] }
 0x165   : > { %3615 = vst [vmem:[#allocation29_spill] sm:$0xff] %v3341_v62  ;;  %v2192_v62 = vor.u32 %v2604_v36, %v2189_v15  ;;  %v2005_v15 = vld [vmem:[%s2882_s20 + $0x68] sm:$0xf0] }
 0x169   : > { %v1093_v32 = vpop.f32.mrf.mxu2  ;;  %v654_v42 = vpop.f32.mrf.mxu0 }
 0x16a   : > { %v1647_v27 = vpop.f32.mrf.mxu3  ;;  %v3352_v7 = vadd.f32 %v1093_v32, %v741_v26  ;;  %v1561_v58 = vpop.f32.mrf.mxu1  ;;  %v744_v37 = vadd.f32 %v3176_v59, %v654_v42  ;;  %v2711_v26 = vld [vmem:[%s2882_s20 + $0xf4] sm:$0xf0]  ;;  %v2197_v32 = vld [vmem:[%s2882_s20 + $0x58] sm:$0xf0] }
 0x16b   : > { %v3354_v23 = vadd.f32 %v1647_v27, %v1558_v2  ;;  %v2509_v27 = vld [vmem:[%s2882_s20 + $0xf8] sm:$0xf0]  ;;  %v2508_v42 = vor.u32 %v2711_v26, %v2507_v1  ;;  %v2652_v26 = vld [vmem:[%s2882_s20 + $0x74] sm:$0xf] }
 0x16c   : > { %2141 = vmatmul.msk.bf16.gmra.mxu0 %vm536_vm0, %v2000_v8 }
 0x16d   : > { %1600 = vmatmul.bf16.gmra.mxu1 %v2500_v53  ;;  %v2008_v53 = vor.u32 %v2650_v35, %v2005_v15 }
 0x16e   : > { %2333 = vmatmul.msk.bf16.gmra.mxu2 %vm536_vm0, %v2192_v62  ;;  %v2710_v62 = vld [vmem:[%s2882_s20 + $0xf4] sm:$0xf] }
 0x16f   : > { %2589 = vmatmul.msk.bf16.gmra.mxu3 %vm536_vm0, %v2504_v3 }
 0x171   : > { %v1096_v55 = vpop.f32.mrf.mxu2  ;;  %v656_v36 = vpop.f32.mrf.mxu0 }
 0x172   : > { %v1650_v2 = vpop.f32.mrf.mxu3  ;;  %v3360_v54 = vadd.f32 %v1096_v55, %v744_v37  ;;  %v1563_v45 = vpop.f32.mrf.mxu1  ;;  %v746_v3 = vadd.f32 %v3185_v10, %v656_v36 }
 0x173   : > { %v3362_v25 = vadd.f32 %v1650_v2, %v1561_v58 }
 0x174   : > { %3616 = vst [vmem:[#allocation30_spill] sm:$0xff] %v3360_v54  ;;  %v2512_v54 = vor.u32 %v2710_v62, %v2509_v27  ;;  %v2608_v62 = vld [vmem:[%s2882_s20 + $0x64] sm:$0xf]  ;;  %v2515_v27 = vld [vmem:[%s2882_s20 + $0x100] sm:$0xf] }
 0x175   : > { %3617 = vst [vmem:[#allocation31_spill] sm:$0xff] %v3362_v25  ;;  %v2200_v25 = vor.u32 %v2606_v34, %v2197_v32  ;;  %v2013_v32 = vld [vmem:[%s2882_s20 + $0x78] sm:$0xf0] }
 0x179   : > { %v1098_v8 = vpop.f32.mrf.mxu2  ;;  %v659_v55 = vpop.f32.mrf.mxu0 }
 0x17a   : > { %v1652_v59 = vpop.f32.mrf.mxu3  ;;  %v3373_v37 = vadd.f32 %v1098_v8, %v746_v3  ;;  %v1566_v2 = vpop.f32.mrf.mxu1  ;;  %v749_v10 = vadd.f32 %v3201_v43, %v659_v55  ;;  %v2713_v3 = vld [vmem:[%s2882_s20 + $0x104] sm:$0xf0]  ;;  %v2205_v8 = vld [vmem:[%s2882_s20 + $0x68] sm:$0xf0] }
 0x17b   : > { %v3375_v58 = vadd.f32 %v1652_v59, %v1563_v45  ;;  %v2517_v59 = vld [vmem:[%s2882_s20 + $0x108] sm:$0xf0]  ;;  %v2516_v55 = vor.u32 %v2713_v3, %v2515_v27 }
 0x17c   : > { %2142 = vmatmul.msk.bf16.gmra.mxu0 %vm536_vm0, %v2008_v53 }
 0x17d   : > { %1605 = vmatmul.bf16.gmra.mxu1 %v2508_v42  ;;  %v2016_v42 = vor.u32 %v2652_v26, %v2013_v32 }
 0x17e   : > { %2334 = vmatmul.msk.bf16.gmra.mxu2 %vm536_vm0, %v2200_v25  ;;  %v2712_v25 = vld [vmem:[%s2882_s20 + $0x104] sm:$0xf] }
 0x17f   : > { %2590 = vmatmul.msk.bf16.gmra.mxu3 %vm536_vm0, %v2512_v54 }
 0x181   : > { %v1101_v36 = vpop.f32.mrf.mxu2  ;;  %v661_v34 = vpop.f32.mrf.mxu0 }
 0x182   : > { %v1655_v45 = vpop.f32.mrf.mxu3  ;;  %v3381_v35 = vadd.f32 %v1101_v36, %v749_v10  ;;  %v1568_v1 = vpop.f32.mrf.mxu1  ;;  %v751_v54 = vadd.f32 %v3210_v57, %v661_v34 }
 0x183   : > { %v3383_v15 = vadd.f32 %v1655_v45, %v1566_v2 }
 0x184   : > { %3618 = vst [vmem:[#allocation32_spill] sm:$0xff] %v3381_v35  ;;  %v2520_v35 = vor.u32 %v2712_v25, %v2517_v59  ;;  %v2714_v25 = vld [vmem:[%s2882_s20 + $0x114] sm:$0xf]  ;;  %v2525_v59 = vld [vmem:[%s2882_s20 + $0x118] sm:$0xf0] }
 0x185   : > { %3619 = vst [vmem:[#allocation33_spill] sm:$0xff] %v3383_v15  ;;  %v2208_v15 = vor.u32 %v2608_v62, %v2205_v8  ;;  %v2523_v62 = vld [vmem:[%s2882_s20 + $0x110] sm:$0xf]  ;;  %v2715_v8 = vld [vmem:[%s2882_s20 + $0x114] sm:$0xf0]  ;;  %s2595_s20 = sshll.u32 %s3657_s12, 8 }
 0x186   : > { %s3430_s29 = scalar_lea.vmem %s3587_s3, %s2595_s20 }
 0x189   : > { %v1103_v53 = vpop.f32.mrf.mxu2  ;;  %v664_v36 = vpop.f32.mrf.mxu0 }
 0x18a   : > { %v1657_v43 = vpop.f32.mrf.mxu3  ;;  %v3394_v10 = vadd.f32 %v1103_v53, %v751_v54  ;;  %v1571_v45 = vpop.f32.mrf.mxu1  ;;  %v754_v57 = vadd.f32 %v3226_v47, %v664_v36  ;;  %v2528_v36 = vor.u32 %v2714_v25, %v2525_v59 }
 0x18b   : > { %v3396_v2 = vadd.f32 %v1657_v43, %v1568_v1 }
 0x18c   : > { %2143 = vmatmul.msk.bf16.gmra.mxu0 %vm536_vm0, %v2016_v42 }
 0x18d   : > { %1610 = vmatmul.bf16.gmra.mxu1 %v2516_v55 }
 0x18e   : > { %2335 = vmatmul.msk.bf16.gmra.mxu2 %vm536_vm0, %v2208_v15 }
 0x18f   : > { %2591 = vmatmul.msk.bf16.gmra.mxu3 %vm536_vm0, %v2520_v35  ;;  %v2524_v35 = vor.u32 %v2715_v8, %v2523_v62 }
 0x191   : > { %v1106_v34 = vpop.f32.mrf.mxu2  ;;  %v666_v27 = vpop.f32.mrf.mxu0 }
 0x192   : > { %v1660_v1 = vpop.f32.mrf.mxu3  ;;  %v3402_v26 = vadd.f32 %v1106_v34, %v754_v57  ;;  %v1573_v3 = vpop.f32.mrf.mxu1  ;;  %v756_v54 = vadd.f32 %v3235_v14, %v666_v27  ;;  %v1161_v14 = vadd.f32 %v3060_v11, %v3255_v16 }
 0x193   : > { %v3404_v32 = vadd.f32 %v1660_v1, %v1571_v45 }
 0x199   : > { %v1108_v15 = vpop.f32.mrf.mxu2  ;;  %v669_v42 = vpop.f32.mrf.mxu0 }
 0x19a   : > { %v1662_v53 = vpop.f32.mrf.mxu3  ;;  %v3411_v43 = vadd.f32 %v1108_v15, %v756_v54  ;;  %v1576_v55 = vpop.f32.mrf.mxu1  ;;  %v759_v45 = vadd.f32 %v3249_v63, %v669_v42  ;;  %v1163_v54 = vadd.f32 %v3072_v21, %v3270_v46  ;;  %v1166_v21 = vadd.f32 %v3081_v29, %v3276_v22 }
 0x19b   : > { %v3413_v47 = vadd.f32 %v1662_v53, %v1573_v3  ;;  %v3425_v3 = vld [vmem:[%s3586_s2] ss:$0 sm:$0xff] }
 0x19d   : > { %1615 = vmatmul.bf16.gmra.mxu1 %v2524_v35 }
 0x19f   : > { %2592 = vmatmul.msk.bf16.gmra.mxu3 %vm536_vm0, %v2528_v36 }
 0x1a1   : > { %v1111_v57 = vpop.f32.mrf.mxu2  ;;  %v671_v62 = vpop.f32.mrf.mxu0 }
 0x1a2   : > { %v1665_v34 = vpop.f32.mrf.mxu3  ;;  %v3419_v1 = vadd.f32 %v1111_v57, %v759_v45  ;;  %v1578_v8 = vpop.f32.mrf.mxu1  ;;  %v761_v63 = vadd.f32 %v3257_v39, %v671_v62 }
 0x1a3   : > { %v1666_v27 = vadd.f32 %v1665_v34, %v1576_v55 }
 0x1a5   : > { %v1724_v25 = vadd.f32 %v1666_v27, %v1161_v14 }
 0x1a7   : > { %v1760_v11 = vadd.f32 %v3425_v3, %v1724_v25 }
 0x1a9   : > { %1792 = vst [vmem:[%s3430_s29 + $0x70] sm:$0xff] %v1760_v11  ;;  %v1113_v16 = vpop.f32.mrf.mxu2  ;;  %v683_v35 = vpop.f32.mrf.mxu0 }
 0x1aa   : > { %v1667_v59 = vpop.f32.mrf.mxu3  ;;  %v3437_v15 = vadd.f32 %v1113_v16, %v761_v63  ;;  %v1581_v42 = vpop.f32.mrf.mxu1  ;;  %v684_v36 = vadd.f32 %v683_v35, %v3074_v24  ;;  %v1168_v16 = vadd.f32 %v3097_v41, %v3289_v12 }
 0x1ab   : > { %v1668_v53 = vadd.f32 %v1667_v59, %v1578_v8 }
 0x1ac   : > { %v1037_v39 = vadd.f32 %v3079_v28, %v684_v36 }
 0x1ad   : > { %v1725_v55 = vadd.f32 %v1668_v53, %v1163_v54 }
 0x1af   : > { %v1761_v45 = vadd.f32 %v3425_v3, %v1725_v55 }
 0x1b1   : > { %1793 = vst [vmem:[%s3430_s29 + $0x78] sm:$0xff] %v1761_v45  ;;  %v1125_v57 = vpop.f32.mrf.mxu2  ;;  %v685_v27 = vpop.f32.mrf.mxu0  ;;  %v1171_v45 = vadd.f32 %v3106_v49, %v3297_v18 }
 0x1b2   : > { %v1670_v34 = vpop.f32.mrf.mxu3  ;;  %v1126_v46 = vadd.f32 %v1125_v57, %v1037_v39  ;;  %v1583_v62 = vpop.f32.mrf.mxu1  ;;  %v686_v24 = vadd.f32 %v685_v27, %v3083_v30 }
 0x1b3   : > { %v1671_v14 = vadd.f32 %v1670_v34, %v1581_v42 }
 0x1b4   : > { %v1710_v8 = vadd.f32 %v3278_v17, %v1126_v46  ;;  %v1039_v28 = vadd.f32 %v3095_v40, %v686_v24 }
 0x1b5   : > { %v1726_v25 = vadd.f32 %v1671_v14, %v1166_v21 }
 0x1b6   : > { %v1746_v11 = vadd.f32 %v3425_v3, %v1710_v8 }
 0x1b7   : > { %v1762_v63 = vadd.f32 %v3425_v3, %v1726_v25 }
 0x1b8   : > { %1778 = vst [vmem:[%s3430_s29] sm:$0xff] %v1746_v11 }
 0x1b9   : > { %1794 = vst [vmem:[%s3430_s29 + $0x80] sm:$0xff] %v1762_v63  ;;  %v1127_v29 = vpop.f32.mrf.mxu2  ;;  %v688_v54 = vpop.f32.mrf.mxu0 }
 0x1ba   : > { %v1672_v22 = vpop.f32.mrf.mxu3  ;;  %v1128_v59 = vadd.f32 %v1127_v29, %v1039_v28  ;;  %v1586_v53 = vpop.f32.mrf.mxu1  ;;  %v689_v42 = vadd.f32 %v688_v54, %v3099_v44 }
 0x1bb   : > { %v1673_v17 = vadd.f32 %v1672_v22, %v1583_v62  ;;  %v1173_v62 = vadd.f32 %v3122_v61, %v3310_v31  ;;  %v1176_v22 = vadd.f32 %v3131_v5, %v3318_v13 }
 0x1bc   : > { %v1711_v30 = vadd.f32 %v3291_v9, %v1128_v59  ;;  %v1042_v36 = vadd.f32 %v3104_v48, %v689_v42  ;;  %v1178_v42 = vadd.f32 %v3147_v20, %v3331_v51 }
 0x1bd   : > { %v1727_v35 = vadd.f32 %v1673_v17, %v1168_v16 }
 0x1be   : > { %v1747_v55 = vadd.f32 %v3425_v3, %v1711_v30 }
 0x1bf   : > { %v1763_v40 = vadd.f32 %v3425_v3, %v1727_v35 }
 0x1c0   : > { %1779 = vst [vmem:[%s3430_s29 + $0x8] sm:$0xff] %v1747_v55 }
 0x1c1   : > { %1795 = vst [vmem:[%s3430_s29 + $0x88] sm:$0xff] %v1763_v40  ;;  %v1130_v41 = vpop.f32.mrf.mxu2  ;;  %v690_v57 = vpop.f32.mrf.mxu0 }
 0x1c2   : > { %v1675_v12 = vpop.f32.mrf.mxu3  ;;  %v1131_v39 = vadd.f32 %v1130_v41, %v1042_v36  ;;  %v1588_v34 = vpop.f32.mrf.mxu1  ;;  %v691_v46 = vadd.f32 %v690_v57, %v3108_v50 }
 0x1c3   : > { %v1676_v9 = vadd.f32 %v1675_v12, %v1586_v53  ;;  %v3620_v12 = vld [vmem:[#allocation2_spill] sm:$0xff] }
 0x1c4   : > { %v1712_v44 = vadd.f32 %v3299_v38, %v1131_v39  ;;  %v1044_v27 = vadd.f32 %v3120_v60, %v691_v46 }
 0x1c5   : > { %v1728_v21 = vadd.f32 %v1676_v9, %v1171_v45  ;;  %v3621_v9 = vld [vmem:[#allocation3_spill] sm:$0xff] }
 0x1c6   : > { %v1748_v14 = vadd.f32 %v3425_v3, %v1712_v44  ;;  %v3623_v44 = vld [vmem:[#allocation4_spill] sm:$0xff] }
 0x1c7   : > { %v1764_v48 = vadd.f32 %v3425_v3, %v1728_v21 }
 0x1c8   : > { %1780 = vst [vmem:[%s3430_s29 + $0x10] sm:$0xff] %v1748_v14 }
 0x1c9   : > { %1796 = vst [vmem:[%s3430_s29 + $0x90] sm:$0xff] %v1764_v48  ;;  %v1132_v49 = vpop.f32.mrf.mxu2  ;;  %v693_v25 = vpop.f32.mrf.mxu0 }
 0x1ca   : > { %v1677_v18 = vpop.f32.mrf.mxu3  ;;  %v1133_v8 = vadd.f32 %v1132_v49, %v1044_v27  ;;  %v1591_v24 = vpop.f32.mrf.mxu1  ;;  %v694_v63 = vadd.f32 %v693_v25, %v3124_v0  ;;  %v3624_v27 = vld [vmem:[#allocation29_spill] sm:$0xff] }
 0x1cb   : > { %v1678_v38 = vadd.f32 %v1677_v18, %v1588_v34  ;;  %v3622_v34 = vld [vmem:[#allocation28_spill] sm:$0xff] }
 0x1cc   : > { %v1713_v50 = vadd.f32 %v3312_v56, %v1133_v8  ;;  %v1047_v29 = vadd.f32 %v3129_v4, %v694_v63  ;;  %v1181_v21 = vadd.f32 %v3623_v44, %v3622_v34 }
 0x1cd   : > { %v1729_v11 = vadd.f32 %v1678_v38, %v1173_v62  ;;  %v3625_v62 = vld [vmem:[#allocation5_spill] sm:$0xff] }
 0x1ce   : > { %v1749_v28 = vadd.f32 %v3425_v3, %v1713_v50 }
 0x1cf   : > { %v1765_v60 = vadd.f32 %v3425_v3, %v1729_v11 }
 0x1d0   : > { %1781 = vst [vmem:[%s3430_s29 + $0x18] sm:$0xff] %v1749_v28  ;;  %v3627_v28 = vld [vmem:[#allocation7_spill] sm:$0xff] }
 0x1d1   : > { %1797 = vst [vmem:[%s3430_s29 + $0x98] sm:$0xff] %v1765_v60  ;;  %v1135_v61 = vpop.f32.mrf.mxu2  ;;  %v695_v59 = vpop.f32.mrf.mxu0  ;;  %v1183_v60 = vadd.f32 %v3627_v28, %v3352_v7 }
 0x1d2   : > { %v1680_v31 = vpop.f32.mrf.mxu3  ;;  %v1136_v16 = vadd.f32 %v1135_v61, %v1047_v29  ;;  %v1593_v17 = vpop.f32.mrf.mxu1  ;;  %v696_v53 = vadd.f32 %v695_v59, %v3133_v6  ;;  %v3628_v59 = vld [vmem:[#allocation8_spill] sm:$0xff] }
 0x1d3   : > { %v1681_v56 = vadd.f32 %v1680_v31, %v1591_v24  ;;  %v3626_v24 = vld [vmem:[#allocation6_spill] sm:$0xff] }
 0x1d4   : > { %v1714_v0 = vadd.f32 %v3320_v52, %v1136_v16  ;;  %v1049_v35 = vadd.f32 %v3145_v19, %v696_v53  ;;  %v3629_v53 = vld [vmem:[#allocation9_spill] sm:$0xff] }
 0x1d5   : > { %v1730_v54 = vadd.f32 %v1681_v56, %v1176_v22 }
 0x1d6   : > { %v1750_v30 = vadd.f32 %v3425_v3, %v1714_v0 }
 0x1d7   : > { %v1766_v4 = vadd.f32 %v3425_v3, %v1730_v54 }
 0x1d8   : > { %1782 = vst [vmem:[%s3430_s29 + $0x20] sm:$0xff] %v1750_v30 }
 0x1d9   : > { %1798 = vst [vmem:[%s3430_s29 + $0xa0] sm:$0xff] %v1766_v4  ;;  %v1137_v5 = vpop.f32.mrf.mxu2  ;;  %v698_v40 = vpop.f32.mrf.mxu0 }
 0x1da   : > { %v1682_v13 = vpop.f32.mrf.mxu3  ;;  %v1138_v55 = vadd.f32 %v1137_v5, %v1049_v35  ;;  %v1596_v36 = vpop.f32.mrf.mxu1  ;;  %v699_v45 = vadd.f32 %v698_v40, %v3620_v12  ;;  %v3630_v35 = vld [vmem:[#allocation30_spill] sm:$0xff]  ;;  %v3632_v40 = vld [vmem:[#allocation31_spill] sm:$0xff] }
 0x1db   : > { %v1683_v52 = vadd.f32 %v1682_v13, %v1593_v17  ;;  %v3631_v5 = vld [vmem:[#allocation10_spill] sm:$0xff] }
 0x1dc   : > { %v1715_v6 = vadd.f32 %v3333_v33, %v1138_v55  ;;  %v1052_v57 = vadd.f32 %v3621_v9, %v699_v45  ;;  %v1186_v13 = vadd.f32 %v3631_v5, %v3630_v35 }
 0x1dd   : > { %v1731_v41 = vadd.f32 %v1683_v52, %v1178_v42 }
 0x1de   : > { %v1751_v39 = vadd.f32 %v3425_v3, %v1715_v6 }
 0x1df   : > { %v1767_v19 = vadd.f32 %v3425_v3, %v1731_v41  ;;  %v3633_v41 = vld [vmem:[#allocation11_spill] sm:$0xff] }
 0x1e0   : > { %1783 = vst [vmem:[%s3430_s29 + $0x28] sm:$0xff] %v1751_v39 }
 0x1e1   : > { %1799 = vst [vmem:[%s3430_s29 + $0xa8] sm:$0xff] %v1767_v19  ;;  %v1140_v20 = vpop.f32.mrf.mxu2  ;;  %v700_v14 = vpop.f32.mrf.mxu0  ;;  %v3634_v19 = vld [vmem:[#allocation12_spill] sm:$0xff] }
 0x1e2   : > { %v1685_v51 = vpop.f32.mrf.mxu3  ;;  %v1141_v46 = vadd.f32 %v1140_v20, %v1052_v57  ;;  %v1598_v48 = vpop.f32.mrf.mxu1  ;;  %v701_v8 = vadd.f32 %v700_v14, %v3625_v62 }
 0x1e3   : > { %v1686_v33 = vadd.f32 %v1685_v51, %v1596_v36  ;;  %v3635_v51 = vld [vmem:[#allocation13_spill] sm:$0xff] }
 0x1e4   : > { %v1716_v49 = vadd.f32 %v3624_v27, %v1141_v46  ;;  %v1054_v50 = vadd.f32 %v3626_v24, %v701_v8  ;;  %v1188_v34 = vadd.f32 %v3635_v51, %v3373_v37  ;;  %v3636_v27 = vld [vmem:[#allocation14_spill] sm:$0xff]  ;;  %v3637_v8 = vld [vmem:[#allocation15_spill] sm:$0xff]  ;;  %v3638_v24 = vld [vmem:[#allocation32_spill] sm:$0xff] }
 0x1e5   : > { %v1732_v18 = vadd.f32 %v1686_v33, %v1181_v21  ;;  %v3647_v51 = vld [vmem:[#allocation23_spill] sm:$0xff] }
 0x1e6   : > { %v1752_v38 = vadd.f32 %v3425_v3, %v1716_v49 }
 0x1e7   : > { %v1768_v25 = vadd.f32 %v3425_v3, %v1732_v18 }
 0x1e8   : > { %1784 = vst [vmem:[%s3430_s29 + $0x30] sm:$0xff] %v1752_v38 }
 0x1e9   : > { %1800 = vst [vmem:[%s3430_s29 + $0xb0] sm:$0xff] %v1768_v25  ;;  %v1142_v11 = vpop.f32.mrf.mxu2  ;;  %v703_v31 = vpop.f32.mrf.mxu0 }
 0x1ea   : > { %v1687_v63 = vpop.f32.mrf.mxu3  ;;  %v1143_v29 = vadd.f32 %v1142_v11, %v1054_v50  ;;  %v1601_v22 = vpop.f32.mrf.mxu1  ;;  %v704_v17 = vadd.f32 %v703_v31, %v3628_v59  ;;  %v3639_v50 = vld [vmem:[#allocation16_spill] sm:$0xff] }
 0x1eb   : > { %v1688_v61 = vadd.f32 %v1687_v63, %v1598_v48  ;;  %v1191_v11 = vadd.f32 %v3639_v50, %v3638_v24  ;;  %v3650_v50 = vld [vmem:[#allocation26_spill] sm:$0xff] }
 0x1ec   : > { %v1717_v16 = vadd.f32 %v3354_v23, %v1143_v29  ;;  %v1057_v30 = vadd.f32 %v3629_v53, %v704_v17  ;;  %v3640_v29 = vld [vmem:[#allocation33_spill] sm:$0xff]  ;;  %v3642_v17 = vld [vmem:[#allocation18_spill] sm:$0xff] }
 0x1ed   : > { %v1733_v56 = vadd.f32 %v1688_v61, %v1183_v60 }
 0x1ee   : > { %v1753_v0 = vadd.f32 %v3425_v3, %v1717_v16 }
 0x1ef   : > { %v1769_v54 = vadd.f32 %v3425_v3, %v1733_v56 }
 0x1f0   : > { %1785 = vst [vmem:[%s3430_s29 + $0x38] sm:$0xff] %v1753_v0 }
 0x1f1   : > { %1801 = vst [vmem:[%s3430_s29 + $0xb8] sm:$0xff] %v1769_v54  ;;  %v1145_v7 = vpop.f32.mrf.mxu2  ;;  %v705_v55 = vpop.f32.mrf.mxu0 }
 0x1f2   : > { %v1690_v4 = vpop.f32.mrf.mxu3  ;;  %v1146_v42 = vadd.f32 %v1145_v7, %v1057_v30  ;;  %v1603_v52 = vpop.f32.mrf.mxu1  ;;  %v706_v12 = vadd.f32 %v705_v55, %v3633_v41  ;;  %v3643_v30 = vld [vmem:[#allocation19_spill] sm:$0xff]  ;;  %v3644_v55 = vld [vmem:[#allocation20_spill] sm:$0xff] }
 0x1f3   : > { %v1691_v23 = vadd.f32 %v1690_v4, %v1601_v22  ;;  %v3641_v22 = vld [vmem:[#allocation17_spill] sm:$0xff]  ;;  %v1193_v7 = vadd.f32 %v3643_v30, %v3394_v10 }
 0x1f4   : > { %v1718_v36 = vadd.f32 %v3632_v40, %v1146_v42  ;;  %v1059_v9 = vadd.f32 %v3634_v19, %v706_v12 }
 0x1f5   : > { %v1734_v6 = vadd.f32 %v1691_v23, %v1186_v13 }
 0x1f6   : > { %v1754_v45 = vadd.f32 %v3425_v3, %v1718_v36 }
 0x1f7   : > { %v1770_v39 = vadd.f32 %v3425_v3, %v1734_v6  ;;  %v3645_v6 = vld [vmem:[#allocation21_spill] sm:$0xff] }
 0x1f8   : > { %1786 = vst [vmem:[%s3430_s29 + $0x40] sm:$0xff] %v1754_v45  ;;  %v3646_v45 = vld [vmem:[#allocation22_spill] sm:$0xff] }
 0x1f9   : > { %1802 = vst [vmem:[%s3430_s29 + $0xc0] sm:$0xff] %v1770_v39  ;;  %v1147_v57 = vpop.f32.mrf.mxu2  ;;  %v708_v46 = vpop.f32.mrf.mxu0  ;;  %v1196_v39 = vadd.f32 %v3646_v45, %v3402_v26 }
 0x1fa   : > { %v1692_v20 = vpop.f32.mrf.mxu3  ;;  %v1148_v44 = vadd.f32 %v1147_v57, %v1059_v9  ;;  %v1606_v33 = vpop.f32.mrf.mxu1  ;;  %v709_v49 = vadd.f32 %v708_v46, %v3636_v27  ;;  %v3649_v27 = vld [vmem:[#allocation25_spill] sm:$0xff] }
 0x1fb   : > { %v1693_v21 = vadd.f32 %v1692_v20, %v1603_v52 }
 0x1fc   : > { %v1719_v14 = vadd.f32 %v3375_v58, %v1148_v44  ;;  %v1062_v38 = vadd.f32 %v3637_v8, %v709_v49 }
 0x1fd   : > { %v1735_v48 = vadd.f32 %v1693_v21, %v1188_v34 }
 0x1fe   : > { %v1755_v18 = vadd.f32 %v3425_v3, %v1719_v14 }
 0x1ff   : > { %v1771_v62 = vadd.f32 %v3425_v3, %v1735_v48 }
 0x200   : > { %1787 = vst [vmem:[%s3430_s29 + $0x48] sm:$0xff] %v1755_v18 }
 0x201   : > { %1803 = vst [vmem:[%s3430_s29 + $0xc8] sm:$0xff] %v1771_v62  ;;  %v1150_v37 = vpop.f32.mrf.mxu2  ;;  %v710_v28 = vpop.f32.mrf.mxu0 }
 0x202   : > { %v1695_v25 = vpop.f32.mrf.mxu3  ;;  %v1151_v63 = vadd.f32 %v1150_v37, %v1062_v38  ;;  %v1608_v60 = vpop.f32.mrf.mxu1  ;;  %v711_v16 = vadd.f32 %v710_v28, %v3641_v22 }
 0x203   : > { %v1696_v58 = vadd.f32 %v1695_v25, %v1606_v33  ;;  %v3648_v33 = vld [vmem:[#allocation24_spill] sm:$0xff] }
 0x204   : > { %v1720_v61 = vadd.f32 %v3640_v29, %v1151_v63  ;;  %v1064_v0 = vadd.f32 %v3642_v17, %v711_v16 }
 0x205   : > { %v1736_v31 = vadd.f32 %v1696_v58, %v1191_v11  ;;  %v1201_v11 = vadd.f32 %v3650_v50, %v3419_v1 }
 0x206   : > { %v1756_v56 = vadd.f32 %v3425_v3, %v1720_v61 }
 0x207   : > { %v1772_v59 = vadd.f32 %v3425_v3, %v1736_v31 }
 0x208   : > { %1788 = vst [vmem:[%s3430_s29 + $0x50] sm:$0xff] %v1756_v56 }
 0x209   : > { %1804 = vst [vmem:[%s3430_s29 + $0xd0] sm:$0xff] %v1772_v59  ;;  %v1152_v54 = vpop.f32.mrf.mxu2  ;;  %v713_v5 = vpop.f32.mrf.mxu0 }
 0x20a   : > { %v1697_v53 = vpop.f32.mrf.mxu3  ;;  %v1153_v4 = vadd.f32 %v1152_v54, %v1064_v0  ;;  %v1611_v13 = vpop.f32.mrf.mxu1  ;;  %v714_v52 = vadd.f32 %v713_v5, %v3644_v55 }
 0x20b   : > { %v1698_v35 = vadd.f32 %v1697_v53, %v1608_v60  ;;  %v3651_v60 = vld [vmem:[#allocation27_spill] sm:$0xff] }
 0x20c   : > { %v1721_v42 = vadd.f32 %v3396_v2, %v1153_v4  ;;  %v1067_v41 = vadd.f32 %v3645_v6, %v714_v52  ;;  %v1203_v29 = vadd.f32 %v3651_v60, %v3437_v15 }
 0x20d   : > { %v1737_v23 = vadd.f32 %v1698_v35, %v1193_v7 }
 0x20e   : > { %v1757_v40 = vadd.f32 %v3425_v3, %v1721_v42 }
 0x20f   : > { %v1773_v36 = vadd.f32 %v3425_v3, %v1737_v23 }
 0x210   : > { %1789 = vst [vmem:[%s3430_s29 + $0x58] sm:$0xff] %v1757_v40 }
 0x211   : > { %1805 = vst [vmem:[%s3430_s29 + $0xd8] sm:$0xff] %v1773_v36  ;;  %v1155_v10 = vpop.f32.mrf.mxu2  ;;  %v715_v9 = vpop.f32.mrf.mxu0 }
 0x212   : > { %v1700_v12 = vpop.f32.mrf.mxu3  ;;  %v1156_v19 = vadd.f32 %v1155_v10, %v1067_v41  ;;  %v716_v34 = vadd.f32 %v715_v9, %v3647_v51  ;;  %v1613_v44 = vpop.f32.mrf.mxu1 }
 0x213   : > { %v1701_v2 = vadd.f32 %v1700_v12, %v1611_v13 }
 0x214   : > { %v1722_v57 = vadd.f32 %v3404_v32, %v1156_v19  ;;  %v1069_v14 = vadd.f32 %v3648_v33, %v716_v34  ;;  %v1198_v32 = vadd.f32 %v3649_v27, %v3411_v43 }
 0x215   : > { %v1738_v20 = vadd.f32 %v1701_v2, %v1196_v39 }
 0x216   : > { %v1758_v21 = vadd.f32 %v3425_v3, %v1722_v57 }
 0x217   : > { %v1774_v46 = vadd.f32 %v3425_v3, %v1738_v20 }
 0x218   : > { %1790 = vst [vmem:[%s3430_s29 + $0x60] sm:$0xff] %v1758_v21 }
 0x219   : > { %1806 = vst [vmem:[%s3430_s29 + $0xe0] sm:$0xff] %v1774_v46  ;;  %v1157_v26 = vpop.f32.mrf.mxu2 }
 0x21a   : > { %v1702_v48 = vpop.f32.mrf.mxu3  ;;  %v1158_v49 = vadd.f32 %v1157_v26, %v1069_v14  ;;  %v1616_v25 = vpop.f32.mrf.mxu1 }
 0x21b   : > { %v1703_v18 = vadd.f32 %v1702_v48, %v1613_v44 }
 0x21c   : > { %v1723_v62 = vadd.f32 %v3413_v47, %v1158_v49 }
 0x21d   : > { %v1739_v8 = vadd.f32 %v1703_v18, %v1198_v32 }
 0x21e   : > { %v1759_v38 = vadd.f32 %v3425_v3, %v1723_v62 }
 0x21f   : > { %v1775_v37 = vadd.f32 %v3425_v3, %v1739_v8 }
 0x220   : > { %1791 = vst [vmem:[%s3430_s29 + $0x68] sm:$0xff] %v1759_v38 }
 0x221   : > { %1807 = vst [vmem:[%s3430_s29 + $0xe8] sm:$0xff] %v1775_v37 }
 0x222   : > { %v1705_v24 = vpop.f32.mrf.mxu3  ;;  %v1618_v28 = vpop.f32.mrf.mxu1 }
 0x223   : > { %v1706_v63 = vadd.f32 %v1705_v24, %v1616_v25 }
 0x225   : > { %v1740_v58 = vadd.f32 %v1706_v63, %v1201_v11 }
 0x227   : > { %v1776_v43 = vadd.f32 %v3425_v3, %v1740_v58 }
 0x229   : > { %1808 = vst [vmem:[%s3430_s29 + $0xf0] sm:$0xff] %v1776_v43 }
 0x22a   : > { %v1707_v47 = vpop.f32.mrf.mxu3 }
 0x22b   : > { %v1708_v61 = vadd.f32 %v1707_v47, %v1618_v28 }
 0x22d   : > { %v1741_v31 = vadd.f32 %v1708_v61, %v1203_v29 }
 0x22f   : > { %v1777_v22 = vadd.f32 %v3425_v3, %v1741_v31 }
 0x231   : > { %1809 = vst [vmem:[%s3430_s29 + $0xf8] sm:$0xff] %v1777_v22 }
 0x232 PF: > { %s13_s14 = sadd.s32 1, %s2784_s14   ;;  %s3652_s12 = smov %s2780_s13 }
 0x233   : > { %p10_p5 = scmp.ge.s32.totalorder %s13_s14, 6   ;;  %s3653_s13 = smov %s3655_s15 }
 0x235   :  { %12 = sbr.rel (!%p10_p5) target bundleno = 2 (0x2), region = 67 }

// kernel: feature_loss_forward.10
= control target key start
LH: loop header
LB: loop body
LE: loop exit
PB: predicated region body
PF: predicated region fallthrough
CT: control target
= control target key end

     0   :  { %s462_s9 = smov 0   ;;  %s464_s10 = smov 0   ;;  %s538_s0 = inlined_call_operand.vmem [shape: f32[2,128,128], index: 0, kind: input, shape index: {}]   ;;  %s539_s1 = inlined_call_operand.vmem [shape: f32[2,128,128], index: 1, kind: input, shape index: {}]   ;;  %s540_s2 = inlined_call_operand.vmem [shape: f32[2,1,1], index: 2, kind: output, shape index: {}]  }
   0x1   :  { %s466_s11 = smov 0  }
   0x2 LB: > { %s24_s12 = sadd.s32 1, %s440_s10  ;;  %p386_p0 = scmp.ge.s32.totalorder %s444_s11, 1  ;;  %s444_s11 = sphi %s466_s11, %s12_s11   ;;  %s440_s10 = sphi %s464_s10, %s542_s10   ;;  %s436_s9 = sphi %s462_s9, %s541_s9  }
   0x3   : > { %p26_p1 = scmp.ge.s32.totalorder %s24_s12, 2  ;;  %p148_p2 = scmp.lt.s32.totalorder %s444_s11, 3 }
   0x5   : > { %s544_s12 = smov (%p26_p1, %s24_s12), 0  ;;  %p149_p3 = pnand %p386_p0, %p148_p2 }
   0x6   : > { %p182_p4 = scmp.lt.s32.totalorder (!%p149_p3), %s436_s9, 1 }
   0x7   : > { %152 = sbr.rel (%p149_p3) target bundleno = 233 (0xe9), region = 28 }
   0xc   : > { %s546_s9 = smov (!%p182_p4, %s436_s9), 1  ;;  %vm208_vm0 = vcmask 0  }
   0xd   : > { %s393_s13 = sshll.u32 %s546_s9, 7  ;;  %s203_s22 = scalar_lea.vmem %s540_s2, %s546_s9 }
   0xe   : > { %s486_s16 = scalar_lea.vmem %s538_s0, %s393_s13  ;;  %s491_s19 = scalar_lea.vmem %s539_s1, %s393_s13 }
   0xf   : > { %v210_v0 = vld [vmem:[%s486_s16] sm:$0xff]  ;;  %v211_v1 = vld [vmem:[%s486_s16 + $0x8] sm:$0xff]  ;;  %v212_v2 = vld [vmem:[%s486_s16 + $0x10] sm:$0xff] }
  0x10   : > { %v226_v3 = vld [vmem:[%s491_s19] sm:$0xff]  ;;  %v227_v4 = vld [vmem:[%s491_s19 + $0x8] sm:$0xff]  ;;  %v228_v5 = vld [vmem:[%s491_s19 + $0x10] sm:$0xff] }
  0x11   : > { %v242_v6 = vsub.f32 %v210_v0, %v226_v3  ;;  %v243_v7 = vsub.f32 %v211_v1, %v227_v4  ;;  %v213_v8 = vld [vmem:[%s486_s16 + $0x18] sm:$0xff]  ;;  %v244_v10 = vsub.f32 %v212_v2, %v228_v5  ;;  %v214_v11 = vld [vmem:[%s486_s16 + $0x20] sm:$0xff]  ;;  %v215_v16 = vld [vmem:[%s486_s16 + $0x28] sm:$0xff] }
  0x12   : > { %v229_v9 = vld [vmem:[%s491_s19 + $0x18] sm:$0xff]  ;;  %v230_v12 = vld [vmem:[%s491_s19 + $0x20] sm:$0xff]  ;;  %v231_v17 = vld [vmem:[%s491_s19 + $0x28] sm:$0xff] }
  0x13   : > { %v245_v13 = vsub.f32 %v213_v8, %v229_v9  ;;  %v259_v14 = vmul.f32 %v242_v6, %v242_v6  ;;  %v260_v15 = vmul.f32 %v243_v7, %v243_v7  ;;  %v246_v18 = vsub.f32 %v214_v11, %v230_v12  ;;  %v216_v20 = vld [vmem:[%s486_s16 + $0x30] sm:$0xff]  ;;  %v217_v25 = vld [vmem:[%s486_s16 + $0x38] sm:$0xff]  ;;  %v218_v30 = vld [vmem:[%s486_s16 + $0x40] sm:$0xff] }
  0x14   : > { %v261_v19 = vmul.f32 %v244_v10, %v244_v10  ;;  %v232_v21 = vld [vmem:[%s491_s19 + $0x30] sm:$0xff]  ;;  %v247_v22 = vsub.f32 %v215_v16, %v231_v17  ;;  %v233_v26 = vld [vmem:[%s491_s19 + $0x38] sm:$0xff]  ;;  %v234_v31 = vld [vmem:[%s491_s19 + $0x40] sm:$0xff] }
  0x15   : > { %v262_v23 = vmul.f32 %v245_v13, %v245_v13  ;;  %v275_v24 = vadd.f32 %v260_v15, %v259_v14  ;;  %v248_v27 = vsub.f32 %v216_v20, %v232_v21  ;;  %v263_v28 = vmul.f32 %v246_v18, %v246_v18  ;;  %v219_v35 = vld [vmem:[%s486_s16 + $0x48] sm:$0xff]  ;;  %v220_v40 = vld [vmem:[%s486_s16 + $0x50] sm:$0xff]  ;;  %v221_v45 = vld [vmem:[%s486_s16 + $0x58] sm:$0xff] }
  0x16   : > { %v249_v32 = vsub.f32 %v217_v25, %v233_v26  ;;  %v264_v33 = vmul.f32 %v247_v22, %v247_v22  ;;  %v235_v36 = vld [vmem:[%s491_s19 + $0x48] sm:$0xff]  ;;  %v250_v37 = vsub.f32 %v218_v30, %v234_v31  ;;  %v236_v41 = vld [vmem:[%s491_s19 + $0x50] sm:$0xff]  ;;  %v237_v46 = vld [vmem:[%s491_s19 + $0x58] sm:$0xff]  ;;  %v446_v15 = vmov 0.0  }
  0x17   : > { %v276_v29 = vadd.f32 %v275_v24, %v261_v19  ;;  %v265_v38 = vmul.f32 %v248_v27, %v248_v27  ;;  %v251_v42 = vsub.f32 %v219_v35, %v235_v36  ;;  %v252_v47 = vsub.f32 %v220_v40, %v236_v41  ;;  %v222_v50 = vld [vmem:[%s486_s16 + $0x60] sm:$0xff]  ;;  %v223_v55 = vld [vmem:[%s486_s16 + $0x68] sm:$0xff]  ;;  %v224_v60 = vld [vmem:[%s486_s16 + $0x70] sm:$0xff]  ;;  %209 = vst.msk [vmem:[%s203_s22] sm:$0x1] %vm208_vm0, %v446_v15 }
  0x18   : > { %v266_v43 = vmul.f32 %v249_v32, %v249_v32  ;;  %v267_v48 = vmul.f32 %v250_v37, %v250_v37  ;;  %v238_v51 = vld [vmem:[%s491_s19 + $0x60] sm:$0xff]  ;;  %v253_v52 = vsub.f32 %v221_v45, %v237_v46  ;;  %v239_v56 = vld [vmem:[%s491_s19 + $0x68] sm:$0xff]  ;;  %v240_v61 = vld [vmem:[%s491_s19 + $0x70] sm:$0xff] }
  0x19   : > { %v277_v34 = vadd.f32 %v276_v29, %v262_v23  ;;  %v268_v53 = vmul.f32 %v251_v42, %v251_v42  ;;  %v254_v57 = vsub.f32 %v222_v50, %v238_v51  ;;  %v269_v58 = vmul.f32 %v252_v47, %v252_v47  ;;  %v225_v1 = vld [vmem:[%s486_s16 + $0x78] sm:$0xff] }
  0x1a   : > { %v255_v62 = vsub.f32 %v223_v55, %v239_v56  ;;  %v270_v63 = vmul.f32 %v253_v52, %v253_v52  ;;  %v241_v2 = vld [vmem:[%s491_s19 + $0x78] sm:$0xff]  ;;  %v256_v3 = vsub.f32 %v224_v60, %v240_v61 }
  0x1b   : > { %v278_v39 = vadd.f32 %v277_v34, %v263_v28  ;;  %v271_v4 = vmul.f32 %v254_v57, %v254_v57  ;;  %v257_v6 = vsub.f32 %v225_v1, %v241_v2 }
  0x1c   : > { %v272_v7 = vmul.f32 %v255_v62, %v255_v62  ;;  %v273_v9 = vmul.f32 %v256_v3, %v256_v3 }
  0x1d   : > { %v279_v44 = vadd.f32 %v278_v39, %v264_v33  ;;  %v274_v11 = vmul.f32 %v257_v6, %v257_v6 }
  0x1e   : > { %v258_v23 = vld [vmem:[%s203_s22] sm:$0x1] }
  0x1f   : > { %v280_v49 = vadd.f32 %v279_v44, %v265_v38 }
  0x21   : > { %v281_v54 = vadd.f32 %v280_v49, %v266_v43 }
  0x23   : > { %v282_v59 = vadd.f32 %v281_v54, %v267_v48 }
  0x25   : > { %v283_v0 = vadd.f32 %v282_v59, %v268_v53 }
  0x27   : > { %v284_v5 = vadd.f32 %v283_v0, %v269_v58 }
  0x29   : > { %v285_v8 = vadd.f32 %v284_v5, %v270_v63 }
  0x2b   : > { %v286_v10 = vadd.f32 %v285_v8, %v271_v4 }
  0x2d   : > { %v287_v12 = vadd.f32 %v286_v10, %v272_v7 }
  0x2f   : > { %v288_v13 = vadd.f32 %v287_v12, %v273_v9 }
  0x31   : > { %v289_v14 = vadd.f32 %v288_v13, %v274_v11 }
  0x33   : > { %290 = vadd.xlane.f32.xlu0 %v289_v14 }
  0xa6   : > { %v291_v16 = vpop.xlane.xlu0 %290 }
  0xa7   : > { %v292_v17 = vrot.slane %v291_v16, 4 }
  0xa9   : > { %v293_v18 = vadd.f32 %v292_v17, %v291_v16 }
  0xab   : > { %v294_v19 = vrot.slane %v293_v18, 2 }
  0xad   : > { %v295_v20 = vadd.f32 %v294_v19, %v293_v18 }
  0xaf   : > { %v296_v21 = vrot.slane %v295_v20, 1 }
  0xb1   : > { %v297_v22 = vadd.f32 %v296_v21, %v295_v20 }
  0xb3   : > { %395 = vpush %v297_v22 }
  0xe4   : > { %s396_s23 = spop %395 }
  0xe5   : > { %v299_v24 = vstv %s396_s23 }
  0xe6   : > { %v300_v25 = vadd.f32 %v299_v24, %v258_v23 }
  0xe8   : > { %302 = vst.msk [vmem:[%s203_s22] sm:$0x1] %vm208_vm0, %v300_v25 }
  0xe9 PF: > { %s12_s11 = sadd.s32 1, %s444_s11   ;;  %s541_s9 = smov %s440_s10 }
  0xea   : > { %p9_p5 = scmp.ge.s32.totalorder %s12_s11, 4   ;;  %s542_s10 = smov %s544_s12 }
  0xec   :  { %11 = sbr.rel (!%p9_p5) target bundleno = 2 (0x2), region = 65 }

// kernel: feature_loss_forward.8
= control target key start
LH: loop header
LB: loop body
LE: loop exit
PB: predicated region body
PF: predicated region fallthrough
CT: control target
= control target key end

     0   :  { %s1965_s12 = smov 0   ;;  %s1967_s13 = smov 0   ;;  %s2439_s0 = inlined_call_operand.vmem [shape: bf16[4,144,192], index: 0, kind: input, shape index: {}]   ;;  %s2440_s1 = inlined_call_operand.vmem [shape: bf16[3,192,128], index: 1, kind: input, shape index: {}]   ;;  %s2441_s2 = inlined_call_operand.vmem [shape: f32[1,128], index: 2, kind: input, shape index: {}]   ;;  %s2442_s3 = inlined_call_operand.vmem [shape: bf16[4,128,128], index: 3, kind: output, shape index: {}]  }
   0x1   :  { %s1969_s14 = smov 0  }
   0x2 LB: > { %s25_s15 = sadd.s32 1, %s1939_s13  ;;  %p1309_p0 = scmp.ge.s32.totalorder %s1943_s14, 1  ;;  %s1943_s14 = sphi %s1969_s14, %s13_s14   ;;  %s1939_s13 = sphi %s1967_s13, %s2444_s13   ;;  %s1935_s12 = sphi %s1965_s12, %s2443_s12  }
   0x3   : > { %p27_p1 = scmp.ge.s32.totalorder %s25_s15, 4  ;;  %p151_p2 = scmp.lt.s32.totalorder %s1943_s14, 5 }
   0x5   : > { %s2446_s15 = smov (%p27_p1, %s25_s15), 0  ;;  %p152_p3 = pnand %p1309_p0, %p151_p2 }
   0x6   : > { %p179_p4 = scmp.lt.s32.totalorder (!%p152_p3), %s1935_s12, 3 }
   0x7   : > { %155 = sbr.rel (%p152_p3) target bundleno = 374 (0x176), region = 32 }
   0xc   : > { %v1807_v0 = vld [vmem:[%s2440_s1 + $0x98] sm:$0xff]  ;;  %v1806_v4 = vld [vmem:[%s2440_s1 + $0x90] sm:$0xff]  ;;  %s2448_s12 = smov (!%p179_p4, %s1935_s12), 3  ;;  %v1805_v8 = vld [vmem:[%s2440_s1 + $0x88] sm:$0xff]  ;;  %vm432_vm0 = vcmask 523264  }
   0xd   : > { %v1989_v1 = vld [vmem:[%s2440_s1 + $0xb8] sm:$0xff]  ;;  %457 = vmatpush.bf16.msra.mxu0 %v1807_v0  ;;  %v2006_v5 = vld [vmem:[%s2440_s1 + $0xb0] sm:$0xff]  ;;  %s1895_s5 = smul.u32 144, %s2448_s12  ;;  %v2027_v9 = vld [vmem:[%s2440_s1 + $0xa8] sm:$0xff]  ;;  %s1755_s26 = sshll.u32 %s2448_s12, 6 }
   0xe   : > { %v1779_v2 = vld [vmem:[%s2440_s1 + $0x38] sm:$0xff]  ;;  %1887 = vmatpush.bf16.msra.mxu1 %v1989_v1  ;;  %v1778_v6 = vld [vmem:[%s2440_s1 + $0x30] sm:$0xff]  ;;  %v1777_v10 = vld [vmem:[%s2440_s1 + $0x28] sm:$0xff]  ;;  %s2381_s29 = scalar_lea.vmem %s2442_s3, %s1755_s26 }
   0xf   : > { %v1997_v3 = vld [vmem:[%s2440_s1 + $0x58] sm:$0xff]  ;;  %723 = vmatpush.bf16.msra.mxu2 %v1779_v2  ;;  %v2017_v7 = vld [vmem:[%s2440_s1 + $0x50] sm:$0xff]  ;;  %v2036_v11 = vld [vmem:[%s2440_s1 + $0x48] sm:$0xff]  ;;  %s2041_s20 = scalar_lea.vmem %s2439_s0, %s1895_s5 }
  0x10   : > { %1891 = vmatpush.bf16.msra.mxu3 %v1997_v3  ;;  %v1804_v12 = vld [vmem:[%s2440_s1 + $0x80] sm:$0xff]  ;;  %v1790_v15 = vld [vmem:[%s2041_s20 + $0x3c] sm:$0xf]  ;;  %v1762_v18 = vld [vmem:[%s2041_s20 + $0x34] sm:$0xf] }
  0x11   : > { %458 = vmatpush.bf16.msra.mxu0 %v1806_v4  ;;  %v2049_v13 = vld [vmem:[%s2440_s1 + $0xa0] sm:$0xff]  ;;  %v1501_v19 = vld [vmem:[%s2041_s20 + $0x38] sm:$0xf0]  ;;  %v1834_v26 = vld [vmem:[%s2440_s1 + $0xf0] sm:$0xff] }
  0x12   : > { %1888 = vmatpush.bf16.msra.mxu1 %v2006_v5  ;;  %v1776_v14 = vld [vmem:[%s2440_s1 + $0x20] sm:$0xff]  ;;  %v1839_v20 = vld [vmem:[%s2440_s1 + $0x118] sm:$0xff]  ;;  %v1504_v23 = vor.u32 %v1762_v18, %v1501_v19  ;;  %v1838_v27 = vld [vmem:[%s2440_s1 + $0x110] sm:$0xff] }
  0x13   : > { %724 = vmatpush.bf16.msra.mxu2 %v1778_v6  ;;  %v1381_v16 = vld [vmem:[%s2041_s20 + $0x40] sm:$0xf0]  ;;  %v1835_v21 = vld [vmem:[%s2440_s1 + $0xf8] sm:$0xff]  ;;  %v1802_v28 = vld [vmem:[%s2440_s1 + $0x70] sm:$0xff] }
  0x14   : > { %1892 = vmatpush.bf16.msra.mxu3 %v2017_v7  ;;  %v2061_v17 = vld [vmem:[%s2440_s1 + $0x40] sm:$0xff]  ;;  %v1384_v22 = vor.u32 %v1790_v15, %v1381_v16  ;;  %v1803_v24 = vld [vmem:[%s2440_s1 + $0x78] sm:$0xff]  ;;  %v1774_v29 = vld [vmem:[%s2440_s1 + $0x10] sm:$0xff] }
  0x15   : > { %459 = vmatpush.bf16.msra.mxu0 %v1805_v8  ;;  %v1775_v25 = vld [vmem:[%s2440_s1 + $0x18] sm:$0xff]  ;;  %v1833_v30 = vld [vmem:[%s2440_s1 + $0xe8] sm:$0xff]  ;;  %v1800_v34 = vld [vmem:[%s2440_s1 + $0x60] sm:$0xff] }
  0x16   : > { %1889 = vmatpush.bf16.msra.mxu1 %v2027_v9  ;;  %v1837_v31 = vld [vmem:[%s2440_s1 + $0x108] sm:$0xff]  ;;  %v1832_v35 = vld [vmem:[%s2440_s1 + $0xe0] sm:$0xff]  ;;  %v1785_v38 = vld [vmem:[%s2041_s20 + $0xc] sm:$0xf0] }
  0x17   : > { %725 = vmatpush.bf16.msra.mxu2 %v1777_v10  ;;  %v1801_v32 = vld [vmem:[%s2440_s1 + $0x68] sm:$0xff]  ;;  %v1772_v36 = vld [vmem:[%s2440_s1] sm:$0xff]  ;;  %v1389_v40 = vld [vmem:[%s2041_s20 + $0x50] sm:$0xf0] }
  0x18   : > { %1893 = vmatpush.bf16.msra.mxu3 %v2036_v11  ;;  %v1773_v33 = vld [vmem:[%s2440_s1 + $0x8] sm:$0xff]  ;;  %v1475_v41 = vld [vmem:[%s2041_s20] sm:$0xf]  ;;  %v1764_v43 = vld [vmem:[%s2041_s20 + $0x44] sm:$0xf] }
  0x19   : > { %460 = vmatpush.bf16.msra.mxu0 %v1804_v12  ;;  %v1355_v37 = vld [vmem:[%s2041_s20 + $0x8] sm:$0xf]  ;;  %v1792_v39 = vld [vmem:[%s2041_s20 + $0x4c] sm:$0xf]  ;;  %v1831_v45 = vld [vmem:[%s2440_s1 + $0xd8] sm:$0xff] }
  0x1a   : > { %1890 = vmatpush.bf16.msra.mxu1 %v2049_v13  ;;  %v1757_v42 = vld [vmem:[%s2041_s20 + $0x4] sm:$0xf0]  ;;  %v1509_v44 = vld [vmem:[%s2041_s20 + $0x48] sm:$0xf0]  ;;  %v1356_v46 = vor.u32 %v1785_v38, %v1355_v37  ;;  %v1392_v47 = vor.u32 %v1792_v39, %v1389_v40  ;;  %v1830_v50 = vld [vmem:[%s2440_s1 + $0xd0] sm:$0xff] }
  0x1b   : > { %726 = vmatpush.bf16.msra.mxu2 %v1776_v14  ;;  %v1476_v48 = vor.u32 %v1757_v42, %v1475_v41  ;;  %v1512_v49 = vor.u32 %v1764_v43, %v1509_v44  ;;  %v1836_v51 = vld [vmem:[%s2440_s1 + $0x100] sm:$0xff]  ;;  %v1363_v52 = vld [vmem:[%s2041_s20 + $0x18] sm:$0xf]  ;;  %v1794_v54 = vld [vmem:[%s2041_s20 + $0x5c] sm:$0xf] }
  0x1c   : > { %1894 = vmatpush.bf16.msra.mxu3 %v2061_v17  ;;  %v1787_v53 = vld [vmem:[%s2041_s20 + $0x1c] sm:$0xf0]  ;;  %v1397_v55 = vld [vmem:[%s2041_s20 + $0x60] sm:$0xf0]  ;;  %v1483_v56 = vld [vmem:[%s2041_s20 + $0x10] sm:$0xf] }
  0x1d   : > { %1468 = vmatmul.msk.bf16.vlgmr.msra.gmra.mxu1 %vm432_vm0, %v1384_v22  ;;  %461 = vmatpush.bf16.msra.mxu0 %v1803_v24  ;;  %v1759_v57 = vld [vmem:[%s2041_s20 + $0x14] sm:$0xf0]  ;;  %v1766_v58 = vld [vmem:[%s2041_s20 + $0x54] sm:$0xf]  ;;  %v1517_v59 = vld [vmem:[%s2041_s20 + $0x58] sm:$0xf0]  ;;  %v1364_v60 = vor.u32 %v1787_v53, %v1363_v52  ;;  %v1400_v61 = vor.u32 %v1794_v54, %v1397_v55 }
  0x1e   : > { %1036 = vmatpush.bf16.msrb.mxu1 %v1835_v21  ;;  %v1484_v62 = vor.u32 %v1759_v57, %v1483_v56  ;;  %v1520_v63 = vor.u32 %v1766_v58, %v1517_v59  ;;  %v1829_v0 = vld [vmem:[%s2440_s1 + $0xc8] sm:$0xff]  ;;  %v1491_v6 = vld [vmem:[%s2041_s20 + $0x20] sm:$0xf]  ;;  %v1768_v8 = vld [vmem:[%s2041_s20 + $0x64] sm:$0xf] }
  0x1f   : > { %1588 = vmatmul.msk.bf16.vlgmr.msra.gmra.mxu3 %vm432_vm0, %v1504_v23  ;;  %727 = vmatpush.bf16.msra.mxu2 %v1775_v25  ;;  %v1371_v2 = vld [vmem:[%s2041_s20 + $0x28] sm:$0xf]  ;;  %v1796_v4 = vld [vmem:[%s2041_s20 + $0x6c] sm:$0xf]  ;;  %v1379_v14 = vld [vmem:[%s2041_s20 + $0x38] sm:$0xf] }
  0x20   : > { %1089 = vmatpush.bf16.msrb.mxu3 %v1839_v20  ;;  %v1791_v15 = vld [vmem:[%s2041_s20 + $0x3c] sm:$0xf0]  ;;  %v1798_v16 = vld [vmem:[%s2041_s20 + $0x7c] sm:$0xf]  ;;  %v1499_v18 = vld [vmem:[%s2041_s20 + $0x30] sm:$0xf] }
  0x21   : > { %462 = vmatpush.bf16.msra.mxu0 %v1802_v28  ;;  %v1763_v19 = vld [vmem:[%s2041_s20 + $0x34] sm:$0xf0]  ;;  %v1770_v20 = vld [vmem:[%s2041_s20 + $0x74] sm:$0xf]  ;;  %v1533_v21 = vld [vmem:[%s2041_s20 + $0x78] sm:$0xf0]  ;;  %v1380_v22 = vor.u32 %v1791_v15, %v1379_v14 }
  0x22   : > { %1037 = vmatpush.bf16.msrb.mxu1 %v1834_v26  ;;  %v1500_v24 = vor.u32 %v1763_v19, %v1499_v18  ;;  %v1536_v25 = vor.u32 %v1770_v20, %v1533_v21  ;;  %v1387_v26 = vld [vmem:[%s2041_s20 + $0x48] sm:$0xf]  ;;  %v1507_v28 = vld [vmem:[%s2041_s20 + $0x40] sm:$0xf]  ;;  %v1395_v38 = vld [vmem:[%s2041_s20 + $0x58] sm:$0xf] }
  0x23   : > { %728 = vmatpush.bf16.msra.mxu2 %v1774_v29  ;;  %v1635_v29 = vld [vmem:[%s2041_s20 + $0x10] sm:$0xf]  ;;  %v1795_v39 = vld [vmem:[%s2041_s20 + $0x5c] sm:$0xf0]  ;;  %v1815_v42 = vld [vmem:[%s2041_s20 + $0x24] sm:$0xf0] }
  0x24   : > { %1090 = vmatpush.bf16.msrb.mxu3 %v1838_v27  ;;  %v1793_v27 = vld [vmem:[%s2041_s20 + $0x4c] sm:$0xf0]  ;;  %v1643_v41 = vld [vmem:[%s2041_s20 + $0x20] sm:$0xf]  ;;  %v1767_v43 = vld [vmem:[%s2041_s20 + $0x54] sm:$0xf0] }
  0x25   : > { %463 = vmatpush.bf16.msra.mxu0 %v1801_v32  ;;  %v1812_v32 = vld [vmem:[%s2041_s20 + $0x14] sm:$0xf]  ;;  %v1515_v40 = vld [vmem:[%s2041_s20 + $0x50] sm:$0xf]  ;;  %v1814_v44 = vld [vmem:[%s2041_s20 + $0x24] sm:$0xf] }
  0x26   : > { %1038 = vmatpush.bf16.msrb.mxu1 %v1833_v30  ;;  %v1813_v30 = vld [vmem:[%s2041_s20 + $0x14] sm:$0xf0]  ;;  %v1523_v52 = vld [vmem:[%s2041_s20 + $0x60] sm:$0xf]  ;;  %v1651_v53 = vld [vmem:[%s2041_s20 + $0x30] sm:$0xf] }
  0x27   : > { %729 = vmatpush.bf16.msra.mxu2 %v1773_v33  ;;  %v1637_v33 = vld [vmem:[%s2041_s20 + $0x18] sm:$0xf0]  ;;  %v1817_v54 = vld [vmem:[%s2041_s20 + $0x34] sm:$0xf0]  ;;  %v1769_v55 = vld [vmem:[%s2041_s20 + $0x64] sm:$0xf0] }
  0x28   : > { %1091 = vmatpush.bf16.msrb.mxu3 %v1837_v31  ;;  %v1765_v31 = vld [vmem:[%s2041_s20 + $0x44] sm:$0xf0]  ;;  %v1640_v37 = vor.u32 %v1812_v32, %v1637_v33  ;;  %v1816_v56 = vld [vmem:[%s2041_s20 + $0x34] sm:$0xf]  ;;  %v1653_v57 = vld [vmem:[%s2041_s20 + $0x38] sm:$0xf0]  ;;  %v1652_v59 = vor.u32 %v1817_v54, %v1651_v53 }
  0x29   : > { %464 = vmatpush.bf16.msra.mxu0 %v1800_v34  ;;  %v1388_v34 = vor.u32 %v1793_v27, %v1387_v26  ;;  %v1357_v14 = vld [vmem:[%s2041_s20 + $0x10] sm:$0xf0]  ;;  %v1756_v15 = vld [vmem:[%s2041_s20 + $0x4] sm:$0xf]  ;;  %v1477_v18 = vld [vmem:[%s2041_s20 + $0x8] sm:$0xf0] }
  0x2a   : > { %1039 = vmatpush.bf16.msrb.mxu1 %v1832_v35  ;;  %v1636_v35 = vor.u32 %v1813_v30, %v1635_v29  ;;  %v1820_v19 = vld [vmem:[%s2041_s20 + $0x54] sm:$0xf]  ;;  %v1669_v20 = vld [vmem:[%s2041_s20 + $0x58] sm:$0xf0]  ;;  %v1480_v26 = vor.u32 %v1756_v15, %v1477_v18  ;;  %v1365_v33 = vld [vmem:[%s2041_s20 + $0x20] sm:$0xf0] }
  0x2b   : > { %730 = vmatpush.bf16.msra.mxu2 %v1772_v36  ;;  %v1508_v36 = vor.u32 %v1765_v31, %v1507_v28  ;;  %v1672_v27 = vor.u32 %v1820_v19, %v1669_v20  ;;  %v1786_v32 = vld [vmem:[%s2041_s20 + $0x1c] sm:$0xf]  ;;  %v1373_v53 = vld [vmem:[%s2041_s20 + $0x30] sm:$0xf0]  ;;  %v1760_v54 = vld [vmem:[%s2041_s20 + $0x24] sm:$0xf] }
  0x2c   : > { %465 = vmatmul.bf16.vlgmr.msra.gmra.mxu0 %v1356_v46  ;;  %1092 = vmatpush.bf16.msrb.mxu3 %v1836_v51  ;;  %v1396_v46 = vor.u32 %v1795_v39, %v1395_v38  ;;  %v1797_v51 = vld [vmem:[%s2041_s20 + $0x6c] sm:$0xf0]  ;;  %v1822_v38 = vld [vmem:[%s2041_s20 + $0x64] sm:$0xf]  ;;  %v1677_v39 = vld [vmem:[%s2041_s20 + $0x68] sm:$0xf0] }
  0x2d   : > { %510 = vmatpush.bf16.msrb.mxu0 %v1989_v1  ;;  %1469 = vmatmul.msk.bf16.gmra.mxu1 %vm432_vm0, %v1392_v47  ;;  %v1828_v1 = vld [vmem:[%s2440_s1 + $0xc0] sm:$0xff]  ;;  %v1644_v47 = vor.u32 %v1815_v42, %v1643_v41  ;;  %v1368_v42 = vor.u32 %v1786_v32, %v1365_v33 }
  0x2e   : > { %1040 = vmatpush.bf16.msrb.mxu1 %v1831_v45  ;;  %731 = vmatmul.bf16.vlgmr.msra.gmra.mxu2 %v1476_v48  ;;  %v1645_v45 = vld [vmem:[%s2041_s20 + $0x28] sm:$0xf0]  ;;  %v1516_v48 = vor.u32 %v1767_v43, %v1515_v40 }
  0x2f   : > { %776 = vmatpush.bf16.msrb.mxu2 %v1997_v3  ;;  %1589 = vmatmul.msk.bf16.gmra.mxu3 %vm432_vm0, %v1512_v49  ;;  %v1789_v3 = vld [vmem:[%s2041_s20 + $0x2c] sm:$0xf0]  ;;  %v1648_v49 = vor.u32 %v1814_v44, %v1645_v45 }
  0x30   : > { %v1372_v10 = vor.u32 %v1789_v3, %v1371_v2  ;;  %v1819_v2 = vld [vmem:[%s2041_s20 + $0x44] sm:$0xf0]  ;;  %v1771_v3 = vld [vmem:[%s2041_s20 + $0x74] sm:$0xf0] }
  0x31   : > { %511 = vmatpush.bf16.msrb.mxu0 %v2006_v5  ;;  %v1405_v5 = vld [vmem:[%s2041_s20 + $0x70] sm:$0xf0] }
  0x32   : > { %1041 = vmatpush.bf16.msrb.mxu1 %v1830_v50  ;;  %v1403_v50 = vld [vmem:[%s2041_s20 + $0x68] sm:$0xf] }
  0x33   : > { %777 = vmatpush.bf16.msrb.mxu2 %v2017_v7  ;;  %v1761_v7 = vld [vmem:[%s2041_s20 + $0x24] sm:$0xf0]  ;;  %v1404_v58 = vor.u32 %v1797_v51, %v1403_v50 }
  0x34   : > { %v1492_v12 = vor.u32 %v1761_v7, %v1491_v6 }
  0x35   : > { %512 = vmatpush.bf16.msrb.mxu0 %v2027_v9  ;;  %v1525_v9 = vld [vmem:[%s2041_s20 + $0x68] sm:$0xf0] }
  0x36   : > { %1042 = vmatpush.bf16.msrb.mxu1 %v1829_v0  ;;  %v1531_v0 = vld [vmem:[%s2041_s20 + $0x70] sm:$0xf] }
  0x37   : > { %778 = vmatpush.bf16.msrb.mxu2 %v2036_v11  ;;  %v1408_v11 = vor.u32 %v1796_v4, %v1405_v5  ;;  %v1818_v4 = vld [vmem:[%s2041_s20 + $0x44] sm:$0xf]  ;;  %v1661_v5 = vld [vmem:[%s2041_s20 + $0x48] sm:$0xf0] }
  0x39   : > { %513 = vmatpush.bf16.msrb.mxu0 %v2049_v13  ;;  %v1528_v13 = vor.u32 %v1768_v8, %v1525_v9  ;;  %v1532_v9 = vor.u32 %v1771_v3, %v1531_v0 }
  0x3a   : > { %1043 = vmatpush.bf16.msrb.mxu1 %v1828_v1  ;;  %v1659_v1 = vld [vmem:[%s2041_s20 + $0x40] sm:$0xf] }
  0x3b   : > { %779 = vmatpush.bf16.msrb.mxu2 %v2061_v17  ;;  %v1413_v17 = vld [vmem:[%s2041_s20 + $0x80] sm:$0xf0]  ;;  %v1660_v7 = vor.u32 %v1819_v2, %v1659_v1 }
  0x3c   : > { %470 = vmatmul.bf16.gmra.mxu0 %v1364_v60  ;;  %v1416_v23 = vor.u32 %v1798_v16, %v1413_v17  ;;  %v1524_v60 = vor.u32 %v1769_v55, %v1523_v52  ;;  %v1667_v16 = vld [vmem:[%s2041_s20 + $0x50] sm:$0xf]  ;;  %v1821_v17 = vld [vmem:[%s2041_s20 + $0x54] sm:$0xf0]  ;;  %v1788_v52 = vld [vmem:[%s2041_s20 + $0x2c] sm:$0xf] }
  0x3d   : > { %1470 = vmatmul.msk.bf16.gmra.mxu1 %vm432_vm0, %v1400_v61  ;;  %v1656_v61 = vor.u32 %v1816_v56, %v1653_v57  ;;  %v1683_v55 = vld [vmem:[%s2041_s20 + $0x70] sm:$0xf]  ;;  %v1825_v56 = vld [vmem:[%s2041_s20 + $0x74] sm:$0xf0]  ;;  %v1493_v57 = vld [vmem:[%s2041_s20 + $0x28] sm:$0xf0] }
  0x3e   : > { %736 = vmatmul.bf16.gmra.mxu2 %v1484_v62  ;;  %v1411_v62 = vld [vmem:[%s2041_s20 + $0x78] sm:$0xf]  ;;  %v1496_v2 = vor.u32 %v1760_v54, %v1493_v57 }
  0x3f   : > { %1590 = vmatmul.msk.bf16.gmra.mxu3 %vm432_vm0, %v1520_v63  ;;  %v1799_v63 = vld [vmem:[%s2041_s20 + $0x7c] sm:$0xf0] }
  0x40   : > { %v1412_v6 = vor.u32 %v1799_v63, %v1411_v62  ;;  %v1376_v62 = vor.u32 %v1788_v52, %v1373_v53  ;;  %v1684_v63 = vor.u32 %v1825_v56, %v1683_v55 }
  0x4c   : > { %475 = vmatmul.bf16.gmra.mxu0 %v1372_v10  ;;  %v1664_v10 = vor.u32 %v1818_v4, %v1661_v5 }
  0x4d   : > { %1471 = vmatmul.msk.bf16.gmra.mxu1 %vm432_vm0, %v1408_v11 }
  0x4e   : > { %741 = vmatmul.bf16.gmra.mxu2 %v1492_v12 }
  0x4f   : > { %1591 = vmatmul.msk.bf16.gmra.mxu3 %vm432_vm0, %v1528_v13  ;;  %v1784_v13 = vld [vmem:[%s2041_s20 + $0xc] sm:$0xf] }
  0x5c   : > { %480 = vmatmul.bf16.gmra.mxu0 %v1380_v22  ;;  %v1360_v22 = vor.u32 %v1784_v13, %v1357_v14  ;;  %v1826_v13 = vld [vmem:[%s2041_s20 + $0x84] sm:$0xf]  ;;  %v1693_v14 = vld [vmem:[%s2041_s20 + $0x88] sm:$0xf0] }
  0x5d   : > { %1472 = vmatmul.msk.bf16.gmra.mxu1 %vm432_vm0, %v1416_v23  ;;  %v1668_v23 = vor.u32 %v1821_v17, %v1667_v16  ;;  %v1696_v20 = vor.u32 %v1826_v13, %v1693_v14 }
  0x5e   : > { %746 = vmatmul.bf16.gmra.mxu2 %v1500_v24 }
  0x5f   : > { %1592 = vmatmul.msk.bf16.gmra.mxu3 %vm432_vm0, %v1536_v25 }
  0x6c   : > { %485 = vmatmul.bf16.gmra.mxu0 %v1388_v34  ;;  %v1758_v34 = vld [vmem:[%s2041_s20 + $0x14] sm:$0xf] }
  0x6d   : > { %1044 = vmatmul.bf16.vlgmr.msrb.gmra.mxu1 %v1636_v35  ;;  %v1675_v35 = vld [vmem:[%s2041_s20 + $0x60] sm:$0xf] }
  0x6e   : > { %751 = vmatmul.bf16.gmra.mxu2 %v1508_v36  ;;  %v1823_v36 = vld [vmem:[%s2041_s20 + $0x64] sm:$0xf0] }
  0x6f   : > { %1745 = vmatmul.msk.bf16.vlgmr.msrb.gmra.mxu3 %vm432_vm0, %v1640_v37  ;;  %v1485_v37 = vld [vmem:[%s2041_s20 + $0x18] sm:$0xf0]  ;;  %v1676_v43 = vor.u32 %v1823_v36, %v1675_v35 }
  0x7c   : > { %490 = vmatmul.bf16.gmra.mxu0 %v1396_v46  ;;  %v1488_v46 = vor.u32 %v1758_v34, %v1485_v37 }
  0x7d   : > { %1049 = vmatmul.bf16.gmra.mxu1 %v1644_v47  ;;  %v1680_v47 = vor.u32 %v1822_v38, %v1677_v39 }
  0x7e   : > { %756 = vmatmul.bf16.gmra.mxu2 %v1516_v48 }
  0x7f   : > { %1746 = vmatmul.msk.bf16.gmra.mxu3 %vm432_vm0, %v1648_v49 }
  0x8c   : > { %495 = vmatmul.bf16.gmra.mxu0 %v1404_v58  ;;  %v1824_v58 = vld [vmem:[%s2041_s20 + $0x74] sm:$0xf] }
  0x8d   : > { %1054 = vmatmul.bf16.gmra.mxu1 %v1652_v59  ;;  %v1685_v59 = vld [vmem:[%s2041_s20 + $0x78] sm:$0xf0] }
  0x8e   : > { %761 = vmatmul.bf16.gmra.mxu2 %v1524_v60  ;;  %v1688_v3 = vor.u32 %v1824_v58, %v1685_v59 }
  0x8f   : > { %1747 = vmatmul.msk.bf16.gmra.mxu3 %vm432_vm0, %v1656_v61 }
  0x9a   : > { %v2212_v8 = vpop.f32.mrf.mxu1 }
  0x9c   : > { %500 = vmatmul.bf16.gmra.mxu0 %v1412_v6 }
  0x9d   : > { %1059 = vmatmul.bf16.gmra.mxu1 %v1660_v7 }
  0x9e   : > { %766 = vmatmul.bf16.gmra.mxu2 %v1532_v9  ;;  %v1691_v9 = vld [vmem:[%s2041_s20 + $0x80] sm:$0xf] }
  0x9f   : > { %1748 = vmatmul.msk.bf16.gmra.mxu3 %vm432_vm0, %v1664_v10  ;;  %v1827_v10 = vld [vmem:[%s2041_s20 + $0x84] sm:$0xf0] }
  0xa0   : > { %v1692_v17 = vor.u32 %v1827_v10, %v1691_v9 }
  0xa2   : > { %v2215_v11 = vpop.f32.mrf.mxu3  ;;  %v2217_v12 = vpop.f32.mrf.mxu1 }
  0xa9   : > { %v2229_v24 = vpop.f32.mrf.mxu0 }
  0xaa   : > { %v2227_v21 = vpop.f32.mrf.mxu3  ;;  %v2231_v25 = vpop.f32.mrf.mxu1 }
  0xac   : > { %1465 = vmatmul.msk.bf16.vlgmr.msrb.gmra.mxu0 %vm432_vm0, %v1360_v22 }
  0xad   : > { %1064 = vmatmul.bf16.gmra.mxu1 %v1668_v23 }
  0xae   : > { %1585 = vmatmul.msk.bf16.vlgmr.msrb.gmra.mxu2 %vm432_vm0, %v1480_v26 }
  0xaf   : > { %1749 = vmatmul.msk.bf16.gmra.mxu3 %vm432_vm0, %v1672_v27 }
  0xb1   : > { %v2236_v28 = vpop.f32.mrf.mxu2  ;;  %v2240_v30 = vpop.f32.mrf.mxu0 }
  0xb2   : > { %v2238_v29 = vpop.f32.mrf.mxu3  ;;  %v2242_v31 = vpop.f32.mrf.mxu1 }
  0xb9   : > { %v2252_v40 = vpop.f32.mrf.mxu2  ;;  %v2256_v44 = vpop.f32.mrf.mxu0 }
  0xba   : > { %v2254_v41 = vpop.f32.mrf.mxu3  ;;  %v2258_v45 = vpop.f32.mrf.mxu1 }
  0xbc   : > { %1466 = vmatmul.msk.bf16.gmra.mxu0 %vm432_vm0, %v1368_v42 }
  0xbd   : > { %1069 = vmatmul.bf16.gmra.mxu1 %v1676_v43 }
  0xbe   : > { %1586 = vmatmul.msk.bf16.gmra.mxu2 %vm432_vm0, %v1488_v46 }
  0xbf   : > { %1750 = vmatmul.msk.bf16.gmra.mxu3 %vm432_vm0, %v1680_v47 }
  0xc1   : > { %v2263_v48 = vpop.f32.mrf.mxu2  ;;  %v2267_v50 = vpop.f32.mrf.mxu0 }
  0xc2   : > { %v2265_v49 = vpop.f32.mrf.mxu3  ;;  %v2269_v51 = vpop.f32.mrf.mxu1 }
  0xc9   : > { %v2279_v60 = vpop.f32.mrf.mxu2  ;;  %v2283_v0 = vpop.f32.mrf.mxu0 }
  0xca   : > { %v2281_v61 = vpop.f32.mrf.mxu3  ;;  %v2285_v1 = vpop.f32.mrf.mxu1 }
  0xcc   : > { %1467 = vmatmul.msk.bf16.gmra.mxu0 %vm432_vm0, %v1376_v62 }
  0xcd   : > { %1074 = vmatmul.bf16.gmra.mxu1 %v1684_v63 }
  0xce   : > { %1587 = vmatmul.msk.bf16.gmra.mxu2 %vm432_vm0, %v1496_v2 }
  0xcf   : > { %1751 = vmatmul.msk.bf16.gmra.mxu3 %vm432_vm0, %v1688_v3 }
  0xd1   : > { %v2290_v4 = vpop.f32.mrf.mxu2  ;;  %v2294_v6 = vpop.f32.mrf.mxu0 }
  0xd2   : > { %v2292_v5 = vpop.f32.mrf.mxu3  ;;  %v2296_v7 = vpop.f32.mrf.mxu1 }
  0xd9   : > { %v2302_v15 = vpop.f32.mrf.mxu2  ;;  %v481_v18 = vpop.f32.mrf.mxu0 }
  0xda   : > { %v2304_v16 = vpop.f32.mrf.mxu3  ;;  %v2306_v19 = vpop.f32.mrf.mxu1  ;;  %v531_v22 = vadd.f32 %v2212_v8, %v481_v18 }
  0xdd   : > { %1079 = vmatmul.bf16.gmra.mxu1 %v1692_v17 }
  0xdf   : > { %1752 = vmatmul.msk.bf16.gmra.mxu3 %vm432_vm0, %v1696_v20 }
  0xe1   : > { %v747_v23 = vpop.f32.mrf.mxu2  ;;  %v483_v32 = vpop.f32.mrf.mxu0 }
  0xe2   : > { %v2310_v26 = vpop.f32.mrf.mxu3  ;;  %v748_v27 = vadd.f32 %v747_v23, %v531_v22  ;;  %v2312_v33 = vpop.f32.mrf.mxu1  ;;  %v533_v34 = vadd.f32 %v2217_v12, %v483_v32 }
  0xe4   : > { %v2316_v35 = vadd.f32 %v2215_v11, %v748_v27 }
  0xe9   : > { %v749_v36 = vpop.f32.mrf.mxu2  ;;  %v486_v8 = vpop.f32.mrf.mxu0 }
  0xea   : > { %v2318_v37 = vpop.f32.mrf.mxu3  ;;  %v750_v38 = vadd.f32 %v749_v36, %v533_v34  ;;  %v1045_v39 = vpop.f32.mrf.mxu1  ;;  %v536_v42 = vadd.f32 %v2231_v25, %v486_v8 }
  0xec   : > { %v2322_v43 = vadd.f32 %v2227_v21, %v750_v38 }
  0xf1   : > { %v752_v46 = vpop.f32.mrf.mxu2  ;;  %v488_v12 = vpop.f32.mrf.mxu0 }
  0xf2   : > { %v1094_v47 = vpop.f32.mrf.mxu3  ;;  %v753_v52 = vadd.f32 %v752_v46, %v536_v42  ;;  %v1047_v54 = vpop.f32.mrf.mxu1  ;;  %v538_v11 = vadd.f32 %v2242_v31, %v488_v12 }
  0xf3   : > { %v2324_v53 = vadd.f32 %v1094_v47, %v1045_v39 }
  0xf4   : > { %v2328_v55 = vadd.f32 %v2238_v29, %v753_v52 }
  0xf9   : > { %v754_v56 = vpop.f32.mrf.mxu2  ;;  %v491_v25 = vpop.f32.mrf.mxu0 }
  0xfa   : > { %v1096_v57 = vpop.f32.mrf.mxu3  ;;  %v755_v58 = vadd.f32 %v754_v56, %v538_v11  ;;  %v1050_v21 = vpop.f32.mrf.mxu1  ;;  %v541_v62 = vadd.f32 %v2258_v45, %v491_v25 }
  0xfb   : > { %v2330_v59 = vadd.f32 %v1096_v57, %v1047_v54 }
  0xfc   : > { %v2334_v63 = vadd.f32 %v2254_v41, %v755_v58 }
 0x101   : > { %v757_v2 = vpop.f32.mrf.mxu2  ;;  %v493_v31 = vpop.f32.mrf.mxu0 }
 0x102   : > { %v1099_v3 = vpop.f32.mrf.mxu3  ;;  %v758_v9 = vadd.f32 %v757_v2, %v541_v62  ;;  %v1052_v29 = vpop.f32.mrf.mxu1  ;;  %v543_v13 = vadd.f32 %v2269_v51, %v493_v31 }
 0x103   : > { %v2336_v10 = vadd.f32 %v1099_v3, %v1050_v21 }
 0x104   : > { %v2340_v14 = vadd.f32 %v2265_v49, %v758_v9 }
 0x109   : > { %v759_v17 = vpop.f32.mrf.mxu2  ;;  %v496_v45 = vpop.f32.mrf.mxu0 }
 0x10a   : > { %v1101_v18 = vpop.f32.mrf.mxu3  ;;  %v760_v20 = vadd.f32 %v759_v17, %v543_v13  ;;  %v1055_v41 = vpop.f32.mrf.mxu1  ;;  %v546_v23 = vadd.f32 %v2285_v1, %v496_v45 }
 0x10b   : > { %v2342_v22 = vadd.f32 %v1101_v18, %v1052_v29 }
 0x10c   : > { %v2346_v27 = vadd.f32 %v2281_v61, %v760_v20 }
 0x111   : > { %v762_v32 = vpop.f32.mrf.mxu2  ;;  %v498_v51 = vpop.f32.mrf.mxu0 }
 0x112   : > { %v1104_v34 = vpop.f32.mrf.mxu3  ;;  %v763_v36 = vadd.f32 %v762_v32, %v546_v23  ;;  %v1057_v49 = vpop.f32.mrf.mxu1  ;;  %v548_v8 = vadd.f32 %v2296_v7, %v498_v51 }
 0x113   : > { %v2348_v38 = vadd.f32 %v1104_v34, %v1055_v41 }
 0x114   : > { %v2352_v39 = vadd.f32 %v2292_v5, %v763_v36 }
 0x119   : > { %v764_v42 = vpop.f32.mrf.mxu2  ;;  %v501_v1 = vpop.f32.mrf.mxu0 }
 0x11a   : > { %v1106_v46 = vpop.f32.mrf.mxu3  ;;  %v765_v47 = vadd.f32 %v764_v42, %v548_v8  ;;  %v1060_v61 = vpop.f32.mrf.mxu1  ;;  %v551_v12 = vadd.f32 %v2306_v19, %v501_v1  ;;  %v2368_v19 = vld [vmem:[%s2441_s2] ss:$0 sm:$0xff] }
 0x11b   : > { %v2354_v52 = vadd.f32 %v1106_v46, %v1057_v49 }
 0x11c   : > { %v2358_v54 = vadd.f32 %v2304_v16, %v765_v47 }
 0x121   : > { %v767_v11 = vpop.f32.mrf.mxu2  ;;  %v503_v58 = vpop.f32.mrf.mxu0 }
 0x122   : > { %v1109_v56 = vpop.f32.mrf.mxu3  ;;  %v768_v57 = vadd.f32 %v767_v11, %v551_v12  ;;  %v1062_v7 = vpop.f32.mrf.mxu1  ;;  %v553_v5 = vadd.f32 %v2312_v33, %v503_v58 }
 0x123   : > { %v1110_v21 = vadd.f32 %v1109_v56, %v1060_v61 }
 0x124   : > { %v2362_v25 = vadd.f32 %v2310_v26, %v768_v57 }
 0x125   : > { %v1140_v62 = vadd.f32 %v1110_v21, %v2316_v35 }
 0x127   : > { %v1160_v13 = vadd.f32 %v2368_v19, %v1140_v62 }
 0x129   : > { %v769_v16 = vpop.f32.mrf.mxu2  ;;  %v515_v31 = vpop.f32.mrf.mxu0  ;;  %v1176_v18 = vmax.f32 %v1160_v13, 0.0 }
 0x12a   : > { %v1111_v2 = vpop.f32.mrf.mxu3  ;;  %v770_v3 = vadd.f32 %v769_v16, %v553_v5  ;;  %v1065_v29 = vpop.f32.mrf.mxu1  ;;  %v516_v17 = vadd.f32 %v515_v31, %v2229_v24 }
 0x12b   : > { %v1112_v9 = vadd.f32 %v1111_v2, %v1062_v7 }
 0x12c   : > { %v2372_v33 = vadd.f32 %v2318_v37, %v770_v3  ;;  %v733_v37 = vadd.f32 %v2236_v28, %v516_v17 }
 0x12d   : > { %v1141_v26 = vadd.f32 %v1112_v9, %v2322_v43 }
 0x12f   : > { %v1161_v35 = vadd.f32 %v2368_v19, %v1141_v26 }
 0x131   : > { %v1177_v20 = vmax.f32 %v1161_v35, 0.0  ;;  %v781_v45 = vpop.f32.mrf.mxu2  ;;  %v517_v32 = vpop.f32.mrf.mxu0 }
 0x132   : > { %v1114_v41 = vpop.f32.mrf.mxu3  ;;  %v1067_v43 = vpop.f32.mrf.mxu1  ;;  %v782_v34 = vadd.f32 %v781_v45, %v733_v37  ;;  %v518_v24 = vadd.f32 %v517_v32, %v2240_v30 }
 0x133   : > { %v1858_v23 = vpack.c.bf16 %v1177_v20, %v1176_v18  ;;  %v1115_v36 = vadd.f32 %v1114_v41, %v1065_v29 }
 0x134   : > { %v1134_v51 = vadd.f32 %v2324_v53, %v782_v34  ;;  %v735_v8 = vadd.f32 %v2252_v40, %v518_v24 }
 0x135   : > { %1882 = vst [vmem:[%s2381_s29 + $0x18] sm:$0xff] %v1858_v23   ;;  %v1142_v49 = vadd.f32 %v1115_v36, %v2328_v55 }
 0x136   : > { %v1154_v28 = vadd.f32 %v2368_v19, %v1134_v51 }
 0x137   : > { %v1162_v11 = vadd.f32 %v2368_v19, %v1142_v49 }
 0x138   : > { %v1170_v57 = vmax.f32 %v1154_v28, 0.0 }
 0x139   : > { %v783_v42 = vpop.f32.mrf.mxu2  ;;  %v520_v61 = vpop.f32.mrf.mxu0  ;;  %v1178_v58 = vmax.f32 %v1162_v11, 0.0 }
 0x13a   : > { %v1116_v46 = vpop.f32.mrf.mxu3  ;;  %v784_v47 = vadd.f32 %v783_v42, %v735_v8  ;;  %v1070_v12 = vpop.f32.mrf.mxu1  ;;  %v521_v40 = vadd.f32 %v520_v61, %v2256_v44 }
 0x13b   : > { %v1117_v1 = vadd.f32 %v1116_v46, %v1067_v43 }
 0x13c   : > { %v1135_v56 = vadd.f32 %v2330_v59, %v784_v47  ;;  %v738_v59 = vadd.f32 %v2263_v48, %v521_v40 }
 0x13d   : > { %v1143_v30 = vadd.f32 %v1117_v1, %v2334_v63 }
 0x13e   : > { %v1155_v53 = vadd.f32 %v2368_v19, %v1135_v56 }
 0x13f   : > { %v1163_v55 = vadd.f32 %v2368_v19, %v1143_v30 }
 0x140   : > { %v1171_v7 = vmax.f32 %v1155_v53, 0.0 }
 0x141   : > { %v1179_v5 = vmax.f32 %v1163_v55, 0.0  ;;  %v786_v21 = vpop.f32.mrf.mxu2  ;;  %v522_v3 = vpop.f32.mrf.mxu0 }
 0x142   : > { %v1119_v62 = vpop.f32.mrf.mxu3  ;;  %v1843_v16 = vpack.c.bf16 %v1171_v7, %v1170_v57  ;;  %v1072_v9 = vpop.f32.mrf.mxu1  ;;  %v787_v63 = vadd.f32 %v786_v21, %v738_v59  ;;  %v523_v29 = vadd.f32 %v522_v3, %v2267_v50 }
 0x143   : > { %v1863_v2 = vpack.c.bf16 %v1179_v5, %v1178_v58  ;;  %v1120_v31 = vadd.f32 %v1119_v62, %v1070_v12 }
 0x144   : > { %1844 = vst [vmem:[%s2381_s29] sm:$0xff] %v1843_v16   ;;  %v1136_v44 = vadd.f32 %v2336_v10, %v787_v63  ;;  %v740_v26 = vadd.f32 %v2279_v60, %v523_v29 }
 0x145   : > { %1883 = vst [vmem:[%s2381_s29 + $0x20] sm:$0xff] %v1863_v2   ;;  %v1144_v13 = vadd.f32 %v1120_v31, %v2340_v14 }
 0x146   : > { %v1156_v41 = vadd.f32 %v2368_v19, %v1136_v44 }
 0x147   : > { %v1164_v23 = vadd.f32 %v2368_v19, %v1144_v13 }
 0x148   : > { %v1172_v32 = vmax.f32 %v1156_v41, 0.0 }
 0x149   : > { %v788_v35 = vpop.f32.mrf.mxu2  ;;  %v525_v45 = vpop.f32.mrf.mxu0  ;;  %v1180_v43 = vmax.f32 %v1164_v23, 0.0 }
 0x14a   : > { %v1121_v17 = vpop.f32.mrf.mxu3  ;;  %v789_v18 = vadd.f32 %v788_v35, %v740_v26  ;;  %v1075_v48 = vpop.f32.mrf.mxu1  ;;  %v526_v60 = vadd.f32 %v525_v45, %v2283_v0 }
 0x14b   : > { %v1122_v20 = vadd.f32 %v1121_v17, %v1072_v9 }
 0x14c   : > { %v1137_v50 = vadd.f32 %v2342_v22, %v789_v18  ;;  %v743_v42 = vadd.f32 %v2290_v4, %v526_v60 }
 0x14d   : > { %v1145_v37 = vadd.f32 %v1122_v20, %v2346_v27 }
 0x14e   : > { %v1157_v10 = vadd.f32 %v2368_v19, %v1137_v50 }
 0x14f   : > { %v1165_v14 = vadd.f32 %v2368_v19, %v1145_v37 }
 0x150   : > { %v1173_v34 = vmax.f32 %v1157_v10, 0.0 }
 0x151   : > { %v1181_v36 = vmax.f32 %v1165_v14, 0.0  ;;  %v791_v24 = vpop.f32.mrf.mxu2  ;;  %v527_v22 = vpop.f32.mrf.mxu0 }
 0x152   : > { %v1124_v51 = vpop.f32.mrf.mxu3  ;;  %v1848_v49 = vpack.c.bf16 %v1173_v34, %v1172_v32  ;;  %v792_v27 = vadd.f32 %v791_v24, %v743_v42  ;;  %v528_v47 = vadd.f32 %v527_v22, %v2294_v6  ;;  %v1077_v1 = vpop.f32.mrf.mxu1 }
 0x153   : > { %v1868_v8 = vpack.c.bf16 %v1181_v36, %v1180_v43  ;;  %v1125_v46 = vadd.f32 %v1124_v51, %v1075_v48 }
 0x154   : > { %1880 = vst [vmem:[%s2381_s29 + $0x8] sm:$0xff] %v1848_v49   ;;  %v1138_v0 = vadd.f32 %v2348_v38, %v792_v27  ;;  %v745_v12 = vadd.f32 %v2302_v15, %v528_v47 }
 0x155   : > { %1884 = vst [vmem:[%s2381_s29 + $0x28] sm:$0xff] %v1868_v8   ;;  %v1146_v61 = vadd.f32 %v1125_v46, %v2352_v39 }
 0x156   : > { %v1158_v4 = vadd.f32 %v2368_v19, %v1138_v0 }
 0x157   : > { %v1166_v53 = vadd.f32 %v2368_v19, %v1146_v61 }
 0x158   : > { %v1174_v15 = vmax.f32 %v1158_v4, 0.0 }
 0x159   : > { %v793_v28 = vpop.f32.mrf.mxu2  ;;  %v1182_v57 = vmax.f32 %v1166_v53, 0.0 }
 0x15a   : > { %v1126_v11 = vpop.f32.mrf.mxu3  ;;  %v794_v56 = vadd.f32 %v793_v28, %v745_v12  ;;  %v1080_v40 = vpop.f32.mrf.mxu1 }
 0x15b   : > { %v1127_v30 = vadd.f32 %v1126_v11, %v1077_v1 }
 0x15c   : > { %v1139_v6 = vadd.f32 %v2354_v52, %v794_v56 }
 0x15d   : > { %v1147_v55 = vadd.f32 %v1127_v30, %v2358_v54 }
 0x15e   : > { %v1159_v38 = vadd.f32 %v2368_v19, %v1139_v6 }
 0x15f   : > { %v1167_v39 = vadd.f32 %v2368_v19, %v1147_v55 }
 0x160   : > { %v1175_v58 = vmax.f32 %v1159_v38, 0.0 }
 0x161   : > { %v1183_v7 = vmax.f32 %v1167_v39, 0.0 }
 0x162   : > { %v1129_v5 = vpop.f32.mrf.mxu3  ;;  %v1853_v21 = vpack.c.bf16 %v1175_v58, %v1174_v15  ;;  %v1082_v54 = vpop.f32.mrf.mxu1 }
 0x163   : > { %v1873_v62 = vpack.c.bf16 %v1183_v7, %v1182_v57  ;;  %v1130_v16 = vadd.f32 %v1129_v5, %v1080_v40 }
 0x164   : > { %1881 = vst [vmem:[%s2381_s29 + $0x10] sm:$0xff] %v1853_v21  }
 0x165   : > { %v1148_v2 = vadd.f32 %v1130_v16, %v2362_v25  ;;  %1885 = vst [vmem:[%s2381_s29 + $0x30] sm:$0xff] %v1873_v62  }
 0x167   : > { %v1168_v52 = vadd.f32 %v2368_v19, %v1148_v2 }
 0x169   : > { %v1184_v31 = vmax.f32 %v1168_v52, 0.0 }
 0x16a   : > { %v1131_v59 = vpop.f32.mrf.mxu3 }
 0x16b   : > { %v1132_v3 = vadd.f32 %v1131_v59, %v1082_v54 }
 0x16d   : > { %v1149_v9 = vadd.f32 %v1132_v3, %v2372_v33 }
 0x16f   : > { %v1169_v63 = vadd.f32 %v2368_v19, %v1149_v9 }
 0x171   : > { %v1185_v29 = vmax.f32 %v1169_v63, 0.0 }
 0x173   : > { %v1878_v44 = vpack.c.bf16 %v1185_v29, %v1184_v31 }
 0x175   : > { %1886 = vst [vmem:[%s2381_s29 + $0x38] sm:$0xff] %v1878_v44  }
 0x176 PF: > { %s13_s14 = sadd.s32 1, %s1943_s14   ;;  %s2443_s12 = smov %s1939_s13 }
 0x177   : > { %p10_p5 = scmp.ge.s32.totalorder %s13_s14, 6   ;;  %s2444_s13 = smov %s2446_s15 }
 0x179   :  { %12 = sbr.rel (!%p10_p5) target bundleno = 2 (0x2), region = 67 }

// kernel: feature_loss_forward.11
= control target key start
LH: loop header
LB: loop body
LE: loop exit
PB: predicated region body
PF: predicated region fallthrough
CT: control target
= control target key end

     0   :  { %s422_s9 = smov 0   ;;  %s424_s10 = smov 0   ;;  %s462_s0 = inlined_call_operand.vmem [shape: f32[2,64,128], index: 0, kind: input, shape index: {}]   ;;  %s463_s1 = inlined_call_operand.vmem [shape: f32[2,64,128], index: 1, kind: input, shape index: {}]   ;;  %s464_s2 = inlined_call_operand.vmem [shape: f32[2,1,1], index: 2, kind: output, shape index: {}]  }
   0x1   :  { %s426_s11 = smov 0  }
   0x2 LB: > { %s24_s12 = sadd.s32 1, %s400_s10  ;;  %p346_p0 = scmp.ge.s32.totalorder %s404_s11, 1  ;;  %s404_s11 = sphi %s426_s11, %s12_s11   ;;  %s400_s10 = sphi %s424_s10, %s466_s10   ;;  %s396_s9 = sphi %s422_s9, %s465_s9  }
   0x3   : > { %p26_p1 = scmp.ge.s32.totalorder %s24_s12, 2  ;;  %p148_p2 = scmp.lt.s32.totalorder %s404_s11, 3 }
   0x5   : > { %s468_s12 = smov (%p26_p1, %s24_s12), 0  ;;  %p149_p3 = pnand %p346_p0, %p148_p2 }
   0x6   : > { %p182_p4 = scmp.lt.s32.totalorder (!%p149_p3), %s396_s9, 1 }
   0x7   : > { %152 = sbr.rel (%p149_p3) target bundleno = 218 (0xda), region = 28 }
   0xc   : > { %s470_s9 = smov (!%p182_p4, %s396_s9), 1  ;;  %vm208_vm0 = vcmask 0   ;;  %v406_v39 = vmov 0.0  }
   0xd   : > { %s353_s13 = sshll.u32 %s470_s9, 6  ;;  %s203_s22 = scalar_lea.vmem %s464_s2, %s470_s9 }
   0xe   : > { %s189_s16 = scalar_lea.vmem %s462_s0, %s353_s13  ;;  %s199_s19 = scalar_lea.vmem %s463_s1, %s353_s13  ;;  %209 = vst.msk [vmem:[%s203_s22] sm:$0x1] %vm208_vm0, %v406_v39 }
   0xf   : > { %v210_v0 = vld [vmem:[%s189_s16] sm:$0xff]  ;;  %v211_v1 = vld [vmem:[%s189_s16 + $0x8] sm:$0xff]  ;;  %v212_v2 = vld [vmem:[%s189_s16 + $0x10] sm:$0xff] }
  0x10   : > { %v213_v3 = vld [vmem:[%s189_s16 + $0x18] sm:$0xff]  ;;  %v214_v4 = vld [vmem:[%s189_s16 + $0x20] sm:$0xff]  ;;  %v219_v6 = vld [vmem:[%s199_s19 + $0x8] sm:$0xff] }
  0x11   : > { %v218_v5 = vld [vmem:[%s199_s19] sm:$0xff]  ;;  %v220_v7 = vld [vmem:[%s199_s19 + $0x10] sm:$0xff]  ;;  %v221_v8 = vld [vmem:[%s199_s19 + $0x18] sm:$0xff]  ;;  %v227_v11 = vsub.f32 %v211_v1, %v219_v6 }
  0x12   : > { %v226_v9 = vsub.f32 %v210_v0, %v218_v5  ;;  %v222_v10 = vld [vmem:[%s199_s19 + $0x20] sm:$0xff]  ;;  %v228_v12 = vsub.f32 %v212_v2, %v220_v7  ;;  %v229_v13 = vsub.f32 %v213_v3, %v221_v8  ;;  %v215_v14 = vld [vmem:[%s189_s16 + $0x28] sm:$0xff]  ;;  %v216_v20 = vld [vmem:[%s189_s16 + $0x30] sm:$0xff] }
  0x13   : > { %v223_v15 = vld [vmem:[%s199_s19 + $0x28] sm:$0xff]  ;;  %v230_v17 = vsub.f32 %v214_v4, %v222_v10  ;;  %v236_v18 = vmul.f32 %v227_v11, %v227_v11  ;;  %v224_v21 = vld [vmem:[%s199_s19 + $0x30] sm:$0xff]  ;;  %v217_v25 = vld [vmem:[%s189_s16 + $0x38] sm:$0xff] }
  0x14   : > { %v235_v16 = vmul.f32 %v226_v9, %v226_v9  ;;  %v237_v19 = vmul.f32 %v228_v12, %v228_v12  ;;  %v231_v22 = vsub.f32 %v215_v14, %v223_v15  ;;  %v238_v23 = vmul.f32 %v229_v13, %v229_v13  ;;  %v225_v26 = vld [vmem:[%s199_s19 + $0x38] sm:$0xff] }
  0x15   : > { %v232_v27 = vsub.f32 %v216_v20, %v224_v21  ;;  %v239_v28 = vmul.f32 %v230_v17, %v230_v17  ;;  %v233_v30 = vsub.f32 %v217_v25, %v225_v26  ;;  %v234_v47 = vld [vmem:[%s203_s22] sm:$0x1] }
  0x16   : > { %v243_v24 = vadd.f32 %v236_v18, %v235_v16  ;;  %v240_v31 = vmul.f32 %v231_v22, %v231_v22 }
  0x17   : > { %v241_v33 = vmul.f32 %v232_v27, %v232_v27  ;;  %v242_v35 = vmul.f32 %v233_v30, %v233_v30 }
  0x18   : > { %v244_v29 = vadd.f32 %v243_v24, %v237_v19 }
  0x1a   : > { %v245_v32 = vadd.f32 %v244_v29, %v238_v23 }
  0x1c   : > { %v246_v34 = vadd.f32 %v245_v32, %v239_v28 }
  0x1e   : > { %v247_v36 = vadd.f32 %v246_v34, %v240_v31 }
  0x20   : > { %v248_v37 = vadd.f32 %v247_v36, %v241_v33 }
  0x22   : > { %v249_v38 = vadd.f32 %v248_v37, %v242_v35 }
  0x24   : > { %250 = vadd.xlane.f32.xlu0 %v249_v38 }
  0x97   : > { %v251_v40 = vpop.xlane.xlu0 %250 }
  0x98   : > { %v252_v41 = vrot.slane %v251_v40, 4 }
  0x9a   : > { %v253_v42 = vadd.f32 %v252_v41, %v251_v40 }
  0x9c   : > { %v254_v43 = vrot.slane %v253_v42, 2 }
  0x9e   : > { %v255_v44 = vadd.f32 %v254_v43, %v253_v42 }
  0xa0   : > { %v256_v45 = vrot.slane %v255_v44, 1 }
  0xa2   : > { %v257_v46 = vadd.f32 %v256_v45, %v255_v44 }
  0xa4   : > { %355 = vpush %v257_v46 }
  0xd5   : > { %s356_s23 = spop %355 }
  0xd6   : > { %v259_v48 = vstv %s356_s23 }
  0xd7   : > { %v260_v49 = vadd.f32 %v259_v48, %v234_v47 }
  0xd9   : > { %262 = vst.msk [vmem:[%s203_s22] sm:$0x1] %vm208_vm0, %v260_v49 }
  0xda PF: > { %s12_s11 = sadd.s32 1, %s404_s11   ;;  %s465_s9 = smov %s400_s10 }
  0xdb   : > { %p9_p5 = scmp.ge.s32.totalorder %s12_s11, 4   ;;  %s466_s10 = smov %s468_s12 }
  0xdd   :  { %11 = sbr.rel (!%p9_p5) target bundleno = 2 (0x2), region = 65 }

// kernel: feature_loss_forward.9
= control target key start
LH: loop header
LB: loop body
LE: loop exit
PB: predicated region body
PF: predicated region fallthrough
CT: control target
= control target key end

     0   :  { %s2835_s12 = smov 0   ;;  %s2837_s13 = smov 0   ;;  %s3361_s0 = inlined_call_operand.vmem [shape: bf16[4,144,384], index: 0, kind: input, shape index: {}]   ;;  %s3362_s1 = inlined_call_operand.vmem [shape: bf16[3,384,128], index: 1, kind: input, shape index: {}]   ;;  %s3363_s2 = inlined_call_operand.vmem [shape: f32[1,128], index: 2, kind: input, shape index: {}]   ;;  %s3364_s3 = inlined_call_operand.vmem [shape: f32[4,128,128], index: 3, kind: output, shape index: {}]  }
   0x1   :  { %s2839_s14 = smov 0  }
   0x2 LB: > { %s25_s15 = sadd.s32 1, %s2809_s13  ;;  %p1854_p0 = scmp.ge.s32.totalorder %s2813_s14, 1  ;;  %s2813_s14 = sphi %s2839_s14, %s13_s14   ;;  %s2809_s13 = sphi %s2837_s13, %s3366_s13   ;;  %s2805_s12 = sphi %s2835_s12, %s3365_s12  }
   0x3   : > { %p27_p1 = scmp.ge.s32.totalorder %s25_s15, 4  ;;  %p151_p2 = scmp.lt.s32.totalorder %s2813_s14, 5 }
   0x5   : > { %s3368_s15 = smov (%p27_p1, %s25_s15), 0  ;;  %p152_p3 = pnand %p1854_p0, %p151_p2 }
   0x6   : > { %p179_p4 = scmp.lt.s32.totalorder (!%p152_p3), %s2805_s12, 3 }
   0x7   : > { %155 = sbr.rel (%p152_p3) target bundleno = 466 (0x1d2), region = 32 }
   0xc   : > { %v2676_v0 = vld [vmem:[%s3362_s1 + $0xf8] sm:$0xff]  ;;  %v2675_v1 = vld [vmem:[%s3362_s1 + $0xf0] sm:$0xff]  ;;  %v2674_v2 = vld [vmem:[%s3362_s1 + $0xe8] sm:$0xff]  ;;  %s3370_s12 = smov (!%p179_p4, %s2805_s12), 3 }
   0xd   : > { %639 = vmatpush.bf16.msra.mxu0 %v2676_v0  ;;  %2741 = vmatpush.bf16.msra.mxu1 %v2676_v0  ;;  %v2673_v3 = vld [vmem:[%s3362_s1 + $0xe0] sm:$0xff]  ;;  %v2672_v4 = vld [vmem:[%s3362_s1 + $0xd8] sm:$0xff]  ;;  %v2671_v5 = vld [vmem:[%s3362_s1 + $0xd0] sm:$0xff]  ;;  %s2765_s28 = smul.u32 216, %s3370_s12 }
   0xe   : > { %2742 = vmatpush.bf16.msra.mxu2 %v2676_v0  ;;  %2743 = vmatpush.bf16.msra.mxu3 %v2676_v0  ;;  %v2670_v6 = vld [vmem:[%s3362_s1 + $0xc8] sm:$0xff]  ;;  %v2669_v7 = vld [vmem:[%s3362_s1 + $0xc0] sm:$0xff]  ;;  %v2692_v16 = vld [vmem:[%s3362_s1 + $0x178] sm:$0xff] }
   0xf   : > { %s2884_s6 = scalar_lea.vmem %s3361_s0, %s2765_s28  ;;  %v2628_v17 = vld [vmem:[%s3362_s1 + $0x38] sm:$0xff]  ;;  %v2691_v24 = vld [vmem:[%s3362_s1 + $0x170] sm:$0xff]  ;;  %v2690_v28 = vld [vmem:[%s3362_s1 + $0x168] sm:$0xff] }
  0x10   : > { %v1940_v8 = vld [vmem:[%s2884_s6 + $0xc] sm:$0xf]  ;;  %v2646_v9 = vld [vmem:[%s2884_s6 + $0x14] sm:$0xf0]  ;;  %v1964_v10 = vld [vmem:[%s2884_s6 + $0x3c] sm:$0xf] }
  0x11   : > { %640 = vmatpush.bf16.msra.mxu0 %v2675_v1  ;;  %2744 = vmatpush.bf16.msra.mxu1 %v2675_v1  ;;  %v2652_v11 = vld [vmem:[%s2884_s6 + $0x44] sm:$0xf0]  ;;  %v1988_v12 = vld [vmem:[%s2884_s6 + $0x6c] sm:$0xf]  ;;  %v2658_v13 = vld [vmem:[%s2884_s6 + $0x74] sm:$0xf0]  ;;  %v1941_v18 = vor.u32 %v2646_v9, %v1940_v8 }
  0x12   : > { %2745 = vmatpush.bf16.msra.mxu2 %v2675_v1  ;;  %2746 = vmatpush.bf16.msra.mxu3 %v2675_v1  ;;  %v2012_v14 = vld [vmem:[%s2884_s6 + $0x9c] sm:$0xf]  ;;  %v2664_v15 = vld [vmem:[%s2884_s6 + $0xa4] sm:$0xf0]  ;;  %v1965_v19 = vor.u32 %v2652_v11, %v1964_v10  ;;  %v1989_v20 = vor.u32 %v2658_v13, %v1988_v12  ;;  %v2627_v25 = vld [vmem:[%s3362_s1 + $0x30] sm:$0xff] }
  0x13   : > { %v2013_v21 = vor.u32 %v2664_v15, %v2012_v14  ;;  %v2684_v22 = vld [vmem:[%s3362_s1 + $0x138] sm:$0xff]  ;;  %v2683_v26 = vld [vmem:[%s3362_s1 + $0x130] sm:$0xff]  ;;  %v2626_v29 = vld [vmem:[%s3362_s1 + $0x28] sm:$0xff] }
  0x14   : > { %v2636_v23 = vld [vmem:[%s3362_s1 + $0x78] sm:$0xff]  ;;  %v2635_v27 = vld [vmem:[%s3362_s1 + $0x70] sm:$0xff]  ;;  %v2682_v30 = vld [vmem:[%s3362_s1 + $0x128] sm:$0xff] }
  0x15   : > { %641 = vmatpush.bf16.msra.mxu0 %v2674_v2  ;;  %2747 = vmatpush.bf16.msra.mxu1 %v2674_v2  ;;  %v2634_v31 = vld [vmem:[%s3362_s1 + $0x68] sm:$0xff]  ;;  %v2689_v32 = vld [vmem:[%s3362_s1 + $0x160] sm:$0xff]  ;;  %v2649_v37 = vld [vmem:[%s2884_s6 + $0x2c] sm:$0xf0] }
  0x16   : > { %2748 = vmatpush.bf16.msra.mxu2 %v2674_v2  ;;  %2749 = vmatpush.bf16.msra.mxu3 %v2674_v2  ;;  %v2625_v33 = vld [vmem:[%s3362_s1 + $0x20] sm:$0xff]  ;;  %v1976_v38 = vld [vmem:[%s2884_s6 + $0x54] sm:$0xf]  ;;  %v2661_v41 = vld [vmem:[%s2884_s6 + $0x8c] sm:$0xf0] }
  0x17   : > { %v2681_v34 = vld [vmem:[%s3362_s1 + $0x120] sm:$0xff]  ;;  %v2024_v42 = vld [vmem:[%s2884_s6 + $0xb4] sm:$0xf]  ;;  %v2688_v44 = vld [vmem:[%s3362_s1 + $0x158] sm:$0xff] }
  0x18   : > { %v2633_v35 = vld [vmem:[%s3362_s1 + $0x60] sm:$0xff]  ;;  %v2624_v45 = vld [vmem:[%s3362_s1 + $0x18] sm:$0xff]  ;;  %v2687_v52 = vld [vmem:[%s3362_s1 + $0x150] sm:$0xff] }
  0x19   : > { %642 = vmatpush.bf16.msra.mxu0 %v2673_v3  ;;  %2750 = vmatpush.bf16.msra.mxu1 %v2673_v3  ;;  %v1952_v36 = vld [vmem:[%s2884_s6 + $0x24] sm:$0xf]  ;;  %v2655_v39 = vld [vmem:[%s2884_s6 + $0x5c] sm:$0xf0]  ;;  %v2680_v50 = vld [vmem:[%s3362_s1 + $0x118] sm:$0xff] }
  0x1a   : > { %2751 = vmatpush.bf16.msra.mxu2 %v2673_v3  ;;  %2752 = vmatpush.bf16.msra.mxu3 %v2673_v3  ;;  %v2000_v40 = vld [vmem:[%s2884_s6 + $0x84] sm:$0xf]  ;;  %v2667_v43 = vld [vmem:[%s2884_s6 + $0xbc] sm:$0xf0]  ;;  %v1953_v46 = vor.u32 %v2649_v37, %v1952_v36  ;;  %v1977_v47 = vor.u32 %v2655_v39, %v1976_v38  ;;  %v2632_v51 = vld [vmem:[%s3362_s1 + $0x58] sm:$0xff] }
  0x1b   : > { %v2001_v48 = vor.u32 %v2661_v41, %v2000_v40  ;;  %v2025_v49 = vor.u32 %v2667_v43, %v2024_v42  ;;  %v2623_v53 = vld [vmem:[%s3362_s1 + $0x10] sm:$0xff]  ;;  %v2686_v56 = vld [vmem:[%s3362_s1 + $0x148] sm:$0xff]  ;;  %v2685_v60 = vld [vmem:[%s3362_s1 + $0x140] sm:$0xff] }
  0x1c   : > { %v2679_v54 = vld [vmem:[%s3362_s1 + $0x110] sm:$0xff]  ;;  %v2622_v57 = vld [vmem:[%s3362_s1 + $0x8] sm:$0xff]  ;;  %v2621_v61 = vld [vmem:[%s3362_s1] sm:$0xff] }
  0x1d   : > { %643 = vmatpush.bf16.msra.mxu0 %v2672_v4  ;;  %2753 = vmatpush.bf16.msra.mxu1 %v2672_v4  ;;  %v2631_v55 = vld [vmem:[%s3362_s1 + $0x50] sm:$0xff]  ;;  %v2678_v58 = vld [vmem:[%s3362_s1 + $0x108] sm:$0xff]  ;;  %v2677_v62 = vld [vmem:[%s3362_s1 + $0x100] sm:$0xff] }
  0x1e   : > { %2754 = vmatpush.bf16.msra.mxu2 %v2672_v4  ;;  %2755 = vmatpush.bf16.msra.mxu3 %v2672_v4  ;;  %v2630_v59 = vld [vmem:[%s3362_s1 + $0x48] sm:$0xff]  ;;  %v2629_v63 = vld [vmem:[%s3362_s1 + $0x40] sm:$0xff]  ;;  %v2645_v0 = vld [vmem:[%s2884_s6 + $0x10] sm:$0xf] }
  0x1f   : > { %v2724_v1 = vld [vmem:[%s3362_s1 + $0x1b8] sm:$0xff]  ;;  %v1948_v4 = vld [vmem:[%s2884_s6 + $0x14] sm:$0xf]  ;;  %v2597_v8 = vld [vmem:[%s2884_s6 + $0x4] sm:$0xf] }
  0x20   : > { %v2732_v2 = vld [vmem:[%s3362_s1 + $0x1f8] sm:$0xff]  ;;  %v2134_v9 = vld [vmem:[%s2884_s6 + $0xc] sm:$0xf0]  ;;  %v2721_v36 = vld [vmem:[%s3362_s1 + $0x1a0] sm:$0xff] }
  0x21   : > { %644 = vmatpush.bf16.msra.mxu0 %v2671_v5  ;;  %2756 = vmatpush.bf16.msra.mxu1 %v2671_v5  ;;  %v1942_v3 = vld [vmem:[%s2884_s6 + $0x18] sm:$0xf0]  ;;  %v2723_v12 = vld [vmem:[%s3362_s1 + $0x1b0] sm:$0xff]  ;;  %v2729_v37 = vld [vmem:[%s3362_s1 + $0x1e0] sm:$0xff] }
  0x22   : > { %2757 = vmatpush.bf16.msra.mxu2 %v2671_v5  ;;  %2758 = vmatpush.bf16.msra.mxu3 %v2671_v5  ;;  %v2647_v5 = vld [vmem:[%s2884_s6 + $0x1c] sm:$0xf0]  ;;  %v2644_v10 = vld [vmem:[%s3362_s1 + $0xb8] sm:$0xff]  ;;  %v2731_v13 = vld [vmem:[%s3362_s1 + $0x1f0] sm:$0xff]  ;;  %v1945_v14 = vor.u32 %v2645_v0, %v1942_v3 }
  0x23   : > { %v2740_v11 = vld [vmem:[%s3362_s1 + $0x238] sm:$0xff]  ;;  %v1949_v15 = vor.u32 %v2647_v5, %v1948_v4  ;;  %v2641_v38 = vld [vmem:[%s3362_s1 + $0xa0] sm:$0xff]  ;;  %v1966_v41 = vld [vmem:[%s2884_s6 + $0x48] sm:$0xf0] }
  0x24   : > { %v2737_v39 = vld [vmem:[%s3362_s1 + $0x220] sm:$0xff]  ;;  %v2653_v43 = vld [vmem:[%s2884_s6 + $0x4c] sm:$0xf0] }
  0x25   : > { %645 = vmatpush.bf16.msra.mxu0 %v2670_v6  ;;  %2759 = vmatpush.bf16.msra.mxu1 %v2670_v6  ;;  %v2651_v40 = vld [vmem:[%s2884_s6 + $0x40] sm:$0xf]  ;;  %v1972_v42 = vld [vmem:[%s2884_s6 + $0x44] sm:$0xf]  ;;  %v2719_v4 = vld [vmem:[%s3362_s1 + $0x190] sm:$0xff] }
  0x26   : > { %2760 = vmatpush.bf16.msra.mxu2 %v2670_v6  ;;  %2761 = vmatpush.bf16.msra.mxu3 %v2670_v6  ;;  %v2132_v6 = vld [vmem:[%s2884_s6] sm:$0xf]  ;;  %v2727_v5 = vld [vmem:[%s3362_s1 + $0x1d0] sm:$0xff] }
  0x29   : > { %646 = vmatpush.bf16.msra.mxu0 %v2669_v7  ;;  %2762 = vmatpush.bf16.msra.mxu1 %v2669_v7 }
  0x2a   : > { %2763 = vmatpush.bf16.msra.mxu2 %v2669_v7  ;;  %2764 = vmatpush.bf16.msra.mxu3 %v2669_v7  ;;  %v2598_v7 = vld [vmem:[%s2884_s6 + $0x8] sm:$0xf0] }
  0x2c   : > { %647 = vmatmul.bf16.vlgmr.msra.gmra.mxu0 %v1941_v18  ;;  %657 = vmatmul.bf16.vlgmr.msra.gmra.mxu1 %v1965_v19  ;;  %v2643_v18 = vld [vmem:[%s3362_s1 + $0xb0] sm:$0xff] }
  0x2d   : > { %667 = vmatmul.bf16.vlgmr.msra.gmra.mxu2 %v1989_v20  ;;  %677 = vmatmul.bf16.vlgmr.msra.gmra.mxu3 %v2013_v21  ;;  %v2739_v19 = vld [vmem:[%s3362_s1 + $0x230] sm:$0xff]  ;;  %v2722_v20 = vld [vmem:[%s3362_s1 + $0x1a8] sm:$0xff] }
  0x2e   : > { %737 = vmatpush.bf16.msrb.mxu2 %v2692_v16  ;;  %1058 = vmatpush.bf16.msrb.mxu3 %v2628_v17  ;;  %v2133_v16 = vor.u32 %v2598_v7, %v2132_v6  ;;  %v2137_v17 = vor.u32 %v2597_v8, %v2134_v9  ;;  %v2730_v21 = vld [vmem:[%s3362_s1 + $0x1e8] sm:$0xff]  ;;  %v2639_v6 = vld [vmem:[%s3362_s1 + $0x90] sm:$0xff]  ;;  %v1990_v9 = vld [vmem:[%s2884_s6 + $0x78] sm:$0xf0] }
  0x2f   : > { %688 = vmatpush.bf16.msrb.mxu1 %v2684_v22  ;;  %1107 = vmatpush.bf16.msrb.mxu0 %v2636_v23  ;;  %v2642_v22 = vld [vmem:[%s3362_s1 + $0xa8] sm:$0xff]  ;;  %v2735_v7 = vld [vmem:[%s3362_s1 + $0x210] sm:$0xff] }
  0x30   : > { %v2738_v23 = vld [vmem:[%s3362_s1 + $0x228] sm:$0xff]  ;;  %v2657_v8 = vld [vmem:[%s2884_s6 + $0x70] sm:$0xf] }
  0x32   : > { %738 = vmatpush.bf16.msrb.mxu2 %v2691_v24  ;;  %1059 = vmatpush.bf16.msrb.mxu3 %v2627_v25  ;;  %v2648_v24 = vld [vmem:[%s2884_s6 + $0x28] sm:$0xf]  ;;  %v1954_v25 = vld [vmem:[%s2884_s6 + $0x30] sm:$0xf0] }
  0x33   : > { %689 = vmatpush.bf16.msrb.mxu1 %v2683_v26  ;;  %1108 = vmatpush.bf16.msrb.mxu0 %v2635_v27  ;;  %v1960_v26 = vld [vmem:[%s2884_s6 + $0x2c] sm:$0xf]  ;;  %v2650_v27 = vld [vmem:[%s2884_s6 + $0x34] sm:$0xf0] }
  0x36   : > { %739 = vmatpush.bf16.msrb.mxu2 %v2690_v28  ;;  %1060 = vmatpush.bf16.msrb.mxu3 %v2626_v29  ;;  %v2144_v28 = vld [vmem:[%s2884_s6 + $0x18] sm:$0xf]  ;;  %v2601_v29 = vld [vmem:[%s2884_s6 + $0x20] sm:$0xf0] }
  0x37   : > { %690 = vmatpush.bf16.msrb.mxu1 %v2682_v30  ;;  %1109 = vmatpush.bf16.msrb.mxu0 %v2634_v31  ;;  %v2600_v30 = vld [vmem:[%s2884_s6 + $0x1c] sm:$0xf]  ;;  %v2146_v31 = vld [vmem:[%s2884_s6 + $0x24] sm:$0xf0] }
  0x3a   : > { %740 = vmatpush.bf16.msrb.mxu2 %v2689_v32  ;;  %1061 = vmatpush.bf16.msrb.mxu3 %v2625_v33  ;;  %v1957_v32 = vor.u32 %v2648_v24, %v1954_v25  ;;  %v1961_v33 = vor.u32 %v2650_v27, %v1960_v26  ;;  %v2660_v24 = vld [vmem:[%s2884_s6 + $0x88] sm:$0xf]  ;;  %v2002_v25 = vld [vmem:[%s2884_s6 + $0x90] sm:$0xf0]  ;;  %v2008_v26 = vld [vmem:[%s2884_s6 + $0x8c] sm:$0xf] }
  0x3b   : > { %691 = vmatpush.bf16.msrb.mxu1 %v2681_v34  ;;  %1110 = vmatpush.bf16.msrb.mxu0 %v2633_v35  ;;  %v2145_v34 = vor.u32 %v2601_v29, %v2144_v28  ;;  %v2149_v35 = vor.u32 %v2600_v30, %v2146_v31  ;;  %v2662_v27 = vld [vmem:[%s2884_s6 + $0x94] sm:$0xf0]  ;;  %v2613_v29 = vld [vmem:[%s2884_s6 + $0x80] sm:$0xf0]  ;;  %v2612_v30 = vld [vmem:[%s2884_s6 + $0x7c] sm:$0xf] }
  0x3c   : > { %652 = vmatmul.bf16.gmra.mxu0 %v1953_v46  ;;  %662 = vmatmul.bf16.gmra.mxu1 %v1977_v47  ;;  %v2603_v46 = vld [vmem:[%s2884_s6 + $0x34] sm:$0xf]  ;;  %v2158_v47 = vld [vmem:[%s2884_s6 + $0x3c] sm:$0xf0]  ;;  %v2192_v28 = vld [vmem:[%s2884_s6 + $0x78] sm:$0xf] }
  0x3d   : > { %672 = vmatmul.bf16.gmra.mxu2 %v2001_v48  ;;  %682 = vmatmul.bf16.gmra.mxu3 %v2025_v49  ;;  %v1969_v48 = vor.u32 %v2651_v40, %v1966_v41  ;;  %v1973_v49 = vor.u32 %v2653_v43, %v1972_v42  ;;  %v2194_v31 = vld [vmem:[%s2884_s6 + $0x84] sm:$0xf0]  ;;  %v2663_v40 = vld [vmem:[%s2884_s6 + $0xa0] sm:$0xf]  ;;  %v2014_v41 = vld [vmem:[%s2884_s6 + $0xa8] sm:$0xf0] }
  0x3e   : > { %741 = vmatpush.bf16.msrb.mxu2 %v2688_v44  ;;  %1062 = vmatpush.bf16.msrb.mxu3 %v2624_v45  ;;  %v2156_v44 = vld [vmem:[%s2884_s6 + $0x30] sm:$0xf]  ;;  %v2604_v45 = vld [vmem:[%s2884_s6 + $0x38] sm:$0xf0]  ;;  %v2020_v42 = vld [vmem:[%s2884_s6 + $0xa4] sm:$0xf] }
  0x3f   : > { %692 = vmatpush.bf16.msrb.mxu1 %v2680_v50  ;;  %1111 = vmatpush.bf16.msrb.mxu0 %v2632_v51  ;;  %v2157_v50 = vor.u32 %v2604_v45, %v2156_v44  ;;  %v2161_v51 = vor.u32 %v2603_v46, %v2158_v47  ;;  %v2665_v43 = vld [vmem:[%s2884_s6 + $0xac] sm:$0xf0]  ;;  %v2616_v45 = vld [vmem:[%s2884_s6 + $0x98] sm:$0xf0]  ;;  %v2615_v46 = vld [vmem:[%s2884_s6 + $0x94] sm:$0xf] }
  0x40   : > { %v2204_v44 = vld [vmem:[%s2884_s6 + $0x90] sm:$0xf]  ;;  %v2206_v47 = vld [vmem:[%s2884_s6 + $0x9c] sm:$0xf0] }
  0x42   : > { %742 = vmatpush.bf16.msrb.mxu2 %v2687_v52  ;;  %1063 = vmatpush.bf16.msrb.mxu3 %v2623_v53  ;;  %v2720_v52 = vld [vmem:[%s3362_s1 + $0x198] sm:$0xff] }
  0x43   : > { %693 = vmatpush.bf16.msrb.mxu1 %v2679_v54  ;;  %1112 = vmatpush.bf16.msrb.mxu0 %v2631_v55  ;;  %v2728_v53 = vld [vmem:[%s3362_s1 + $0x1d8] sm:$0xff] }
  0x44   : > { %v2640_v54 = vld [vmem:[%s3362_s1 + $0x98] sm:$0xff] }
  0x45   : > { %v2736_v55 = vld [vmem:[%s3362_s1 + $0x218] sm:$0xff] }
  0x46   : > { %743 = vmatpush.bf16.msrb.mxu2 %v2686_v56  ;;  %1064 = vmatpush.bf16.msrb.mxu3 %v2622_v57  ;;  %v2654_v56 = vld [vmem:[%s2884_s6 + $0x58] sm:$0xf]  ;;  %v1978_v57 = vld [vmem:[%s2884_s6 + $0x60] sm:$0xf0] }
  0x47   : > { %694 = vmatpush.bf16.msrb.mxu1 %v2678_v58  ;;  %1113 = vmatpush.bf16.msrb.mxu0 %v2630_v59  ;;  %v1984_v58 = vld [vmem:[%s2884_s6 + $0x5c] sm:$0xf]  ;;  %v2656_v59 = vld [vmem:[%s2884_s6 + $0x64] sm:$0xf0]  ;;  %v1981_v0 = vor.u32 %v2654_v56, %v1978_v57 }
  0x4a   : > { %744 = vmatpush.bf16.msrb.mxu2 %v2685_v60  ;;  %1065 = vmatpush.bf16.msrb.mxu3 %v2621_v61  ;;  %v2168_v60 = vld [vmem:[%s2884_s6 + $0x48] sm:$0xf]  ;;  %v2607_v61 = vld [vmem:[%s2884_s6 + $0x50] sm:$0xf0] }
  0x4b   : > { %695 = vmatpush.bf16.msrb.mxu1 %v2677_v62  ;;  %1114 = vmatpush.bf16.msrb.mxu0 %v2629_v63  ;;  %v2606_v62 = vld [vmem:[%s2884_s6 + $0x4c] sm:$0xf]  ;;  %v2170_v63 = vld [vmem:[%s2884_s6 + $0x54] sm:$0xf0] }
  0x4c   : > { %v2173_v3 = vor.u32 %v2606_v62, %v2170_v63  ;;  %v2216_v62 = vld [vmem:[%s2884_s6 + $0xa8] sm:$0xf]  ;;  %v2619_v63 = vld [vmem:[%s2884_s6 + $0xb0] sm:$0xf0] }
  0x4d   : > { %745 = vmatmul.bf16.vlgmr.msrb.gmra.mxu2 %v1949_v15  ;;  %1066 = vmatmul.bf16.vlgmr.msrb.gmra.mxu3 %v2133_v16  ;;  %v2182_v15 = vld [vmem:[%s2884_s6 + $0x6c] sm:$0xf0]  ;;  %v1993_v16 = vor.u32 %v2657_v8, %v1990_v9  ;;  %v2217_v8 = vor.u32 %v2619_v63, %v2216_v62 }
  0x4e   : > { %1564 = vmatpush.bf16.msra.mxu2 %v2724_v1  ;;  %1613 = vmatpush.bf16.msra.mxu3 %v2732_v2  ;;  %v1985_v1 = vor.u32 %v2656_v59, %v1984_v58  ;;  %v2169_v2 = vor.u32 %v2607_v61, %v2168_v60  ;;  %v2666_v58 = vld [vmem:[%s2884_s6 + $0xb8] sm:$0xf]  ;;  %v2026_v59 = vld [vmem:[%s2884_s6 + $0xc0] sm:$0xf0]  ;;  %v2032_v60 = vld [vmem:[%s2884_s6 + $0xbc] sm:$0xf] }
  0x4f   : > { %1156 = vmatpush.bf16.msra.mxu1 %v2644_v10  ;;  %1662 = vmatpush.bf16.msra.mxu0 %v2740_v11  ;;  %v1996_v10 = vld [vmem:[%s2884_s6 + $0x74] sm:$0xf]  ;;  %v2659_v11 = vld [vmem:[%s2884_s6 + $0x7c] sm:$0xf0]  ;;  %v2668_v61 = vld [vmem:[%s2884_s6 + $0xc4] sm:$0xf0] }
  0x50   : > { %696 = vmatmul.bf16.vlgmr.msrb.gmra.mxu1 %v1945_v14  ;;  %1115 = vmatmul.bf16.vlgmr.msrb.gmra.mxu0 %v2137_v17  ;;  %v2609_v14 = vld [vmem:[%s2884_s6 + $0x64] sm:$0xf]  ;;  %v1997_v17 = vor.u32 %v2659_v11, %v1996_v10 }
  0x52   : > { %1565 = vmatpush.bf16.msra.mxu2 %v2723_v12  ;;  %1614 = vmatpush.bf16.msra.mxu3 %v2731_v13  ;;  %v2180_v12 = vld [vmem:[%s2884_s6 + $0x60] sm:$0xf]  ;;  %v2610_v13 = vld [vmem:[%s2884_s6 + $0x68] sm:$0xf0] }
  0x53   : > { %1157 = vmatpush.bf16.msra.mxu1 %v2643_v18  ;;  %1663 = vmatpush.bf16.msra.mxu0 %v2739_v19  ;;  %v2181_v18 = vor.u32 %v2610_v13, %v2180_v12  ;;  %v2185_v19 = vor.u32 %v2609_v14, %v2182_v15  ;;  %v2140_v14 = vld [vmem:[%s2884_s6 + $0x8] sm:$0xf]  ;;  %v2599_v15 = vld [vmem:[%s2884_s6 + $0x10] sm:$0xf0] }
  0x56   : > { %1566 = vmatpush.bf16.msra.mxu2 %v2722_v20  ;;  %1615 = vmatpush.bf16.msra.mxu3 %v2730_v21  ;;  %v2718_v20 = vld [vmem:[%s3362_s1 + $0x188] sm:$0xff] }
  0x57   : > { %1158 = vmatpush.bf16.msra.mxu1 %v2642_v22  ;;  %1664 = vmatpush.bf16.msra.mxu0 %v2738_v23  ;;  %v2726_v21 = vld [vmem:[%s3362_s1 + $0x1c8] sm:$0xff] }
  0x58   : > { %v2638_v22 = vld [vmem:[%s3362_s1 + $0x88] sm:$0xff] }
  0x59   : > { %v2734_v23 = vld [vmem:[%s3362_s1 + $0x208] sm:$0xff] }
  0x5a   : > { %1567 = vmatpush.bf16.msra.mxu2 %v2721_v36  ;;  %1616 = vmatpush.bf16.msra.mxu3 %v2729_v37  ;;  %v2717_v36 = vld [vmem:[%s3362_s1 + $0x180] sm:$0xff] }
  0x5b   : > { %1159 = vmatpush.bf16.msra.mxu1 %v2641_v38  ;;  %1665 = vmatpush.bf16.msra.mxu0 %v2737_v39  ;;  %v2725_v37 = vld [vmem:[%s3362_s1 + $0x1c0] sm:$0xff] }
  0x5c   : > { %v2637_v38 = vld [vmem:[%s3362_s1 + $0x80] sm:$0xff] }
  0x5d   : > { %750 = vmatmul.bf16.gmra.mxu2 %v1961_v33  ;;  %1071 = vmatmul.bf16.gmra.mxu3 %v2145_v34  ;;  %v2009_v33 = vor.u32 %v2662_v27, %v2008_v26  ;;  %v2193_v34 = vor.u32 %v2613_v29, %v2192_v28  ;;  %v2733_v39 = vld [vmem:[%s3362_s1 + $0x200] sm:$0xff] }
  0x5e   : > { %1568 = vmatpush.bf16.msra.mxu2 %v2720_v52  ;;  %1617 = vmatpush.bf16.msra.mxu3 %v2728_v53  ;;  %v2205_v52 = vor.u32 %v2616_v45, %v2204_v44  ;;  %v2209_v53 = vor.u32 %v2615_v46, %v2206_v47  ;;  %v2418_v44 = vld [vmem:[%s2884_s6 + $0x3c] sm:$0xf0]  ;;  %v2424_v45 = vld [vmem:[%s2884_s6 + $0x38] sm:$0xf]  ;;  %v2698_v46 = vld [vmem:[%s2884_s6 + $0x40] sm:$0xf0] }
  0x5f   : > { %1160 = vmatpush.bf16.msra.mxu1 %v2640_v54  ;;  %1666 = vmatpush.bf16.msra.mxu0 %v2736_v55 }
  0x60   : > { %701 = vmatmul.bf16.gmra.mxu1 %v1957_v32  ;;  %1120 = vmatmul.bf16.gmra.mxu0 %v2149_v35  ;;  %v2005_v32 = vor.u32 %v2660_v24, %v2002_v25  ;;  %v2197_v35 = vor.u32 %v2612_v30, %v2194_v31  ;;  %v2141_v24 = vor.u32 %v2599_v15, %v2140_v14  ;;  %v2605_v14 = vld [vmem:[%s2884_s6 + $0x40] sm:$0xf0] }
  0x62   : > { %1569 = vmatpush.bf16.msra.mxu2 %v2719_v4  ;;  %1618 = vmatpush.bf16.msra.mxu3 %v2727_v5 }
  0x63   : > { %1161 = vmatpush.bf16.msra.mxu1 %v2639_v6  ;;  %1667 = vmatpush.bf16.msra.mxu0 %v2735_v7  ;;  %v2029_v6 = vor.u32 %v2666_v58, %v2026_v59  ;;  %v2033_v7 = vor.u32 %v2668_v61, %v2032_v60  ;;  %v2425_v59 = vor.u32 %v2698_v46, %v2424_v45  ;;  %v2440_v45 = vld [vmem:[%s2884_s6 + $0x60] sm:$0xf]  ;;  %v2703_v46 = vld [vmem:[%s2884_s6 + $0x68] sm:$0xf0] }
  0x66   : > { %1570 = vmatpush.bf16.msra.mxu2 %v2718_v20  ;;  %1619 = vmatpush.bf16.msra.mxu3 %v2726_v21  ;;  %v2412_v20 = vld [vmem:[%s2884_s6 + $0x20] sm:$0xf]  ;;  %v2695_v21 = vld [vmem:[%s2884_s6 + $0x28] sm:$0xf0] }
  0x67   : > { %1162 = vmatpush.bf16.msra.mxu1 %v2638_v22  ;;  %1668 = vmatpush.bf16.msra.mxu0 %v2734_v23  ;;  %v2413_v28 = vor.u32 %v2695_v21, %v2412_v20  ;;  %v2436_v20 = vld [vmem:[%s2884_s6 + $0x50] sm:$0xf]  ;;  %v2701_v21 = vld [vmem:[%s2884_s6 + $0x58] sm:$0xf0] }
  0x6a   : > { %1571 = vmatpush.bf16.msra.mxu2 %v2717_v36  ;;  %1620 = vmatpush.bf16.msra.mxu3 %v2725_v37 }
  0x6b   : > { %1163 = vmatpush.bf16.msra.mxu1 %v2637_v38  ;;  %1669 = vmatpush.bf16.msra.mxu0 %v2733_v39  ;;  %v2152_v38 = vld [vmem:[%s2884_s6 + $0x20] sm:$0xf]  ;;  %v2602_v39 = vld [vmem:[%s2884_s6 + $0x28] sm:$0xf0] }
  0x6d   : > { %755 = vmatmul.bf16.gmra.mxu2 %v1973_v49  ;;  %1076 = vmatmul.bf16.gmra.mxu3 %v2157_v50  ;;  %v2017_v50 = vor.u32 %v2663_v40, %v2014_v41  ;;  %v2416_v41 = vld [vmem:[%s2884_s6 + $0x30] sm:$0xf] }
  0x70   : > { %706 = vmatmul.bf16.gmra.mxu1 %v1969_v48  ;;  %1125 = vmatmul.bf16.gmra.mxu0 %v2161_v51  ;;  %v2021_v51 = vor.u32 %v2665_v43, %v2020_v42  ;;  %v2697_v42 = vld [vmem:[%s2884_s6 + $0x38] sm:$0xf0]  ;;  %v2696_v43 = vld [vmem:[%s2884_s6 + $0x34] sm:$0xf] }
  0x71   : > { %v2421_v58 = vor.u32 %v2696_v43, %v2418_v44  ;;  %v2608_v43 = vld [vmem:[%s2884_s6 + $0x58] sm:$0xf0] }
  0x7d   : > { %760 = vmatmul.bf16.gmra.mxu2 %v1985_v1  ;;  %1081 = vmatmul.bf16.gmra.mxu3 %v2169_v2  ;;  %v2218_v1 = vld [vmem:[%s2884_s6 + $0xb4] sm:$0xf0] }
  0x80   : > { %711 = vmatmul.bf16.gmra.mxu1 %v1981_v0  ;;  %1130 = vmatmul.bf16.gmra.mxu0 %v2173_v3  ;;  %v2618_v0 = vld [vmem:[%s2884_s6 + $0xac] sm:$0xf] }
  0x81   : > { %v2221_v9 = vor.u32 %v2618_v0, %v2218_v1 }
  0x8d   : > { %765 = vmatmul.bf16.gmra.mxu2 %v1997_v17  ;;  %1086 = vmatmul.bf16.gmra.mxu3 %v2181_v18  ;;  %v2694_v17 = vld [vmem:[%s2884_s6 + $0x20] sm:$0xf0]  ;;  %v2693_v18 = vld [vmem:[%s2884_s6 + $0x1c] sm:$0xf] }
  0x90   : > { %716 = vmatmul.bf16.gmra.mxu1 %v1993_v16  ;;  %1135 = vmatmul.bf16.gmra.mxu0 %v2185_v19  ;;  %v2404_v16 = vld [vmem:[%s2884_s6 + $0x18] sm:$0xf]  ;;  %v2406_v19 = vld [vmem:[%s2884_s6 + $0x24] sm:$0xf0] }
  0x91   : > { %v2405_v25 = vor.u32 %v2694_v17, %v2404_v16  ;;  %v2409_v27 = vor.u32 %v2693_v18, %v2406_v19  ;;  %v2428_v16 = vld [vmem:[%s2884_s6 + $0x48] sm:$0xf]  ;;  %v2700_v17 = vld [vmem:[%s2884_s6 + $0x50] sm:$0xf0]  ;;  %v2699_v18 = vld [vmem:[%s2884_s6 + $0x4c] sm:$0xf] }
  0x92   : > { %v2430_v19 = vld [vmem:[%s2884_s6 + $0x54] sm:$0xf0] }
  0x9d   : > { %770 = vmatmul.bf16.gmra.mxu2 %v2009_v33  ;;  %1091 = vmatmul.bf16.gmra.mxu3 %v2193_v34 }
  0xa0   : > { %721 = vmatmul.bf16.gmra.mxu1 %v2005_v32  ;;  %1140 = vmatmul.bf16.gmra.mxu0 %v2197_v35 }
  0xa9   : > { %v648_v48 = vpop.f32.mrf.mxu0  ;;  %v3153_v49 = vpop.f32.mrf.mxu1 }
  0xad   : > { %775 = vmatmul.bf16.gmra.mxu2 %v2021_v51  ;;  %1096 = vmatmul.bf16.gmra.mxu3 %v2205_v52  ;;  %v2153_v51 = vor.u32 %v2602_v39, %v2152_v38  ;;  %v2417_v52 = vor.u32 %v2697_v42, %v2416_v41  ;;  %v2176_v42 = vld [vmem:[%s2884_s6 + $0x50] sm:$0xf] }
  0xb0   : > { %726 = vmatmul.bf16.gmra.mxu1 %v2017_v50  ;;  %1145 = vmatmul.bf16.gmra.mxu0 %v2209_v53  ;;  %v3155_v54 = vpop.f32.mrf.mxu2  ;;  %v3157_v55 = vpop.f32.mrf.mxu3 }
  0xb1   : > { %v650_v56 = vpop.f32.mrf.mxu0  ;;  %v3159_v57 = vpop.f32.mrf.mxu1 }
  0xb8   : > { %v3169_v2 = vpop.f32.mrf.mxu2  ;;  %v3171_v3 = vpop.f32.mrf.mxu3 }
  0xb9   : > { %v653_v4 = vpop.f32.mrf.mxu0  ;;  %v3173_v5 = vpop.f32.mrf.mxu1 }
  0xbd   : > { %780 = vmatmul.bf16.gmra.mxu2 %v2033_v7  ;;  %1101 = vmatmul.bf16.gmra.mxu3 %v2217_v8 }
  0xc0   : > { %731 = vmatmul.bf16.gmra.mxu1 %v2029_v6  ;;  %1150 = vmatmul.bf16.gmra.mxu0 %v2221_v9  ;;  %v3175_v10 = vpop.f32.mrf.mxu2  ;;  %v3177_v11 = vpop.f32.mrf.mxu3  ;;  %v2164_v9 = vld [vmem:[%s2884_s6 + $0x38] sm:$0xf] }
  0xc1   : > { %v655_v12 = vpop.f32.mrf.mxu0  ;;  %v3179_v13 = vpop.f32.mrf.mxu1 }
  0xc8   : > { %v3189_v22 = vpop.f32.mrf.mxu2  ;;  %v3191_v23 = vpop.f32.mrf.mxu3 }
  0xcd   : > { %v697_v26 = vpop.f32.mrf.mxu1  ;;  %v1116_v30 = vpop.f32.mrf.mxu0  ;;  %1572 = vmatmul.bf16.vlgmr.msra.gmra.mxu2 %v2405_v25  ;;  %1621 = vmatmul.bf16.vlgmr.msra.gmra.mxu3 %v2409_v27  ;;  %v2165_v27 = vor.u32 %v2605_v14, %v2164_v9 }
  0xce   : > { %v698_v29 = vadd.f32 %v697_v26, %v648_v48 }
  0xd0   : > { %1164 = vmatmul.bf16.vlgmr.msra.gmra.mxu1 %v2141_v24  ;;  %1670 = vmatmul.bf16.vlgmr.msra.gmra.mxu0 %v2413_v28  ;;  %v746_v31 = vpop.f32.mrf.mxu2  ;;  %v1067_v33 = vpop.f32.mrf.mxu3  ;;  %v2429_v28 = vor.u32 %v2700_v17, %v2428_v16  ;;  %v2188_v17 = vld [vmem:[%s2884_s6 + $0x68] sm:$0xf] }
  0xd1   : > { %v747_v32 = vadd.f32 %v746_v31, %v698_v29  ;;  %v2437_v31 = vor.u32 %v2701_v21, %v2436_v20  ;;  %v2452_v20 = vld [vmem:[%s2884_s6 + $0x78] sm:$0xf]  ;;  %v2706_v21 = vld [vmem:[%s2884_s6 + $0x80] sm:$0xf0] }
  0xd3   : > { %v1068_v35 = vadd.f32 %v1067_v33, %v747_v32 }
  0xd5   : > { %v699_v34 = vpop.f32.mrf.mxu1  ;;  %v1118_v37 = vpop.f32.mrf.mxu0  ;;  %v3195_v40 = vadd.f32 %v1116_v30, %v1068_v35  ;;  %v2433_v30 = vor.u32 %v2699_v18, %v2430_v19  ;;  %v2611_v18 = vld [vmem:[%s2884_s6 + $0x70] sm:$0xf0] }
  0xd6   : > { %v700_v36 = vadd.f32 %v699_v34, %v650_v56 }
  0xd8   : > { %v748_v47 = vpop.f32.mrf.mxu2  ;;  %v1069_v50 = vpop.f32.mrf.mxu3 }
  0xd9   : > { %v749_v48 = vadd.f32 %v748_v47, %v700_v36  ;;  %v2702_v47 = vld [vmem:[%s2884_s6 + $0x64] sm:$0xf] }
  0xdb   : > { %v1070_v56 = vadd.f32 %v1069_v50, %v749_v48  ;;  %v2442_v48 = vld [vmem:[%s2884_s6 + $0x6c] sm:$0xf0]  ;;  %v2448_v50 = vld [vmem:[%s2884_s6 + $0x68] sm:$0xf] }
  0xdd   : > { %v702_v53 = vpop.f32.mrf.mxu1  ;;  %v1121_v61 = vpop.f32.mrf.mxu0  ;;  %1577 = vmatmul.bf16.gmra.mxu2 %v2417_v52  ;;  %v3203_v62 = vadd.f32 %v1118_v37, %v1070_v56  ;;  %1626 = vmatmul.bf16.gmra.mxu3 %v2421_v58  ;;  %v2441_v56 = vor.u32 %v2703_v46, %v2440_v45  ;;  %v2200_v46 = vld [vmem:[%s2884_s6 + $0x80] sm:$0xf] }
  0xde   : > { %v703_v60 = vadd.f32 %v702_v53, %v653_v4 }
  0xe0   : > { %1169 = vmatmul.bf16.gmra.mxu1 %v2153_v51  ;;  %1675 = vmatmul.bf16.gmra.mxu0 %v2425_v59  ;;  %v751_v63 = vpop.f32.mrf.mxu2  ;;  %v1072_v1 = vpop.f32.mrf.mxu3  ;;  %v2704_v51 = vld [vmem:[%s2884_s6 + $0x70] sm:$0xf0]  ;;  %v2177_v59 = vor.u32 %v2608_v43, %v2176_v42 }
  0xe1   : > { %v752_v0 = vadd.f32 %v751_v63, %v703_v60  ;;  %v2449_v63 = vor.u32 %v2704_v51, %v2448_v50  ;;  %v2464_v50 = vld [vmem:[%s2884_s6 + $0x90] sm:$0xf]  ;;  %v2709_v51 = vld [vmem:[%s2884_s6 + $0x98] sm:$0xf0] }
  0xe3   : > { %v1073_v7 = vadd.f32 %v1072_v1, %v752_v0 }
  0xe5   : > { %v704_v6 = vpop.f32.mrf.mxu1  ;;  %v1123_v4 = vpop.f32.mrf.mxu0  ;;  %v3207_v15 = vadd.f32 %v1121_v61, %v1073_v7  ;;  %v2445_v61 = vor.u32 %v2702_v47, %v2442_v48  ;;  %v2614_v47 = vld [vmem:[%s2884_s6 + $0x88] sm:$0xf0] }
  0xe6   : > { %v705_v8 = vadd.f32 %v704_v6, %v655_v12 }
  0xe8   : > { %v753_v24 = vpop.f32.mrf.mxu2  ;;  %v1074_v26 = vpop.f32.mrf.mxu3 }
  0xe9   : > { %v754_v25 = vadd.f32 %v753_v24, %v705_v8  ;;  %v2705_v24 = vld [vmem:[%s2884_s6 + $0x7c] sm:$0xf] }
  0xeb   : > { %v1075_v12 = vadd.f32 %v1074_v26, %v754_v25  ;;  %v2454_v25 = vld [vmem:[%s2884_s6 + $0x84] sm:$0xf0]  ;;  %v2460_v26 = vld [vmem:[%s2884_s6 + $0x80] sm:$0xf] }
  0xed   : > { %v707_v29 = vpop.f32.mrf.mxu1  ;;  %v1126_v33 = vpop.f32.mrf.mxu0  ;;  %1582 = vmatmul.bf16.gmra.mxu2 %v2429_v28  ;;  %v3216_v34 = vadd.f32 %v1123_v4, %v1075_v12  ;;  %1631 = vmatmul.bf16.gmra.mxu3 %v2433_v30  ;;  %v2453_v12 = vor.u32 %v2706_v21, %v2452_v20  ;;  %v2212_v21 = vld [vmem:[%s2884_s6 + $0x98] sm:$0xf] }
  0xee   : > { %v708_v32 = vadd.f32 %v707_v29, %v3153_v49 }
  0xf0   : > { %1174 = vmatmul.bf16.gmra.mxu1 %v2165_v27  ;;  %1680 = vmatmul.bf16.gmra.mxu0 %v2437_v31  ;;  %v756_v35 = vpop.f32.mrf.mxu2  ;;  %v1077_v37 = vpop.f32.mrf.mxu3  ;;  %v2707_v27 = vld [vmem:[%s2884_s6 + $0x88] sm:$0xf0]  ;;  %v2189_v31 = vor.u32 %v2611_v18, %v2188_v17 }
  0xf1   : > { %v757_v36 = vadd.f32 %v756_v35, %v708_v32 }
  0xf3   : > { %v1078_v39 = vadd.f32 %v1077_v37, %v757_v36 }
  0xf5   : > { %v709_v38 = vpop.f32.mrf.mxu1  ;;  %v1128_v41 = vpop.f32.mrf.mxu0  ;;  %v3221_v44 = vadd.f32 %v1126_v33, %v1078_v39  ;;  %v2457_v33 = vor.u32 %v2705_v24, %v2454_v25  ;;  %v2617_v24 = vld [vmem:[%s2884_s6 + $0xa0] sm:$0xf0] }
  0xf6   : > { %v710_v49 = vadd.f32 %v709_v38, %v3159_v57 }
  0xf8   : > { %v758_v52 = vpop.f32.mrf.mxu2  ;;  %v1079_v58 = vpop.f32.mrf.mxu3 }
  0xf9   : > { %v759_v53 = vadd.f32 %v758_v52, %v710_v49  ;;  %v2708_v52 = vld [vmem:[%s2884_s6 + $0x94] sm:$0xf] }
  0xfb   : > { %v1080_v57 = vadd.f32 %v1079_v58, %v759_v53  ;;  %v2466_v58 = vld [vmem:[%s2884_s6 + $0x9c] sm:$0xf0] }
  0xfd   : > { %v712_v60 = vpop.f32.mrf.mxu1  ;;  %v1131_v1 = vpop.f32.mrf.mxu0  ;;  %1587 = vmatmul.bf16.gmra.mxu2 %v2441_v56  ;;  %v3230_v6 = vadd.f32 %v1128_v41, %v1080_v57  ;;  %1636 = vmatmul.bf16.gmra.mxu3 %v2445_v61  ;;  %v2710_v56 = vld [vmem:[%s2884_s6 + $0xa0] sm:$0xf0]  ;;  %v2465_v57 = vor.u32 %v2709_v51, %v2464_v50 }
  0xfe   : > { %v713_v0 = vadd.f32 %v712_v60, %v3173_v5 }
 0x100   : > { %1179 = vmatmul.bf16.gmra.mxu1 %v2177_v59  ;;  %1685 = vmatmul.bf16.gmra.mxu0 %v2449_v63  ;;  %v761_v7 = vpop.f32.mrf.mxu2  ;;  %v1082_v4 = vpop.f32.mrf.mxu3  ;;  %v2472_v59 = vld [vmem:[%s2884_s6 + $0x98] sm:$0xf]  ;;  %v2201_v63 = vor.u32 %v2614_v47, %v2200_v46 }
 0x101   : > { %v762_v8 = vadd.f32 %v761_v7, %v713_v0  ;;  %v2473_v7 = vor.u32 %v2710_v56, %v2472_v59  ;;  %v2488_v59 = vld [vmem:[%s2884_s6 + $0xc0] sm:$0xf]  ;;  %v2715_v56 = vld [vmem:[%s2884_s6 + $0xc8] sm:$0xf0] }
 0x103   : > { %v1083_v14 = vadd.f32 %v1082_v4, %v762_v8 }
 0x105   : > { %v714_v9 = vpop.f32.mrf.mxu1  ;;  %v1133_v16 = vpop.f32.mrf.mxu0  ;;  %v3235_v19 = vadd.f32 %v1131_v1, %v1083_v14  ;;  %v2469_v1 = vor.u32 %v2708_v52, %v2466_v58  ;;  %v2224_v52 = vld [vmem:[%s2884_s6 + $0xb0] sm:$0xf] }
 0x106   : > { %v715_v5 = vadd.f32 %v714_v9, %v3179_v13  ;;  %v2461_v13 = vor.u32 %v2707_v27, %v2460_v26  ;;  %v2476_v26 = vld [vmem:[%s2884_s6 + $0xa8] sm:$0xf]  ;;  %v2712_v27 = vld [vmem:[%s2884_s6 + $0xb0] sm:$0xf0] }
 0x108   : > { %v763_v28 = vpop.f32.mrf.mxu2  ;;  %v1084_v30 = vpop.f32.mrf.mxu3 }
 0x109   : > { %v764_v29 = vadd.f32 %v763_v28, %v715_v5  ;;  %v2711_v28 = vld [vmem:[%s2884_s6 + $0xac] sm:$0xf] }
 0x10b   : > { %v1085_v35 = vadd.f32 %v1084_v30, %v764_v29  ;;  %v2478_v30 = vld [vmem:[%s2884_s6 + $0xb4] sm:$0xf0] }
 0x10d   : > { %v717_v32 = vpop.f32.mrf.mxu1  ;;  %v1136_v36 = vpop.f32.mrf.mxu0  ;;  %1592 = vmatmul.bf16.gmra.mxu2 %v2453_v12  ;;  %v3243_v37 = vadd.f32 %v1133_v16, %v1085_v35  ;;  %1641 = vmatmul.bf16.gmra.mxu3 %v2457_v33  ;;  %v2713_v12 = vld [vmem:[%s2884_s6 + $0xb8] sm:$0xf0]  ;;  %v2477_v35 = vor.u32 %v2712_v27, %v2476_v26 }
 0x10e   : > { %v718_v38 = vadd.f32 %v717_v32, %v3155_v54 }
 0x110   : > { %1184 = vmatmul.bf16.gmra.mxu1 %v2189_v31  ;;  %1690 = vmatmul.bf16.gmra.mxu0 %v2461_v13  ;;  %v766_v39 = vpop.f32.mrf.mxu2  ;;  %v1087_v41 = vpop.f32.mrf.mxu3  ;;  %v2484_v31 = vld [vmem:[%s2884_s6 + $0xb0] sm:$0xf]  ;;  %v2213_v13 = vor.u32 %v2617_v24, %v2212_v21 }
 0x111   : > { %v767_v49 = vadd.f32 %v766_v39, %v718_v38  ;;  %v2481_v38 = vor.u32 %v2711_v28, %v2478_v30  ;;  %v2485_v39 = vor.u32 %v2713_v12, %v2484_v31 }
 0x113   : > { %v1088_v43 = vadd.f32 %v1087_v41, %v767_v49 }
 0x115   : > { %v719_v42 = vpop.f32.mrf.mxu1  ;;  %v1138_v45 = vpop.f32.mrf.mxu0  ;;  %v3248_v48 = vadd.f32 %v1136_v36, %v1088_v43 }
 0x116   : > { %v720_v53 = vadd.f32 %v719_v42, %v3169_v2 }
 0x118   : > { %v768_v54 = vpop.f32.mrf.mxu2  ;;  %v1089_v61 = vpop.f32.mrf.mxu3 }
 0x119   : > { %v769_v60 = vadd.f32 %v768_v54, %v720_v53  ;;  %v2620_v53 = vld [vmem:[%s2884_s6 + $0xb8] sm:$0xf0]  ;;  %v2714_v54 = vld [vmem:[%s2884_s6 + $0xc4] sm:$0xf] }
 0x11b   : > { %v1090_v8 = vadd.f32 %v1089_v61, %v769_v60  ;;  %v2490_v61 = vld [vmem:[%s2884_s6 + $0xcc] sm:$0xf0] }
 0x11d   : > { %v722_v0 = vpop.f32.mrf.mxu1  ;;  %v1141_v4 = vpop.f32.mrf.mxu0  ;;  %1597 = vmatmul.bf16.gmra.mxu2 %v2465_v57  ;;  %v3257_v2 = vadd.f32 %v1138_v45, %v1090_v8  ;;  %1646 = vmatmul.bf16.gmra.mxu3 %v2469_v1  ;;  %v2716_v57 = vld [vmem:[%s2884_s6 + $0xd0] sm:$0xf0]  ;;  %v2489_v8 = vor.u32 %v2715_v56, %v2488_v59 }
 0x11e   : > { %v723_v9 = vadd.f32 %v722_v0, %v3175_v10 }
 0x120   : > { %1189 = vmatmul.bf16.gmra.mxu1 %v2201_v63  ;;  %1695 = vmatmul.bf16.gmra.mxu0 %v2473_v7  ;;  %v771_v14 = vpop.f32.mrf.mxu2  ;;  %v1092_v16 = vpop.f32.mrf.mxu3  ;;  %v2496_v63 = vld [vmem:[%s2884_s6 + $0xc8] sm:$0xf]  ;;  %v2225_v7 = vor.u32 %v2620_v53, %v2224_v52  ;;  %s2596_s6 = sshll.u32 %s3370_s12, 7 }
 0x121   : > { %v772_v5 = vadd.f32 %v771_v14, %v723_v9  ;;  %v2493_v9 = vor.u32 %v2714_v54, %v2490_v61  ;;  %v2497_v14 = vor.u32 %v2716_v57, %v2496_v63  ;;  %s3303_s9 = scalar_lea.vmem %s3364_s3, %s2596_s6 }
 0x123   : > { %v1093_v18 = vadd.f32 %v1092_v16, %v772_v5 }
 0x125   : > { %v724_v17 = vpop.f32.mrf.mxu1  ;;  %v1143_v20 = vpop.f32.mrf.mxu0  ;;  %v3262_v25 = vadd.f32 %v1141_v4, %v1093_v18 }
 0x126   : > { %v725_v29 = vadd.f32 %v724_v17, %v3189_v22 }
 0x128   : > { %v773_v10 = vpop.f32.mrf.mxu2  ;;  %v1094_v33 = vpop.f32.mrf.mxu3 }
 0x129   : > { %v774_v32 = vadd.f32 %v773_v10, %v725_v29 }
 0x12b   : > { %v1095_v49 = vadd.f32 %v1094_v33, %v774_v32 }
 0x12d   : > { %v727_v36 = vpop.f32.mrf.mxu1  ;;  %v1146_v41 = vpop.f32.mrf.mxu0  ;;  %1602 = vmatmul.bf16.gmra.mxu2 %v2477_v35  ;;  %v3271_v22 = vadd.f32 %v1143_v20, %v1095_v49  ;;  %1651 = vmatmul.bf16.gmra.mxu3 %v2481_v38 }
 0x12e   : > { %v728_v42 = vadd.f32 %v727_v36, %v3157_v55 }
 0x130   : > { %1194 = vmatmul.bf16.gmra.mxu1 %v2213_v13  ;;  %1700 = vmatmul.bf16.gmra.mxu0 %v2485_v39  ;;  %v776_v43 = vpop.f32.mrf.mxu2  ;;  %v1097_v46 = vpop.f32.mrf.mxu3 }
 0x131   : > { %v777_v45 = vadd.f32 %v776_v43, %v728_v42 }
 0x133   : > { %v1098_v50 = vadd.f32 %v1097_v46, %v777_v45 }
 0x135   : > { %v729_v47 = vpop.f32.mrf.mxu1  ;;  %v1148_v51 = vpop.f32.mrf.mxu0  ;;  %v3276_v58 = vadd.f32 %v1146_v41, %v1098_v50 }
 0x136   : > { %v730_v60 = vadd.f32 %v729_v47, %v3171_v3 }
 0x138   : > { %v778_v55 = vpop.f32.mrf.mxu2  ;;  %v1099_v1 = vpop.f32.mrf.mxu3 }
 0x139   : > { %v779_v0 = vadd.f32 %v778_v55, %v730_v60 }
 0x13b   : > { %v1100_v5 = vadd.f32 %v1099_v1, %v779_v0 }
 0x13d   : > { %v732_v4 = vpop.f32.mrf.mxu1  ;;  %v1151_v16 = vpop.f32.mrf.mxu0  ;;  %1607 = vmatmul.bf16.gmra.mxu2 %v2489_v8  ;;  %v3285_v17 = vadd.f32 %v1148_v51, %v1100_v5  ;;  %1656 = vmatmul.bf16.gmra.mxu3 %v2493_v9 }
 0x13e   : > { %v733_v3 = vadd.f32 %v732_v4, %v3177_v11 }
 0x140   : > { %1199 = vmatmul.bf16.gmra.mxu1 %v2225_v7  ;;  %1705 = vmatmul.bf16.gmra.mxu0 %v2497_v14  ;;  %v781_v18 = vpop.f32.mrf.mxu2  ;;  %v1102_v21 = vpop.f32.mrf.mxu3 }
 0x141   : > { %v782_v20 = vadd.f32 %v781_v18, %v733_v3 }
 0x143   : > { %v1103_v26 = vadd.f32 %v1102_v21, %v782_v20 }
 0x145   : > { %v734_v24 = vpop.f32.mrf.mxu1  ;;  %v1153_v27 = vpop.f32.mrf.mxu0  ;;  %v3288_v28 = vadd.f32 %v1151_v16, %v1103_v26 }
 0x146   : > { %v735_v29 = vadd.f32 %v734_v24, %v3191_v23  ;;  %v3298_v23 = vld [vmem:[%s3363_s2] ss:$0 sm:$0xff] }
 0x148   : > { %v783_v30 = vpop.f32.mrf.mxu2  ;;  %v1104_v12 = vpop.f32.mrf.mxu3 }
 0x149   : > { %v784_v31 = vadd.f32 %v783_v30, %v735_v29 }
 0x14b   : > { %v1105_v32 = vadd.f32 %v1104_v12, %v784_v31 }
 0x14d   : > { %v1165_v10 = vpop.f32.mrf.mxu1  ;;  %v1671_v33 = vpop.f32.mrf.mxu0  ;;  %v3291_v13 = vadd.f32 %v1153_v27, %v1105_v32 }
 0x14e   : > { %v1166_v49 = vadd.f32 %v1165_v10, %v3195_v40 }
 0x150   : > { %v1573_v11 = vpop.f32.mrf.mxu2  ;;  %v1622_v35 = vpop.f32.mrf.mxu3 }
 0x151   : > { %v1623_v36 = vadd.f32 %v1622_v35, %v1573_v11 }
 0x153   : > { %v1672_v41 = vadd.f32 %v1671_v33, %v1623_v36 }
 0x155   : > { %v1167_v38 = vpop.f32.mrf.mxu1  ;;  %v1673_v39 = vpop.f32.mrf.mxu0  ;;  %v1711_v42 = vadd.f32 %v1672_v41, %v1166_v49 }
 0x156   : > { %v1168_v51 = vadd.f32 %v1167_v38, %v3203_v62 }
 0x157   : > { %v1731_v43 = vadd.f32 %v3298_v23, %v1711_v42 }
 0x158   : > { %v1575_v45 = vpop.f32.mrf.mxu2  ;;  %v1624_v46 = vpop.f32.mrf.mxu3 }
 0x159   : > { %1747 = vst [vmem:[%s3303_s9] sm:$0xff] %v1731_v43  ;;  %v1625_v40 = vadd.f32 %v1624_v46, %v1575_v45 }
 0x15b   : > { %v1674_v52 = vadd.f32 %v1673_v39, %v1625_v40 }
 0x15d   : > { %v1170_v47 = vpop.f32.mrf.mxu1  ;;  %v1676_v50 = vpop.f32.mrf.mxu0  ;;  %v1712_v53 = vadd.f32 %v1674_v52, %v1168_v51 }
 0x15e   : > { %v1171_v57 = vadd.f32 %v1170_v47, %v3207_v15 }
 0x15f   : > { %v1732_v59 = vadd.f32 %v3298_v23, %v1712_v53 }
 0x160   : > { %v1578_v56 = vpop.f32.mrf.mxu2  ;;  %v1627_v54 = vpop.f32.mrf.mxu3 }
 0x161   : > { %1748 = vst [vmem:[%s3303_s9 + $0x8] sm:$0xff] %v1732_v59  ;;  %v1628_v60 = vadd.f32 %v1627_v54, %v1578_v56 }
 0x163   : > { %v1677_v55 = vadd.f32 %v1676_v50, %v1628_v60 }
 0x165   : > { %v1172_v61 = vpop.f32.mrf.mxu1  ;;  %v1678_v63 = vpop.f32.mrf.mxu0  ;;  %v1713_v0 = vadd.f32 %v1677_v55, %v1171_v57 }
 0x166   : > { %v1173_v14 = vadd.f32 %v1172_v61, %v3216_v34 }
 0x167   : > { %v1733_v1 = vadd.f32 %v3298_v23, %v1713_v0 }
 0x168   : > { %v1580_v7 = vpop.f32.mrf.mxu2  ;;  %v1629_v62 = vpop.f32.mrf.mxu3 }
 0x169   : > { %1749 = vst [vmem:[%s3303_s9 + $0x10] sm:$0xff] %v1733_v1  ;;  %v1630_v8 = vadd.f32 %v1629_v62, %v1580_v7 }
 0x16b   : > { %v1679_v5 = vadd.f32 %v1678_v63, %v1630_v8 }
 0x16d   : > { %v1175_v4 = vpop.f32.mrf.mxu1  ;;  %v1681_v9 = vpop.f32.mrf.mxu0  ;;  %v1714_v16 = vadd.f32 %v1679_v5, %v1173_v14 }
 0x16e   : > { %v1176_v26 = vadd.f32 %v1175_v4, %v3221_v44 }
 0x16f   : > { %v1734_v3 = vadd.f32 %v3298_v23, %v1714_v16 }
 0x170   : > { %v1583_v18 = vpop.f32.mrf.mxu2  ;;  %v1632_v15 = vpop.f32.mrf.mxu3 }
 0x171   : > { %1750 = vst [vmem:[%s3303_s9 + $0x18] sm:$0xff] %v1734_v3  ;;  %v1633_v20 = vadd.f32 %v1632_v15, %v1583_v18 }
 0x173   : > { %v1682_v27 = vadd.f32 %v1681_v9, %v1633_v20 }
 0x175   : > { %v1177_v21 = vpop.f32.mrf.mxu1  ;;  %v1683_v24 = vpop.f32.mrf.mxu0  ;;  %v1715_v29 = vadd.f32 %v1682_v27, %v1176_v26 }
 0x176   : > { %v1178_v33 = vadd.f32 %v1177_v21, %v3230_v6 }
 0x177   : > { %v1735_v30 = vadd.f32 %v3298_v23, %v1715_v29 }
 0x178   : > { %v1585_v31 = vpop.f32.mrf.mxu2  ;;  %v1634_v34 = vpop.f32.mrf.mxu3 }
 0x179   : > { %1751 = vst [vmem:[%s3303_s9 + $0x20] sm:$0xff] %v1735_v30  ;;  %v1635_v12 = vadd.f32 %v1634_v34, %v1585_v31 }
 0x17b   : > { %v1684_v11 = vadd.f32 %v1683_v24, %v1635_v12 }
 0x17d   : > { %v1180_v10 = vpop.f32.mrf.mxu1  ;;  %v1686_v32 = vpop.f32.mrf.mxu0  ;;  %v1716_v35 = vadd.f32 %v1684_v11, %v1178_v33 }
 0x17e   : > { %v1181_v42 = vadd.f32 %v1180_v10, %v3235_v19 }
 0x17f   : > { %v1736_v36 = vadd.f32 %v3298_v23, %v1716_v35 }
 0x180   : > { %v1588_v38 = vpop.f32.mrf.mxu2  ;;  %v1637_v44 = vpop.f32.mrf.mxu3 }
 0x181   : > { %1752 = vst [vmem:[%s3303_s9 + $0x28] sm:$0xff] %v1736_v36  ;;  %v1638_v39 = vadd.f32 %v1637_v44, %v1588_v38 }
 0x183   : > { %v1687_v43 = vadd.f32 %v1686_v32, %v1638_v39 }
 0x185   : > { %v1182_v49 = vpop.f32.mrf.mxu1  ;;  %v1688_v41 = vpop.f32.mrf.mxu0  ;;  %v1717_v45 = vadd.f32 %v1687_v43, %v1181_v42 }
 0x186   : > { %v1183_v52 = vadd.f32 %v1182_v49, %v3243_v37 }
 0x187   : > { %v1737_v46 = vadd.f32 %v3298_v23, %v1717_v45 }
 0x188   : > { %v1590_v40 = vpop.f32.mrf.mxu2  ;;  %v1639_v6 = vpop.f32.mrf.mxu3 }
 0x189   : > { %1753 = vst [vmem:[%s3303_s9 + $0x30] sm:$0xff] %v1737_v46  ;;  %v1640_v47 = vadd.f32 %v1639_v6, %v1590_v40 }
 0x18b   : > { %v1689_v53 = vadd.f32 %v1688_v41, %v1640_v47 }
 0x18d   : > { %v1185_v50 = vpop.f32.mrf.mxu1  ;;  %v1691_v51 = vpop.f32.mrf.mxu0  ;;  %v1718_v59 = vadd.f32 %v1689_v53, %v1183_v52 }
 0x18e   : > { %v1186_v57 = vadd.f32 %v1185_v50, %v3248_v48 }
 0x18f   : > { %v1738_v56 = vadd.f32 %v3298_v23, %v1718_v59 }
 0x190   : > { %v1593_v54 = vpop.f32.mrf.mxu2  ;;  %v1642_v19 = vpop.f32.mrf.mxu3 }
 0x191   : > { %1754 = vst [vmem:[%s3303_s9 + $0x38] sm:$0xff] %v1738_v56  ;;  %v1643_v60 = vadd.f32 %v1642_v19, %v1593_v54 }
 0x193   : > { %v1692_v55 = vadd.f32 %v1691_v51, %v1643_v60 }
 0x195   : > { %v1187_v61 = vpop.f32.mrf.mxu1  ;;  %v1693_v63 = vpop.f32.mrf.mxu0  ;;  %v1719_v0 = vadd.f32 %v1692_v55, %v1186_v57 }
 0x196   : > { %v1188_v9 = vadd.f32 %v1187_v61, %v3257_v2 }
 0x197   : > { %v1739_v1 = vadd.f32 %v3298_v23, %v1719_v0 }
 0x198   : > { %v1595_v7 = vpop.f32.mrf.mxu2  ;;  %v1644_v37 = vpop.f32.mrf.mxu3 }
 0x199   : > { %1755 = vst [vmem:[%s3303_s9 + $0x40] sm:$0xff] %v1739_v1  ;;  %v1645_v62 = vadd.f32 %v1644_v37, %v1595_v7 }
 0x19b   : > { %v1694_v14 = vadd.f32 %v1693_v63, %v1645_v62 }
 0x19d   : > { %v1190_v8 = vpop.f32.mrf.mxu1  ;;  %v1696_v4 = vpop.f32.mrf.mxu0  ;;  %v1720_v5 = vadd.f32 %v1694_v14, %v1188_v9 }
 0x19e   : > { %v1191_v21 = vadd.f32 %v1190_v8, %v3262_v25 }
 0x19f   : > { %v1740_v16 = vadd.f32 %v3298_v23, %v1720_v5 }
 0x1a0   : > { %v1598_v3 = vpop.f32.mrf.mxu2  ;;  %v1647_v48 = vpop.f32.mrf.mxu3 }
 0x1a1   : > { %1756 = vst [vmem:[%s3303_s9 + $0x48] sm:$0xff] %v1740_v16  ;;  %v1648_v18 = vadd.f32 %v1647_v48, %v1598_v3 }
 0x1a3   : > { %v1697_v24 = vadd.f32 %v1696_v4, %v1648_v18 }
 0x1a5   : > { %v1192_v15 = vpop.f32.mrf.mxu1  ;;  %v1698_v20 = vpop.f32.mrf.mxu0  ;;  %v1721_v26 = vadd.f32 %v1697_v24, %v1191_v21 }
 0x1a6   : > { %v1193_v34 = vadd.f32 %v1192_v15, %v3271_v22 }
 0x1a7   : > { %v1741_v27 = vadd.f32 %v3298_v23, %v1721_v26 }
 0x1a8   : > { %v1600_v29 = vpop.f32.mrf.mxu2  ;;  %v1649_v2 = vpop.f32.mrf.mxu3 }
 0x1a9   : > { %1757 = vst [vmem:[%s3303_s9 + $0x50] sm:$0xff] %v1741_v27  ;;  %v1650_v30 = vadd.f32 %v1649_v2, %v1600_v29 }
 0x1ab   : > { %v1699_v12 = vadd.f32 %v1698_v20, %v1650_v30 }
 0x1ad   : > { %v1195_v31 = vpop.f32.mrf.mxu1  ;;  %v1701_v10 = vpop.f32.mrf.mxu0  ;;  %v1722_v32 = vadd.f32 %v1699_v12, %v1193_v34 }
 0x1ae   : > { %v1196_v36 = vadd.f32 %v1195_v31, %v3276_v58 }
 0x1af   : > { %v1742_v33 = vadd.f32 %v3298_v23, %v1722_v32 }
 0x1b0   : > { %v1603_v11 = vpop.f32.mrf.mxu2  ;;  %v1652_v25 = vpop.f32.mrf.mxu3 }
 0x1b1   : > { %1758 = vst [vmem:[%s3303_s9 + $0x58] sm:$0xff] %v1742_v33  ;;  %v1653_v35 = vadd.f32 %v1652_v25, %v1603_v11 }
 0x1b3   : > { %v1702_v38 = vadd.f32 %v1701_v10, %v1653_v35 }
 0x1b5   : > { %v1197_v44 = vpop.f32.mrf.mxu1  ;;  %v1723_v39 = vadd.f32 %v1702_v38, %v1196_v36  ;;  %v1703_v49 = vpop.f32.mrf.mxu0 }
 0x1b6   : > { %v1198_v45 = vadd.f32 %v1197_v44, %v3285_v17 }
 0x1b7   : > { %v1743_v41 = vadd.f32 %v3298_v23, %v1723_v39 }
 0x1b8   : > { %v1605_v22 = vpop.f32.mrf.mxu2  ;;  %v1654_v42 = vpop.f32.mrf.mxu3 }
 0x1b9   : > { %1759 = vst [vmem:[%s3303_s9 + $0x60] sm:$0xff] %v1743_v41  ;;  %v1655_v43 = vadd.f32 %v1654_v42, %v1605_v22 }
 0x1bb   : > { %v1704_v46 = vadd.f32 %v1703_v49, %v1655_v43 }
 0x1bd   : > { %v1724_v40 = vadd.f32 %v1704_v46, %v1198_v45  ;;  %v1200_v6 = vpop.f32.mrf.mxu1  ;;  %v1706_v50 = vpop.f32.mrf.mxu0 }
 0x1be   : > { %v1201_v53 = vadd.f32 %v1200_v6, %v3288_v28 }
 0x1bf   : > { %v1744_v47 = vadd.f32 %v3298_v23, %v1724_v40 }
 0x1c0   : > { %v1608_v58 = vpop.f32.mrf.mxu2  ;;  %v1657_v51 = vpop.f32.mrf.mxu3 }
 0x1c1   : > { %1760 = vst [vmem:[%s3303_s9 + $0x68] sm:$0xff] %v1744_v47  ;;  %v1658_v52 = vadd.f32 %v1657_v51, %v1608_v58 }
 0x1c3   : > { %v1707_v59 = vadd.f32 %v1706_v50, %v1658_v52 }
 0x1c5   : > { %v1725_v56 = vadd.f32 %v1707_v59, %v1201_v53  ;;  %v1202_v17 = vpop.f32.mrf.mxu1  ;;  %v1708_v63 = vpop.f32.mrf.mxu0 }
 0x1c6   : > { %v1203_v57 = vadd.f32 %v1202_v17, %v3291_v13 }
 0x1c7   : > { %v1745_v54 = vadd.f32 %v3298_v23, %v1725_v56 }
 0x1c8   : > { %v1610_v19 = vpop.f32.mrf.mxu2  ;;  %v1659_v60 = vpop.f32.mrf.mxu3 }
 0x1c9   : > { %1761 = vst [vmem:[%s3303_s9 + $0x70] sm:$0xff] %v1745_v54  ;;  %v1660_v61 = vadd.f32 %v1659_v60, %v1610_v19 }
 0x1cb   : > { %v1709_v55 = vadd.f32 %v1708_v63, %v1660_v61 }
 0x1cd   : > { %v1726_v0 = vadd.f32 %v1709_v55, %v1203_v57 }
 0x1cf   : > { %v1746_v1 = vadd.f32 %v3298_v23, %v1726_v0 }
 0x1d1   : > { %1762 = vst [vmem:[%s3303_s9 + $0x78] sm:$0xff] %v1746_v1 }
 0x1d2 PF: > { %s13_s14 = sadd.s32 1, %s2813_s14   ;;  %s3365_s12 = smov %s2809_s13 }
 0x1d3   : > { %p10_p5 = scmp.ge.s32.totalorder %s13_s14, 6   ;;  %s3366_s13 = smov %s3368_s15 }
 0x1d5   :  { %12 = sbr.rel (!%p10_p5) target bundleno = 2 (0x2), region = 67 }

</bundles_post_ra>
